<compile_context>
chip_gen: v5e
topology: v5e:2x2
jax: 0.10.0
libtpu: 0.0.40
codegen_flags: <defaults>
</compile_context>

<pallas_src>
import functools

import jax
import jax.numpy as jnp
import numpy as np
from jax import lax
from jax.experimental import pallas as pl
from jax.experimental.pallas import tpu as pltpu

_LANES = 128


def _round_up(x, m):
    return (x + m - 1) // m * m


def _vmem_limit_bytes():
    # Derive from hardware (v5e/v6e: 128 MiB, v7x: 64 MiB); stay well below.
    try:
        cap = pltpu.get_tpu_info().vmem_capacity_bytes
        return min(cap // 2, 64 * 1024 * 1024)
    except Exception:
        return 32 * 1024 * 1024  # conservative fallback, safe on all chips


# ---------------------------------------------------------------------------
# Fused kernel: per grid step, conv(+bias+ReLU) of one image via a single
# implicit-im2col MXU matmul written into the VMEM-resident output block; the
# last step computes batch-norm statistics (two-pass) and applies the affine
# in place.
# ---------------------------------------------------------------------------
def _conv_relu_bn_kernel(xp_ref, w_ref, b_ref, g_ref, beta_ref, out_ref,
                         sum_sc, *, n, rows, kh, kw, stride, oh, ow, cin,
                         eps, count):
    # xp_ref:   (1, HP, WP, Cin)   zero-padded input image for this grid step
    # w_ref:    (KH*KW*Cin, Cpad)  weight reshaped for im2col, Cout zero-padded
    # b_ref, g_ref, beta_ref: (1, Cpad)
    # out_ref:  (N*OH*OW, Cpad)    VMEM-resident across all grid steps
    # sum_sc:   (1, Cpad)          running per-channel sum of y (for the mean)
    step = pl.program_id(0)

    @pl.when(step == 0)
    def _init():
        sum_sc[...] = jnp.zeros_like(sum_sc)

    # ---- conv + bias + ReLU for this image: ONE fused MXU matmul ----------
    x_img = xp_ref[0]                                   # (HP, WP, Cin)
    taps = []
    for i in range(kh):                                 # static unroll (3x3)
        row_hi = i + (oh - 1) * stride + 1
        for j in range(kw):
            col_hi = j + (ow - 1) * stride + 1
            xs = lax.slice(x_img, (i, j, 0), (row_hi, col_hi, cin),
                           (stride, stride, 1))         # (OH, OW, Cin)
            taps.append(xs.reshape(rows, cin))          # layout-preserving
    lhs = jnp.concatenate(taps, axis=-1)                # (rows, KH*KW*Cin)

    y = jnp.dot(lhs, w_ref[...], preferred_element_type=jnp.float32)
    y = jnp.maximum(y + b_ref[...], 0.0)                # bias + ReLU (f32)

    r0 = pl.multiple_of(step * rows, rows)
    out_ref[pl.ds(r0, rows), :] = y                     # full-width lane store
    sum_sc[...] += jnp.sum(y, axis=0, keepdims=True)

    # ---- last step: BatchNorm over the whole VMEM-resident activation -----
    @pl.when(step == n - 1)
    def _bn():
        inv_n = 1.0 / count
        mean = sum_sc[...] * inv_n                      # (1, Cpad)

        # Two-pass variance (sum of squared deviations) -> no cancellation.
        def var_body(b, acc):
            q0 = pl.multiple_of(b * rows, rows)
            d = out_ref[pl.ds(q0, rows), :] - mean
            return acc + jnp.sum(d * d, axis=0, keepdims=True)

        ssq = lax.fori_loop(0, n, var_body, jnp.zeros_like(mean), unroll=True)
        inv_std = lax.rsqrt(ssq * inv_n + eps)          # EUP
        scale = g_ref[...] * inv_std                    # fused BN affine
        shift = beta_ref[...] - mean * scale

        def apply_body(b, carry):
            q0 = pl.multiple_of(b * rows, rows)
            yb = out_ref[pl.ds(q0, rows), :]
            out_ref[pl.ds(q0, rows), :] = yb * scale + shift
            return carry

        lax.fori_loop(0, n, apply_body, 0, unroll=True)


def conv_relu_bn(x_nchw, weight, bias, gamma, beta, *, stride, padding,
                 eps=1e-5):
    """Forward of the PyTorch `Conv` module (Conv2d -> ReLU -> BatchNorm2d).

    x_nchw:  (N, Cin, H, W)        float32
    weight:  (Cout, Cin, KH, KW)   float32 (PyTorch conv weight layout)
    bias, gamma, beta: (Cout,)
    returns: (N, Cout, OH, OW)
    """
    n, cin, h, w = x_nchw.shape
    cout, _, kh, kw = weight.shape
    oh = (h + 2 * padding - kh) // stride + 1
    ow = (w + 2 * padding - kw) // stride + 1
    rows = oh * ow
    r = n * rows
    cpad = _round_up(cout, _LANES)          # lane-dense output channels
    ktot = kh * kw * cin                    # im2col contraction depth

    # Layout constraint of this kernel (true for the tested shape: 256 % 8 == 0).
    assert rows % 8 == 0, "OH*OW must be a multiple of 8 for this kernel"

    # --- wrapper glue: layout + zero padding only (no im2col in HBM) ---
    x_nhwc = jnp.transpose(x_nchw, (0, 2, 3, 1))
    xp = jnp.pad(x_nhwc, ((0, 0), (padding, padding), (padding, padding), (0, 0)))
    hp, wp = h + 2 * padding, w + 2 * padding

    # (Cout,Cin,KH,KW) -> (KH,KW,Cin,Cout) -> (KH*KW*Cin, Cout) -> pad lanes.
    w2d = jnp.transpose(weight, (2, 3, 1, 0)).reshape(ktot, cout)
    w_pad = jnp.pad(w2d, ((0, 0), (0, cpad - cout)))
    b_pad = jnp.pad(bias.reshape(1, cout), ((0, 0), (0, cpad - cout)))
    g_pad = jnp.pad(gamma.reshape(1, cout), ((0, 0), (0, cpad - cout)))
    be_pad = jnp.pad(beta.reshape(1, cout), ((0, 0), (0, cpad - cout)))

    out2d = pl.pallas_call(
        functools.partial(_conv_relu_bn_kernel,
                          n=n, rows=rows, kh=kh, kw=kw, stride=stride,
                          oh=oh, ow=ow, cin=cin, eps=eps, count=float(r)),
        out_shape=jax.ShapeDtypeStruct((r, cpad), jnp.float32),
        grid=(n,),
        in_specs=[
            pl.BlockSpec((1, hp, wp, cin), lambda i: (i, 0, 0, 0)),
            pl.BlockSpec((ktot, cpad), lambda i: (0, 0)),
            pl.BlockSpec((1, cpad), lambda i: (0, 0)),
            pl.BlockSpec((1, cpad), lambda i: (0, 0)),
            pl.BlockSpec((1, cpad), lambda i: (0, 0)),
        ],
        # Constant index map => output block stays resident in VMEM across the
        # whole grid and is written back to HBM exactly once at the end.
        out_specs=pl.BlockSpec((r, cpad), lambda i: (0, 0)),
        scratch_shapes=[pltpu.VMEM((1, cpad), jnp.float32)],
        compiler_params=pltpu.CompilerParams(
            dimension_semantics=("arbitrary",),
            vmem_limit_bytes=_vmem_limit_bytes()),
    )(xp, w_pad, b_pad, g_pad, be_pad)

    # --- wrapper glue: drop channel padding, back to NCHW (tiny, XLA-fused) ---
    out_nhwc = out2d[:, :cout].reshape(n, oh, ow, cout)
    return jnp.transpose(out_nhwc, (0, 3, 1, 2))


def _reference(x_nchw, weight, bias, gamma, beta, stride, padding, eps=1e-5):
    """Pure-JAX reference matching PyTorch Conv2d -> ReLU -> BatchNorm2d(train)."""
    y = lax.conv_general_dilated(
        x_nchw, weight,
        window_strides=(stride, stride),
        padding=((padding, padding), (padding, padding)),
        dimension_numbers=("NCHW", "OIHW", "NCHW"),
    ) + bias.reshape(1, -1, 1, 1)
    y = jnp.maximum(y, 0.0)
    mean = jnp.mean(y, axis=(0, 2, 3), keepdims=True)
    var = jnp.mean((y - mean) ** 2, axis=(0, 2, 3), keepdims=True)
    return (y - mean) / jnp.sqrt(var + eps) * gamma.reshape(1, -1, 1, 1) \
        + beta.reshape(1, -1, 1, 1)


if __name__ == "__main__":
    # Small shapes consistent with the module: N=2, Cin=4, H=W=16,
    # Cout=8, kernel=3, stride=1, padding=1.
    N, CIN, H, W = 2, 4, 16, 16
    COUT, KH, KW = 8, 3, 3
    STRIDE, PADDING = 1, 1

    key = jax.random.PRNGKey(0)
    kx, kw_, kb = jax.random.split(key, 3)
    x = jax.random.normal(kx, (N, CIN, H, W), dtype=jnp.float32)
    weight = 0.1 * jax.random.normal(kw_, (COUT, CIN, KH, KW), dtype=jnp.float32)
    bias = 0.1 * jax.random.normal(kb, (COUT,), dtype=jnp.float32)
    gamma = jnp.ones((COUT,), dtype=jnp.float32)   # BatchNorm2d default init
    beta = jnp.zeros((COUT,), dtype=jnp.float32)   # BatchNorm2d default init

    out = conv_relu_bn(x, weight, bias, gamma, beta,
                       stride=STRIDE, padding=PADDING)
    out = jax.block_until_ready(out)

    ref = jax.block_until_ready(
        _reference(x, weight, bias, gamma, beta, STRIDE, PADDING))

    assert out.shape == (N, COUT, H, W), out.shape
    np.testing.assert_allclose(np.asarray(out), np.asarray(ref),
                               rtol=1e-4, atol=1e-4)
    print("KERNEL_OK")
</pallas_src>

<mosaic_0001>
module attributes {stable_mosaic.version = 11 : i64} {
  func.func @_conv_relu_bn_kernel(%arg0: i32, %arg1: memref<1x18x18x4xf32, #tpu.memory_space<vmem>>, %arg2: memref<36x128xf32, #tpu.memory_space<vmem>>, %arg3: memref<1x128xf32, #tpu.memory_space<vmem>>, %arg4: memref<1x128xf32, #tpu.memory_space<vmem>>, %arg5: memref<1x128xf32, #tpu.memory_space<vmem>>, %arg6: memref<512x128xf32, #tpu.memory_space<vmem>>, %arg7: memref<1x128xf32, #tpu.memory_space<vmem>>) attributes {dimension_semantics = [#tpu.dimension_semantics<arbitrary>], iteration_bounds = array<i64: 2>, scalar_prefetch = 0 : i64, scratch_operands = 1 : i64, tpu.core_type = #tpu.core_type<tc>, window_params = [{transform_indices = @transform_0, window_bounds = array<i64: 1, 18, 18, 4>}, {pipeline_mode = #tpu.pipeline_mode<synchronous>, transform_indices = @transform_1, window_bounds = array<i64: 36, 128>}, {pipeline_mode = #tpu.pipeline_mode<synchronous>, transform_indices = @transform_2, window_bounds = array<i64: 1, 128>}, {pipeline_mode = #tpu.pipeline_mode<synchronous>, transform_indices = @transform_3, window_bounds = array<i64: 1, 128>}, {pipeline_mode = #tpu.pipeline_mode<synchronous>, transform_indices = @transform_4, window_bounds = array<i64: 1, 128>}, {pipeline_mode = #tpu.pipeline_mode<synchronous>, transform_indices = @transform_5, window_bounds = array<i64: 512, 128>}]} {
    %c0_i32 = arith.constant 0 : i32
    %0 = arith.cmpi eq, %arg0, %c0_i32 : i32
    %1 = arith.extui %0 : i1 to i32
    %c0_i32_0 = arith.constant 0 : i32
    %2 = arith.cmpi ne, %1, %c0_i32_0 : i32
    scf.if %2 {
      %cst_16 = arith.constant 0.000000e+00 : f32
      %43 = vector.broadcast %cst_16 : f32 to vector<1x128xf32>
      %c0_17 = arith.constant 0 : index
      %c0_18 = arith.constant 0 : index
      %44 = vector.load %arg7[%c0_17, %c0_18] : memref<1x128xf32, #tpu.memory_space<vmem>>, vector<1x128xf32>
      tpu.vector_store %arg7[%c0_17, %c0_18], %43 {strides = array<i32>} : memref<1x128xf32, #tpu.memory_space<vmem>>, vector<1x128xf32>,
    } else {
    }
    %c0 = arith.constant 0 : index
    %c0_1 = arith.constant 0 : index
    %c0_2 = arith.constant 0 : index
    %c0_3 = arith.constant 0 : index
    %3 = vector.load %arg1[%c0, %c0_1, %c0_2, %c0_3] : memref<1x18x18x4xf32, #tpu.memory_space<vmem>>, vector<1x18x18x4xf32>
    %4 = vector.shape_cast %3 : vector<1x18x18x4xf32> to vector<18x18x4xf32>
    %5 = vector.extract_strided_slice %4 {offsets = [0, 0, 0], sizes = [16, 16, 4], strides = [1, 1, 1]} : vector<18x18x4xf32> to vector<16x16x4xf32>
    %6 = vector.shape_cast %5 : vector<16x16x4xf32> to vector<256x4xf32>
    %7 = vector.extract_strided_slice %4 {offsets = [0, 1, 0], sizes = [16, 16, 4], strides = [1, 1, 1]} : vector<18x18x4xf32> to vector<16x16x4xf32>
    %8 = vector.shape_cast %7 : vector<16x16x4xf32> to vector<256x4xf32>
    %9 = vector.extract_strided_slice %4 {offsets = [0, 2, 0], sizes = [16, 16, 4], strides = [1, 1, 1]} : vector<18x18x4xf32> to vector<16x16x4xf32>
    %10 = vector.shape_cast %9 : vector<16x16x4xf32> to vector<256x4xf32>
    %11 = vector.extract_strided_slice %4 {offsets = [1, 0, 0], sizes = [16, 16, 4], strides = [1, 1, 1]} : vector<18x18x4xf32> to vector<16x16x4xf32>
    %12 = vector.shape_cast %11 : vector<16x16x4xf32> to vector<256x4xf32>
    %13 = vector.extract_strided_slice %4 {offsets = [1, 1, 0], sizes = [16, 16, 4], strides = [1, 1, 1]} : vector<18x18x4xf32> to vector<16x16x4xf32>
    %14 = vector.shape_cast %13 : vector<16x16x4xf32> to vector<256x4xf32>
    %15 = vector.extract_strided_slice %4 {offsets = [1, 2, 0], sizes = [16, 16, 4], strides = [1, 1, 1]} : vector<18x18x4xf32> to vector<16x16x4xf32>
    %16 = vector.shape_cast %15 : vector<16x16x4xf32> to vector<256x4xf32>
    %17 = vector.extract_strided_slice %4 {offsets = [2, 0, 0], sizes = [16, 16, 4], strides = [1, 1, 1]} : vector<18x18x4xf32> to vector<16x16x4xf32>
    %18 = vector.shape_cast %17 : vector<16x16x4xf32> to vector<256x4xf32>
    %19 = vector.extract_strided_slice %4 {offsets = [2, 1, 0], sizes = [16, 16, 4], strides = [1, 1, 1]} : vector<18x18x4xf32> to vector<16x16x4xf32>
    %20 = vector.shape_cast %19 : vector<16x16x4xf32> to vector<256x4xf32>
    %21 = vector.extract_strided_slice %4 {offsets = [2, 2, 0], sizes = [16, 16, 4], strides = [1, 1, 1]} : vector<18x18x4xf32> to vector<16x16x4xf32>
    %22 = vector.shape_cast %21 : vector<16x16x4xf32> to vector<256x4xf32>
    %23 = tpu.concatenate %6, %8, %10, %12, %14, %16, %18, %20, %22 in 1 : vector<256x4xf32>, vector<256x4xf32>, vector<256x4xf32>, vector<256x4xf32>, vector<256x4xf32>, vector<256x4xf32>, vector<256x4xf32>, vector<256x4xf32>, vector<256x4xf32> -> vector<256x36xf32>
    %c0_4 = arith.constant 0 : index
    %c0_5 = arith.constant 0 : index
    %24 = vector.load %arg2[%c0_4, %c0_5] : memref<36x128xf32, #tpu.memory_space<vmem>>, vector<36x128xf32>
    %cst = arith.constant dense<0.000000e+00> : vector<256x128xf32>
    %25 = tpu.matmul %23, %24, %cst {dimension_numbers = #tpu.dot_dimension_numbers<[1], [0], [0], [1], [0, 0, 1, 1], [], []>} : vector<256x36xf32>, vector<36x128xf32>, vector<256x128xf32> -> vector<256x128xf32>
    %c0_6 = arith.constant 0 : index
    %c0_7 = arith.constant 0 : index
    %26 = vector.load %arg3[%c0_6, %c0_7] : memref<1x128xf32, #tpu.memory_space<vmem>>, vector<1x128xf32>
    %27 = vector.broadcast %26 : vector<1x128xf32> to vector<256x128xf32>
    %28 = arith.addf %25, %27 : vector<256x128xf32>
    %cst_8 = arith.constant 0.000000e+00 : f32
    %29 = vector.broadcast %cst_8 : f32 to vector<256x128xf32>
    %30 = arith.maximumf %28, %29 : vector<256x128xf32>
    %c256_i32 = arith.constant 256 : i32
    %31 = arith.muli %arg0, %c256_i32 : i32
    %32 = tpu.assume_multiple %31, 256 : i32
    %33 = arith.index_cast %32 : i32 to index
    %c0_9 = arith.constant 0 : index
    %34 = vector.load %arg6[%33, %c0_9] : memref<512x128xf32, #tpu.memory_space<vmem>>, vector<256x128xf32>
    tpu.vector_store %arg6[%33, %c0_9], %30 {strides = array<i32>} : memref<512x128xf32, #tpu.memory_space<vmem>>, vector<256x128xf32>,
    %c0_10 = arith.constant 0 : index
    %c0_11 = arith.constant 0 : index
    %35 = vector.load %arg7[%c0_10, %c0_11] : memref<1x128xf32, #tpu.memory_space<vmem>>, vector<1x128xf32>
    %cst_12 = arith.constant dense<0.000000e+00> : vector<128xf32>
    %36 = vector.multi_reduction <add>, %30, %cst_12 [0] : vector<256x128xf32> to vector<128xf32>
    %37 = vector.shape_cast %36 : vector<128xf32> to vector<1x128xf32>
    %38 = arith.addf %35, %37 : vector<1x128xf32>
    %c0_13 = arith.constant 0 : index
    %c0_14 = arith.constant 0 : index
    %39 = vector.load %arg7[%c0_13, %c0_14] : memref<1x128xf32, #tpu.memory_space<vmem>>, vector<1x128xf32>
    tpu.vector_store %arg7[%c0_13, %c0_14], %38 {strides = array<i32>} : memref<1x128xf32, #tpu.memory_space<vmem>>, vector<1x128xf32>,
    %c1_i32 = arith.constant 1 : i32
    %40 = arith.cmpi eq, %arg0, %c1_i32 : i32
    %41 = arith.extui %40 : i1 to i32
    %c0_i32_15 = arith.constant 0 : i32
    %42 = arith.cmpi ne, %41, %c0_i32_15 : i32
    scf.if %42 {
      %c0_16 = arith.constant 0 : index
      %c0_17 = arith.constant 0 : index
      %43 = vector.load %arg7[%c0_16, %c0_17] : memref<1x128xf32, #tpu.memory_space<vmem>>, vector<1x128xf32>
      %cst_18 = arith.constant 0.001953125 : f32
      %44 = vector.broadcast %cst_18 : f32 to vector<1x128xf32>
      %45 = arith.mulf %43, %44 : vector<1x128xf32>
      %cst_19 = arith.constant 0.000000e+00 : f32
      %46 = vector.broadcast %cst_19 : f32 to vector<1x128xf32>
      %c0_i32_20 = arith.constant 0 : i32
      %c256_i32_21 = arith.constant 256 : i32
      %47 = arith.muli %c0_i32_20, %c256_i32_21 : i32
      %48 = tpu.assume_multiple %47, 256 : i32
      %49 = arith.index_cast %48 : i32 to index
      %c0_22 = arith.constant 0 : index
      %50 = vector.load %arg6[%49, %c0_22] : memref<512x128xf32, #tpu.memory_space<vmem>>, vector<256x128xf32>
      %51 = vector.broadcast %45 : vector<1x128xf32> to vector<256x128xf32>
      %52 = arith.subf %50, %51 : vector<256x128xf32>
      %53 = arith.mulf %52, %52 : vector<256x128xf32>
      %cst_23 = arith.constant dense<0.000000e+00> : vector<128xf32>
      %54 = vector.multi_reduction <add>, %53, %cst_23 [0] : vector<256x128xf32> to vector<128xf32>
      %55 = vector.shape_cast %54 : vector<128xf32> to vector<1x128xf32>
      %56 = arith.addf %46, %55 : vector<1x128xf32>
      %c1_i32_24 = arith.constant 1 : i32
      %c256_i32_25 = arith.constant 256 : i32
      %57 = arith.muli %c1_i32_24, %c256_i32_25 : i32
      %58 = tpu.assume_multiple %57, 256 : i32
      %59 = arith.index_cast %58 : i32 to index
      %c0_26 = arith.constant 0 : index
      %60 = vector.load %arg6[%59, %c0_26] : memref<512x128xf32, #tpu.memory_space<vmem>>, vector<256x128xf32>
      %61 = vector.broadcast %45 : vector<1x128xf32> to vector<256x128xf32>
      %62 = arith.subf %60, %61 : vector<256x128xf32>
      %63 = arith.mulf %62, %62 : vector<256x128xf32>
      %cst_27 = arith.constant dense<0.000000e+00> : vector<128xf32>
      %64 = vector.multi_reduction <add>, %63, %cst_27 [0] : vector<256x128xf32> to vector<128xf32>
      %65 = vector.shape_cast %64 : vector<128xf32> to vector<1x128xf32>
      %66 = arith.addf %56, %65 : vector<1x128xf32>
      %c2_i32 = arith.constant 2 : i32
      %cst_28 = arith.constant 0.001953125 : f32
      %67 = vector.broadcast %cst_28 : f32 to vector<1x128xf32>
      %68 = arith.mulf %66, %67 : vector<1x128xf32>
      %cst_29 = arith.constant 9.99999974E-6 : f32
      %69 = vector.broadcast %cst_29 : f32 to vector<1x128xf32>
      %70 = arith.addf %68, %69 : vector<1x128xf32>
      %71 = math.rsqrt %70 : vector<1x128xf32>
      %c0_30 = arith.constant 0 : index
      %c0_31 = arith.constant 0 : index
      %72 = vector.load %arg4[%c0_30, %c0_31] : memref<1x128xf32, #tpu.memory_space<vmem>>, vector<1x128xf32>
      %73 = arith.mulf %72, %71 : vector<1x128xf32>
      %c0_32 = arith.constant 0 : index
      %c0_33 = arith.constant 0 : index
      %74 = vector.load %arg5[%c0_32, %c0_33] : memref<1x128xf32, #tpu.memory_space<vmem>>, vector<1x128xf32>
      %75 = arith.mulf %45, %73 : vector<1x128xf32>
      %76 = arith.subf %74, %75 : vector<1x128xf32>
      %c0_i32_34 = arith.constant 0 : i32
      %c256_i32_35 = arith.constant 256 : i32
      %77 = arith.muli %c0_i32_34, %c256_i32_35 : i32
      %78 = tpu.assume_multiple %77, 256 : i32
      %79 = arith.index_cast %78 : i32 to index
      %c0_36 = arith.constant 0 : index
      %80 = vector.load %arg6[%79, %c0_36] : memref<512x128xf32, #tpu.memory_space<vmem>>, vector<256x128xf32>
      %81 = vector.broadcast %73 : vector<1x128xf32> to vector<256x128xf32>
      %82 = arith.mulf %80, %81 : vector<256x128xf32>
      %83 = vector.broadcast %76 : vector<1x128xf32> to vector<256x128xf32>
      %84 = arith.addf %82, %83 : vector<256x128xf32>
      %85 = arith.index_cast %78 : i32 to index
      %c0_37 = arith.constant 0 : index
      %86 = vector.load %arg6[%85, %c0_37] : memref<512x128xf32, #tpu.memory_space<vmem>>, vector<256x128xf32>
      tpu.vector_store %arg6[%85, %c0_37], %84 {strides = array<i32>} : memref<512x128xf32, #tpu.memory_space<vmem>>, vector<256x128xf32>,
      %c1_i32_38 = arith.constant 1 : i32
      %c256_i32_39 = arith.constant 256 : i32
      %87 = arith.muli %c1_i32_38, %c256_i32_39 : i32
      %88 = tpu.assume_multiple %87, 256 : i32
      %89 = arith.index_cast %88 : i32 to index
      %c0_40 = arith.constant 0 : index
      %90 = vector.load %arg6[%89, %c0_40] : memref<512x128xf32, #tpu.memory_space<vmem>>, vector<256x128xf32>
      %91 = vector.broadcast %73 : vector<1x128xf32> to vector<256x128xf32>
      %92 = arith.mulf %90, %91 : vector<256x128xf32>
      %93 = vector.broadcast %76 : vector<1x128xf32> to vector<256x128xf32>
      %94 = arith.addf %92, %93 : vector<256x128xf32>
      %95 = arith.index_cast %88 : i32 to index
      %c0_41 = arith.constant 0 : index
      %96 = vector.load %arg6[%95, %c0_41] : memref<512x128xf32, #tpu.memory_space<vmem>>, vector<256x128xf32>
      tpu.vector_store %arg6[%95, %c0_41], %94 {strides = array<i32>} : memref<512x128xf32, #tpu.memory_space<vmem>>, vector<256x128xf32>,
      %c2_i32_42 = arith.constant 2 : i32
    } else {
    }
    return
  }
  func.func @transform_0(%arg0: i32) -> (i32, i32, i32, i32) {
    %c0_i32 = arith.constant 0 : i32
    %c0_i32_0 = arith.constant 0 : i32
    %c0_i32_1 = arith.constant 0 : i32
    %c0_i32_2 = arith.constant 0 : i32
    return %arg0, %c0_i32, %c0_i32_0, %c0_i32_1 : i32, i32, i32, i32
  }
  func.func @transform_1(%arg0: i32) -> (i32, i32) {
    %c0_i32 = arith.constant 0 : i32
    %c0_i32_0 = arith.constant 0 : i32
    %c0_i32_1 = arith.constant 0 : i32
    return %c0_i32, %c0_i32_0 : i32, i32
  }
  func.func @transform_2(%arg0: i32) -> (i32, i32) {
    %c0_i32 = arith.constant 0 : i32
    %c0_i32_0 = arith.constant 0 : i32
    %c0_i32_1 = arith.constant 0 : i32
    return %c0_i32, %c0_i32_0 : i32, i32
  }
  func.func @transform_3(%arg0: i32) -> (i32, i32) {
    %c0_i32 = arith.constant 0 : i32
    %c0_i32_0 = arith.constant 0 : i32
    %c0_i32_1 = arith.constant 0 : i32
    return %c0_i32, %c0_i32_0 : i32, i32
  }
  func.func @transform_4(%arg0: i32) -> (i32, i32) {
    %c0_i32 = arith.constant 0 : i32
    %c0_i32_0 = arith.constant 0 : i32
    %c0_i32_1 = arith.constant 0 : i32
    return %c0_i32, %c0_i32_0 : i32, i32
  }
  func.func @transform_5(%arg0: i32) -> (i32, i32) {
    %c0_i32 = arith.constant 0 : i32
    %c0_i32_0 = arith.constant 0 : i32
    %c0_i32_1 = arith.constant 0 : i32
    return %c0_i32, %c0_i32_0 : i32, i32
  }
}

</mosaic_0001>

<bundles_post_ra>
// kernel: tpu_custom_call.1
= control target key start
LH: loop header
LB: loop body
LE: loop exit
PB: predicated region body
PF: predicated region fallthrough
CT: control target
= control target key end

     0   :  { %10 = vsyncpa [#allocation4], 0  ;;  %s2647_s18 = smov 0   ;;  %s5107_s0 = inlined_call_operand.vmem [shape: f32[2,18,18,4], index: 0, kind: input, shape index: {}]   ;;  %s5108_s1 = inlined_call_operand.vmem [shape: f32[36,128], index: 1, kind: input, shape index: {}]   ;;  %s5109_s2 = inlined_call_operand.vmem [shape: f32[1,128], index: 2, kind: input, shape index: {}]   ;;  %s5110_s3 = inlined_call_operand.vmem [shape: f32[1,128], index: 3, kind: input, shape index: {}]   ;;  %s5111_s4 = inlined_call_operand.vmem [shape: f32[1,128], index: 4, kind: input, shape index: {}]   ;;  %s5112_s5 = inlined_call_operand.hbm [shape: f32[512,128], index: 5, kind: output, shape index: {}]  }
   0x1 LB: > { %s2653_s19 = sadd.s32 4294967295, %s2604_s18   ;;  %p2447_p0 = scmp.ge.s32.totalorder %s2604_s18, 1  ;;  %s2604_s18 = sphi %s2647_s18, %s16_s18  }
   0x2   : > { %p183_p1 = scmp.lt.s32.totalorder %s2604_s18, 3 }
   0x4   : > { %p184_p2 = pnand %p2447_p0, %p183_p1 }
   0x6   : > { %187 = sbr.rel (%p184_p2) target bundleno = 1179 (0x49b), region = 40 }
   0xb   : > { %p206_p3 = scmp.lt.s32.totalorder %s2653_s19, 1  ;;  %p2449_p4 = scmp.ne.s32.totalorder %s2653_s19, 0 }
   0xd   : > { %s207_s20 = scalar_select %p206_p3, %s2653_s19, 1 }
   0xe   : > { %214 = sbr.rel (%p2449_p4) target bundleno = 21 (0x15), region = 44 }
   0xf   : > { %s2504_s21 = smul.u32 432, %s207_s20 }
  0x11   : > { %s2662_s24 = scalar_lea.vmem %s5107_s0, %s2504_s21 }
  0x13   : > { %v2606_v0 = vmov 0.0  }
  0x14   : > { %215 = vst [vmem:[#allocation2] sm:$0x1] %v2606_v0 }
  0x15 PF: > { %v2666_v1 = vld [vmem:[%s2662_s24 + $0x30] sm:$0xff]  ;;  %v2669_v2 = vld [vmem:[%s2662_s24 + $0x38] sm:$0xff]  ;;  %vm318_vm0 = vcmask 1046528   ;;  %v2677_v6 = vld [vmem:[%s2662_s24 + $0x20] sm:$0xff]  ;;  %s2607_s25 = smov 4   ;;  %vm399_vm1 = vcmask 1045504  }
  0x16   : > { %v2672_v3 = vld [vmem:[%s2662_s24 + $0x18] sm:$0xff]  ;;  %v329_v4 = vrot.slane %v2666_v1, 1  ;;  %v330_v5 = vrot.slane %v2669_v2, 1  ;;  %v2681_v8 = vld [vmem:[%s2662_s24] sm:$0xff]  ;;  %v2684_v9 = vld [vmem:[%s2662_s24 + $0x8] sm:$0xff]  ;;  %v325_v10 = vrot.slane %v2677_v6, 1 }
  0x17   : > { %v324_v7 = vrot.slane %v2672_v3, 1  ;;  %v319_v11 = vrot.slane %v2681_v8, 1  ;;  %v320_v12 = vrot.slane %v2684_v9, 1  ;;  %v2690_v13 = vld [vmem:[%s2662_s24 + $0x40] sm:$0x3]  ;;  %v2724_v26 = vld [vmem:[%s2662_s24 + $0x68] sm:$0xff] }
  0x18   : > { %v2693_v14 = vsel %vm318_vm0, %v329_v4, %v330_v5  ;;  %v2696_v15 = vld [vmem:[%s2662_s24 + $0x28] sm:$0x3]  ;;  %v2699_v16 = vld [vmem:[%s2662_s24 + $0x10] sm:$0x3]  ;;  %v332_v19 = vrot.slane %v2690_v13, 1  ;;  %v2721_v25 = vld [vmem:[%s2662_s24 + $0x60] sm:$0xff] }
  0x19   : > { %514 = vrot.lane.b32.xlu2 %v2693_v14, %s2607_s25  ;;  %v2704_v17 = vsel %vm318_vm0, %v324_v7, %v325_v10  ;;  %v321_v18 = vsel %vm318_vm0, %v319_v11, %v320_v12  ;;  %v327_v20 = vrot.slane %v2696_v15, 1  ;;  %v322_v21 = vrot.slane %v2699_v16, 1  ;;  %v2727_v27 = vld [vmem:[%s2662_s24 + $0x50] sm:$0xff]  ;;  %v2730_v28 = vld [vmem:[%s2662_s24 + $0x58] sm:$0x3]  ;;  %v2733_v29 = vld [vmem:[%s2662_s24 + $0x48] sm:$0xff] }
  0x1a   : > { %510 = vrot.lane.b32.xlu1 %v2704_v17, %s2607_s25  ;;  %506 = vrot.lane.b32.xlu0 %v321_v18, %s2607_s25  ;;  %v2714_v22 = vsel %vm318_vm0, %v330_v5, %v332_v19  ;;  %v339_v30 = vrot.slane %v2721_v25, 1  ;;  %v340_v31 = vrot.slane %v2724_v26, 1  ;;  %v335_v32 = vrot.slane %v2727_v27, 1  ;;  %v2755_v38 = vld [vmem:[%s2662_s24 + $0x80] sm:$0xff]  ;;  %v2758_v39 = vld [vmem:[%s2662_s24 + $0x88] sm:$0x3] }
  0x1b   : > { %v2717_v23 = vsel %vm318_vm0, %v325_v10, %v327_v20  ;;  %v323_v24 = vsel %vm318_vm0, %v320_v12, %v322_v21  ;;  %v337_v33 = vrot.slane %v2730_v28, 1  ;;  %v334_v34 = vrot.slane %v2733_v29, 1  ;;  %v2761_v40 = vld [vmem:[%s2662_s24 + $0x78] sm:$0xff]  ;;  %v2764_v41 = vld [vmem:[%s2662_s24 + $0x70] sm:$0x3]  ;;  %v2786_v49 = vld [vmem:[%s2662_s24 + $0xa8] sm:$0xff] }
  0x1c   : > { %v2746_v35 = vsel %vm318_vm0, %v339_v30, %v340_v31  ;;  %v345_v42 = vrot.slane %v2755_v38, 1  ;;  %v347_v43 = vrot.slane %v2758_v39, 1  ;;  %v344_v44 = vrot.slane %v2761_v40, 1  ;;  %v2789_v50 = vld [vmem:[%s2662_s24 + $0xb0] sm:$0xff]  ;;  %v2792_v51 = vld [vmem:[%s2662_s24 + $0x98] sm:$0xff]  ;;  %v2821_v62 = vld [vmem:[%s2662_s24 + $0xc8] sm:$0xff] }
  0x1d   : > { %5230 = vst [vmem:[#allocation6_spill] sm:$0xff] %v2746_v35  ;;  %v2749_v36 = vsel %vm318_vm0, %v335_v32, %v337_v33  ;;  %v2752_v37 = vsel %vm318_vm0, %v334_v34, %v335_v32  ;;  %v342_v45 = vrot.slane %v2764_v41, 1  ;;  %v2795_v52 = vld [vmem:[%s2662_s24 + $0xa0] sm:$0x3]  ;;  %v2798_v53 = vld [vmem:[%s2662_s24 + $0x90] sm:$0xff]  ;;  %v354_v54 = vrot.slane %v2786_v49, 1 }
  0x1e   : > { %v2777_v46 = vsel %vm318_vm0, %v345_v42, %v347_v43  ;;  %v2780_v47 = vsel %vm318_vm0, %v344_v44, %v345_v42  ;;  %v355_v55 = vrot.slane %v2789_v50, 1  ;;  %v350_v56 = vrot.slane %v2792_v51, 1  ;;  %v2824_v63 = vld [vmem:[%s2662_s24 + $0xd0] sm:$0x3]  ;;  %v2827_v0 = vld [vmem:[%s2662_s24 + $0xc0] sm:$0xff]  ;;  %v2855_v21 = vld [vmem:[%s2662_s24 + $0xf8] sm:$0xff] }
  0x1f   : > { %5231 = vst [vmem:[#allocation7_spill] sm:$0xff] %v2777_v46  ;;  %v2783_v48 = vsel %vm318_vm0, %v340_v31, %v342_v45  ;;  %v352_v57 = vrot.slane %v2795_v52, 1  ;;  %v349_v58 = vrot.slane %v2798_v53, 1  ;;  %v2830_v4 = vld [vmem:[%s2662_s24 + $0xb8] sm:$0x3]  ;;  %v360_v5 = vrot.slane %v2821_v62, 1 }
  0x20   : > { %5232 = vst [vmem:[#allocation8_spill] sm:$0xff] %v2780_v47  ;;  %v2812_v59 = vsel %vm318_vm0, %v354_v54, %v355_v55  ;;  %v362_v7 = vrot.slane %v2824_v63, 1  ;;  %v359_v10 = vrot.slane %v2827_v0, 1  ;;  %v357_v11 = vrot.slane %v2830_v4, 1  ;;  %v2852_v20 = vld [vmem:[%s2662_s24 + $0xf0] sm:$0xff]  ;;  %v2864_v31 = vld [vmem:[%s2662_s24 + $0xd8] sm:$0xff] }
  0x21   : > { %516 = vrot.lane.b32.xlu2 %v2714_v22, %s2607_s25  ;;  %5233 = vst [vmem:[#allocation9_spill] sm:$0xff] %v2783_v48  ;;  %v2815_v60 = vsel %vm318_vm0, %v350_v56, %v352_v57  ;;  %v2818_v61 = vsel %vm318_vm0, %v349_v58, %v350_v56  ;;  %v2861_v30 = vld [vmem:[%s2662_s24 + $0xe8] sm:$0x3]  ;;  %v369_v32 = vrot.slane %v2852_v20, 1  ;;  %v370_v33 = vrot.slane %v2855_v21, 1  ;;  %s2608_s26 = smov 8  }
  0x22   : > { %512 = vrot.lane.b32.xlu1 %v2717_v23, %s2607_s25  ;;  %508 = vrot.lane.b32.xlu0 %v323_v24, %s2607_s25  ;;  %5234 = vst [vmem:[#allocation10_spill] sm:$0xff] %v2812_v59  ;;  %v2843_v12 = vsel %vm318_vm0, %v360_v5, %v362_v7  ;;  %v2846_v18 = vsel %vm318_vm0, %v359_v10, %v360_v5  ;;  %v2858_v24 = vld [vmem:[%s2662_s24 + $0xe0] sm:$0xff]  ;;  %v367_v42 = vrot.slane %v2861_v30, 1  ;;  %v364_v43 = vrot.slane %v2864_v31, 1  ;;  %v2890_v56 = vld [vmem:[%s2662_s24 + $0x118] sm:$0x3] }
  0x23   : > { %5235 = vst [vmem:[#allocation11_spill] sm:$0xff] %v2815_v60  ;;  %v2849_v19 = vsel %vm318_vm0, %v355_v55, %v357_v11  ;;  %v365_v34 = vrot.slane %v2858_v24, 1  ;;  %v2878_v44 = vsel %vm318_vm0, %v369_v32, %v370_v33  ;;  %v2887_v55 = vld [vmem:[%s2662_s24 + $0x110] sm:$0xff]  ;;  %v2893_v57 = vld [vmem:[%s2662_s24 + $0x108] sm:$0xff]  ;;  %v2896_v58 = vld [vmem:[%s2662_s24 + $0x100] sm:$0x3] }
  0x24   : > { %5236 = vst [vmem:[#allocation12_spill] sm:$0xff] %v2818_v61  ;;  %v375_v5 = vrot.slane %v2887_v55, 1  ;;  %v377_v7 = vrot.slane %v2890_v56, 1  ;;  %v374_v10 = vrot.slane %v2893_v57, 1  ;;  %v372_v11 = vrot.slane %v2896_v58, 1  ;;  %s2609_s27 = smov 12  }
  0x25   : > { %5237 = vst [vmem:[#allocation13_spill] sm:$0xff] %v2843_v12  ;;  %v2881_v45 = vsel %vm318_vm0, %v365_v34, %v367_v42  ;;  %v2884_v54 = vsel %vm318_vm0, %v364_v43, %v365_v34  ;;  %v2918_v43 = vld [vmem:[%s2662_s24 + $0x138] sm:$0xff]  ;;  %s2610_s28 = smov 16   ;;  %s2611_s29 = smov 20   ;;  %vm1274_vm2 = vcmask 31744   ;;  %vm1307_vm3 = vcmask 64512  }
  0x26   : > { %5238 = vst [vmem:[#allocation14_spill] sm:$0xff] %v2846_v18  ;;  %v2909_v32 = vsel %vm318_vm0, %v375_v5, %v377_v7  ;;  %v2912_v34 = vsel %vm318_vm0, %v374_v10, %v375_v5  ;;  %v2915_v42 = vsel %vm318_vm0, %v370_v33, %v372_v11  ;;  %v2930_v7 = vld [vmem:[%s2662_s24 + $0x120] sm:$0xff]  ;;  %v384_v33 = vrot.slane %v2918_v43, 1  ;;  %s2612_s30 = smov 32   ;;  %s2613_s6 = smov 28  }
  0x27   : > { %5239 = vst [vmem:[#allocation15_spill] sm:$0xff] %v2849_v19  ;;  %s2614_s7 = smov 24   ;;  %vm1340_vm4 = vcmask 97280   ;;  %vm1373_vm5 = vcmask 130048   ;;  %vm1406_vm6 = vcmask 162816   ;;  %vm1644_vm7 = vcmask 1043456  }
  0x28   : > { %5240 = vst [vmem:[#allocation16_spill] sm:$0xff] %v2878_v44  ;;  %vm1439_vm8 = vcmask 195584   ;;  %vm1472_vm9 = vcmask 228352   ;;  %vm1505_vm10 = vcmask 261120   ;;  %vm1547_vm11 = vcmask 293888   ;;  %s2483_s22 = sshll.u32 %s2653_s19, 8 }
  0x29   : > { %522 = vrot.lane.b32.xlu2 %v2746_v35, %s2607_s25  ;;  %5241 = vst [vmem:[#allocation17_spill] sm:$0xff] %v2881_v45  ;;  %v2990_v35 = vld [vmem:[%s2662_s24 + $0x168] sm:$0xff]  ;;  %s4396_s23 = scalar_lea.vmem [#allocation3], %s2483_s22  ;;  %p2484_p5 = scmp.ne.s32.totalorder %s2653_s19, 1 }
  0x2a   : > { %520 = vrot.lane.b32.xlu1 %v2749_v36, %s2607_s25  ;;  %518 = vrot.lane.b32.xlu0 %v2752_v37, %s2607_s25  ;;  %5242 = vst [vmem:[#allocation18_spill] sm:$0xff] %v2884_v54 }
  0x2b   : > { %5243 = vst [vmem:[#allocation19_spill] sm:$0xff] %v2909_v32 }
  0x2c   : > { %5244 = vst [vmem:[#allocation20_spill] sm:$0xff] %v2912_v34 }
  0x2d   : > { %5245 = vst [vmem:[#allocation21_spill] sm:$0xff] %v2915_v42 }
  0x2e   : > { %5253 = vst [vmem:[#allocation29_spill] sm:$0xff] %v2990_v35 }
  0x31   : > { %528 = vrot.lane.b32.xlu2 %v2777_v46, %s2607_s25  ;;  %v2962_v46 = vld [vmem:[%s2662_s24 + $0x148] sm:$0x3] }
  0x32   : > { %526 = vrot.lane.b32.xlu1 %v2780_v47, %s2607_s25  ;;  %524 = vrot.lane.b32.xlu0 %v2783_v48, %s2607_s25 }
  0x39   : > { %534 = vrot.lane.b32.xlu2 %v2812_v59, %s2607_s25 }
  0x3a   : > { %532 = vrot.lane.b32.xlu1 %v2815_v60, %s2607_s25  ;;  %530 = vrot.lane.b32.xlu0 %v2818_v61, %s2607_s25 }
  0x41   : > { %540 = vrot.lane.b32.xlu2 %v2843_v12, %s2607_s25  ;;  %v2924_v12 = vld [vmem:[%s2662_s24 + $0x128] sm:$0xff] }
  0x42   : > { %538 = vrot.lane.b32.xlu1 %v2846_v18, %s2607_s25  ;;  %536 = vrot.lane.b32.xlu0 %v2849_v19, %s2607_s25  ;;  %v380_v10 = vrot.slane %v2924_v12, 1  ;;  %v2956_v19 = vld [vmem:[%s2662_s24 + $0x160] sm:$0x3]  ;;  %v2959_v18 = vld [vmem:[%s2662_s24 + $0x150] sm:$0xff] }
  0x49   : > { %546 = vrot.lane.b32.xlu2 %v2878_v44, %s2607_s25  ;;  %v2921_v44 = vld [vmem:[%s2662_s24 + $0x140] sm:$0xff] }
  0x4a   : > { %544 = vrot.lane.b32.xlu1 %v2881_v45, %s2607_s25  ;;  %542 = vrot.lane.b32.xlu0 %v2884_v54, %s2607_s25  ;;  %5246 = vst [vmem:[#allocation22_spill] sm:$0xff] %v2921_v44  ;;  %v2927_v54 = vld [vmem:[%s2662_s24 + $0x130] sm:$0x3]  ;;  %v385_v5 = vrot.slane %v2921_v44, 1  ;;  %v379_v45 = vrot.slane %v2930_v7, 1 }
  0x4b   : > { %v382_v11 = vrot.slane %v2927_v54, 1 }
  0x4c   : > { %v2944_v59 = vsel %vm318_vm0, %v384_v33, %v385_v5  ;;  %v392_v33 = vrot.slane %v2956_v19, 1 }
  0x4d   : > { %5247 = vst [vmem:[#allocation23_spill] sm:$0xff] %v2944_v59 }
  0x51   : > { %552 = vrot.lane.b32.xlu2 %v2909_v32, %s2607_s25  ;;  %v2947_v32 = vsel %vm318_vm0, %v380_v10, %v382_v11  ;;  %v387_v11 = vrot.slane %v2962_v46, 1 }
  0x52   : > { %550 = vrot.lane.b32.xlu1 %v2912_v34, %s2607_s25  ;;  %548 = vrot.lane.b32.xlu0 %v2915_v42, %s2607_s25  ;;  %5248 = vst [vmem:[#allocation24_spill] sm:$0xff] %v2947_v32  ;;  %v2950_v34 = vsel %vm318_vm0, %v379_v45, %v380_v10  ;;  %v2953_v42 = vld [vmem:[%s2662_s24 + $0x158] sm:$0xff]  ;;  %v389_v10 = vrot.slane %v2959_v18, 1 }
  0x53   : > { %5249 = vst [vmem:[#allocation25_spill] sm:$0xff] %v2950_v34  ;;  %v390_v45 = vrot.slane %v2953_v42, 1 }
  0x55   : > { %v2975_v61 = vsel %vm318_vm0, %v390_v45, %v392_v33  ;;  %v2978_v60 = vsel %vm318_vm0, %v389_v10, %v390_v45  ;;  %v400_v45 = vrot.slane %v2681_v8, 2  ;;  %v406_v8 = vrot.slane %v2677_v6, 2 }
  0x56   : > { %5250 = vst [vmem:[#allocation26_spill] sm:$0xff] %v2975_v61 }
  0x57   : > { %5251 = vst [vmem:[#allocation27_spill] sm:$0xff] %v2978_v60 }
  0x59   : > { %558 = vrot.lane.b32.xlu2 %v2944_v59, %s2607_s25  ;;  %v2981_v59 = vsel %vm318_vm0, %v385_v5, %v387_v11  ;;  %v401_v5 = vrot.slane %v2684_v9, 2  ;;  %v394_v11 = vrot.slane %v2990_v35, 1  ;;  %v408_v9 = vrot.slane %v2696_v15, 2 }
  0x5a   : > { %556 = vrot.lane.b32.xlu1 %v2947_v32, %s2607_s25  ;;  %554 = vrot.lane.b32.xlu0 %v2950_v34, %s2607_s25  ;;  %5252 = vst [vmem:[#allocation28_spill] sm:$0xff] %v2981_v59  ;;  %v2984_v32 = vld [vmem:[%s2662_s24 + $0x170] sm:$0xff]  ;;  %v2987_v34 = vld [vmem:[%s2662_s24 + $0x178] sm:$0x3]  ;;  %v415_v15 = vrot.slane %v2733_v29, 2 }
  0x5b   : > { %v395_v33 = vrot.slane %v2984_v32, 1  ;;  %v397_v10 = vrot.slane %v2987_v34, 1  ;;  %v402_v48 = vsel %vm399_vm1, %v400_v45, %v401_v5  ;;  %v405_v45 = vrot.slane %v2672_v3, 2 }
  0x61   : > { %564 = vrot.lane.b32.xlu2 %v2975_v61, %s2607_s25  ;;  %v3005_v61 = vsel %vm318_vm0, %v395_v33, %v397_v10  ;;  %v403_v10 = vrot.slane %v2699_v16, 2  ;;  %v416_v16 = vrot.slane %v2727_v27, 2 }
  0x62   : > { %562 = vrot.lane.b32.xlu1 %v2978_v60, %s2607_s25  ;;  %560 = vrot.lane.b32.xlu0 %v2981_v59, %s2607_s25  ;;  %5254 = vst [vmem:[#allocation30_spill] sm:$0xff] %v3005_v61  ;;  %v3008_v60 = vsel %vm318_vm0, %v394_v11, %v395_v33  ;;  %v3020_v33 = vsel %vm399_vm1, %v406_v8, %v408_v9  ;;  %v411_v9 = vrot.slane %v2669_v2, 2 }
  0x63   : > { %5255 = vst [vmem:[#allocation31_spill] sm:$0xff] %v3008_v60  ;;  %v3023_v11 = vsel %vm399_vm1, %v405_v45, %v406_v8  ;;  %v413_v8 = vrot.slane %v2690_v13, 2  ;;  %v3039_v45 = vsel %vm399_vm1, %v415_v15, %v416_v16  ;;  %v421_v13 = vrot.slane %v2724_v26, 2 }
  0x64   : > { %5256 = vst [vmem:[#allocation32_spill] sm:$0xff] %v3020_v33  ;;  %v423_v15 = vrot.slane %v2764_v41, 2  ;;  %v431_v41 = vrot.slane %v2792_v51, 2 }
  0x65   : > { %5258 = vst [vmem:[#allocation34_spill] sm:$0xff] %v3039_v45 }
  0x69   : > { %602 = vrot.lane.b32.xlu2 %v402_v48, %s2608_s26  ;;  %v404_v48 = vsel %vm399_vm1, %v401_v5, %v403_v10  ;;  %v410_v5 = vrot.slane %v2666_v1, 2  ;;  %v3042_v10 = vsel %vm399_vm1, %v411_v9, %v413_v8  ;;  %v420_v8 = vrot.slane %v2721_v25, 2 }
  0x6a   : > { %568 = vrot.lane.b32.xlu1 %v3005_v61, %s2607_s25  ;;  %566 = vrot.lane.b32.xlu0 %v3008_v60, %s2607_s25 }
  0x71   : > { %608 = vrot.lane.b32.xlu2 %v3020_v33, %s2608_s26 }
  0x72   : > { %606 = vrot.lane.b32.xlu1 %v3023_v11, %s2608_s26  ;;  %604 = vrot.lane.b32.xlu0 %v404_v48, %s2608_s26  ;;  %v3045_v48 = vsel %vm399_vm1, %v410_v5, %v411_v9  ;;  %v418_v9 = vrot.slane %v2730_v28, 2  ;;  %v3060_v5 = vsel %vm399_vm1, %v421_v13, %v423_v15  ;;  %v430_v28 = vrot.slane %v2798_v53, 2 }
  0x73   : > { %v3033_v60 = vpop.permute.xlu2 %514  ;;  %5260 = vst [vmem:[#allocation36_spill] sm:$0xff] %v3060_v5 }
  0x74   : > { %5257 = vst [vmem:[#allocation33_spill] sm:$0xff] %v3033_v60  ;;  %v3066_v33 = vsel %vm399_vm1, %v416_v16, %v418_v9  ;;  %v428_v16 = vrot.slane %v2758_v39, 2  ;;  %v3082_v9 = vsel %vm399_vm1, %v430_v28, %v431_v41  ;;  %v436_v39 = vrot.slane %v2789_v50, 2 }
  0x75   : > { %5261 = vst [vmem:[#allocation37_spill] sm:$0xff] %v3066_v33  ;;  %v438_v28 = vrot.slane %v2830_v4, 2  ;;  %v446_v4 = vrot.slane %v2858_v24, 2 }
  0x76   : > { %5263 = vst [vmem:[#allocation39_spill] sm:$0xff] %v3082_v9 }
  0x79   : > { %614 = vrot.lane.b32.xlu2 %v3039_v45, %s2608_s26  ;;  %v3063_v45 = vsel %vm399_vm1, %v420_v8, %v421_v13  ;;  %v426_v13 = vrot.slane %v2755_v38, 2  ;;  %v425_v8 = vrot.slane %v2761_v40, 2 }
  0x7a   : > { %612 = vrot.lane.b32.xlu1 %v3042_v10, %s2608_s26  ;;  %610 = vrot.lane.b32.xlu0 %v3045_v48, %s2608_s26 }
  0x7b   : > { %v3055_v60 = vpop.permute.xlu2 %516 }
  0x7c   : > { %5259 = vst [vmem:[#allocation35_spill] sm:$0xff] %v3055_v60  ;;  %v3085_v60 = vsel %vm399_vm1, %v426_v13, %v428_v16  ;;  %v435_v16 = vrot.slane %v2786_v49, 2 }
  0x7d   : > { %5264 = vst [vmem:[#allocation40_spill] sm:$0xff] %v3085_v60 }
  0x81   : > { %620 = vrot.lane.b32.xlu2 %v3060_v5, %s2608_s26  ;;  %v3088_v5 = vsel %vm399_vm1, %v425_v8, %v426_v13  ;;  %v433_v13 = vrot.slane %v2795_v52, 2  ;;  %v445_v52 = vrot.slane %v2864_v31, 2 }
  0x82   : > { %618 = vrot.lane.b32.xlu1 %v3063_v45, %s2608_s26  ;;  %616 = vrot.lane.b32.xlu0 %v3066_v33, %s2608_s26  ;;  %5265 = vst [vmem:[#allocation41_spill] sm:$0xff] %v3088_v5 }
  0x83   : > { %v3076_v15 = vpop.permute.xlu2 %522 }
  0x84   : > { %5262 = vst [vmem:[#allocation38_spill] sm:$0xff] %v3076_v15 }
  0x89   : > { %626 = vrot.lane.b32.xlu2 %v3082_v9, %s2608_s26  ;;  %v3107_v9 = vsel %vm399_vm1, %v436_v39, %v438_v28 }
  0x8a   : > { %624 = vrot.lane.b32.xlu1 %v3085_v60, %s2608_s26  ;;  %622 = vrot.lane.b32.xlu0 %v3088_v5, %s2608_s26  ;;  %5269 = vst [vmem:[#allocation45_spill] sm:$0xff] %v3107_v9  ;;  %v3110_v60 = vsel %vm399_vm1, %v435_v16, %v436_v39  ;;  %v3113_v5 = vsel %vm399_vm1, %v431_v41, %v433_v13  ;;  %v441_v39 = vrot.slane %v2821_v62, 2  ;;  %v443_v41 = vrot.slane %v2824_v63, 2 }
  0x8b   : > { %v3098_v15 = vpop.permute.xlu2 %528  ;;  %5270 = vst [vmem:[#allocation46_spill] sm:$0xff] %v3110_v60  ;;  %v440_v16 = vrot.slane %v2827_v0, 2  ;;  %v451_v63 = vrot.slane %v2855_v21, 2 }
  0x8c   : > { %5266 = vst [vmem:[#allocation42_spill] sm:$0xff] %v3098_v15  ;;  %v3102_v8 = vpop.permute.xlu1 %510  ;;  %v3104_v33 = vpop.permute.xlu0 %506 }
  0x8d   : > { %5267 = vst [vmem:[#allocation43_spill] sm:$0xff] %v3102_v8  ;;  %v3133_v8 = vsel %vm399_vm1, %v445_v52, %v446_v4  ;;  %v453_v52 = vrot.slane %v2896_v58, 2  ;;  %v461_v58 = vrot.slane %v2924_v12, 2 }
  0x8e   : > { %5268 = vst [vmem:[#allocation44_spill] sm:$0xff] %v3104_v33  ;;  %v3136_v33 = vsel %vm399_vm1, %v441_v39, %v443_v41  ;;  %v450_v41 = vrot.slane %v2852_v20, 2 }
  0x8f   : > { %5274 = vst [vmem:[#allocation50_spill] sm:$0xff] %v3133_v8 }
  0x90   : > { %5275 = vst [vmem:[#allocation51_spill] sm:$0xff] %v3136_v33 }
  0x91   : > { %632 = vrot.lane.b32.xlu2 %v3107_v9, %s2608_s26  ;;  %v3139_v9 = vsel %vm399_vm1, %v440_v16, %v441_v39  ;;  %v448_v39 = vrot.slane %v2861_v30, 2  ;;  %v460_v30 = vrot.slane %v2930_v7, 2 }
  0x92   : > { %630 = vrot.lane.b32.xlu1 %v3110_v60, %s2608_s26  ;;  %628 = vrot.lane.b32.xlu0 %v3113_v5, %s2608_s26  ;;  %5276 = vst [vmem:[#allocation52_spill] sm:$0xff] %v3139_v9 }
  0x93   : > { %v3123_v28 = vpop.permute.xlu2 %534 }
  0x94   : > { %5271 = vst [vmem:[#allocation47_spill] sm:$0xff] %v3123_v28  ;;  %v3128_v13 = vpop.permute.xlu1 %512  ;;  %v3130_v15 = vpop.permute.xlu0 %508  ;;  %v3158_v28 = vsel %vm399_vm1, %v451_v63, %v453_v52 }
  0x95   : > { %5272 = vst [vmem:[#allocation48_spill] sm:$0xff] %v3128_v13 }
  0x96   : > { %5273 = vst [vmem:[#allocation49_spill] sm:$0xff] %v3130_v15 }
  0x97   : > { %5280 = vst [vmem:[#allocation56_spill] sm:$0xff] %v3158_v28 }
  0x99   : > { %638 = vrot.lane.b32.xlu2 %v3133_v8, %s2608_s26  ;;  %v3161_v8 = vsel %vm399_vm1, %v450_v41, %v451_v63  ;;  %v456_v63 = vrot.slane %v2887_v55, 2  ;;  %v455_v41 = vrot.slane %v2893_v57, 2 }
  0x9a   : > { %636 = vrot.lane.b32.xlu1 %v3136_v33, %s2608_s26  ;;  %634 = vrot.lane.b32.xlu0 %v3139_v9, %s2608_s26  ;;  %v3164_v9 = vsel %vm399_vm1, %v446_v4, %v448_v39  ;;  %v458_v4 = vrot.slane %v2890_v56, 2  ;;  %v466_v56 = vrot.slane %v2921_v44, 2 }
  0x9b   : > { %v3149_v13 = vpop.permute.xlu2 %540  ;;  %5281 = vst [vmem:[#allocation57_spill] sm:$0xff] %v3164_v9 }
  0x9c   : > { %5277 = vst [vmem:[#allocation53_spill] sm:$0xff] %v3149_v13  ;;  %v3153_v16 = vpop.permute.xlu1 %520  ;;  %v3155_v15 = vpop.permute.xlu0 %518  ;;  %v3187_v13 = vsel %vm399_vm1, %v456_v63, %v458_v4  ;;  %v465_v4 = vrot.slane %v2918_v43, 2 }
  0x9d   : > { %5278 = vst [vmem:[#allocation54_spill] sm:$0xff] %v3153_v16 }
  0x9e   : > { %5279 = vst [vmem:[#allocation55_spill] sm:$0xff] %v3155_v15  ;;  %v3184_v15 = vsel %vm399_vm1, %v460_v30, %v461_v58  ;;  %v468_v30 = vrot.slane %v2962_v46, 2  ;;  %v475_v46 = vrot.slane %v2990_v35, 2 }
  0x9f   : > { %5285 = vst [vmem:[#allocation61_spill] sm:$0xff] %v3184_v15 }
  0xa0   : > { %5286 = vst [vmem:[#allocation62_spill] sm:$0xff] %v3187_v13 }
  0xa1   : > { %644 = vrot.lane.b32.xlu2 %v3158_v28, %s2608_s26  ;;  %v3190_v28 = vsel %vm399_vm1, %v455_v41, %v456_v63  ;;  %v463_v63 = vrot.slane %v2927_v54, 2  ;;  %v476_v54 = vrot.slane %v2984_v32, 2 }
  0xa2   : > { %642 = vrot.lane.b32.xlu1 %v3161_v8, %s2608_s26  ;;  %640 = vrot.lane.b32.xlu0 %v3164_v9, %s2608_s26  ;;  %5287 = vst [vmem:[#allocation63_spill] sm:$0xff] %v3190_v28 }
  0xa3   : > { %v3174_v52 = vpop.permute.xlu2 %546 }
  0xa4   : > { %5282 = vst [vmem:[#allocation58_spill] sm:$0xff] %v3174_v52  ;;  %v3179_v39 = vpop.permute.xlu1 %526  ;;  %v3181_v16 = vpop.permute.xlu0 %524  ;;  %v3209_v52 = vsel %vm399_vm1, %v466_v56, %v468_v30 }
  0xa5   : > { %5283 = vst [vmem:[#allocation59_spill] sm:$0xff] %v3179_v39 }
  0xa6   : > { %5284 = vst [vmem:[#allocation60_spill] sm:$0xff] %v3181_v16 }
  0xa7   : > { %5291 = vst [vmem:[#allocation67_spill] sm:$0xff] %v3209_v52 }
  0xa9   : > { %650 = vrot.lane.b32.xlu2 %v3184_v15, %s2608_s26  ;;  %v3212_v15 = vsel %vm399_vm1, %v465_v4, %v466_v56  ;;  %v471_v56 = vrot.slane %v2953_v42, 2  ;;  %v470_v4 = vrot.slane %v2959_v18, 2 }
  0xaa   : > { %648 = vrot.lane.b32.xlu1 %v3187_v13, %s2608_s26  ;;  %646 = vrot.lane.b32.xlu0 %v3190_v28, %s2608_s26  ;;  %5292 = vst [vmem:[#allocation68_spill] sm:$0xff] %v3212_v15  ;;  %v3215_v28 = vsel %vm399_vm1, %v461_v58, %v463_v63  ;;  %v473_v58 = vrot.slane %v2956_v19, 2 }
  0xab   : > { %v3200_v39 = vpop.permute.xlu2 %552  ;;  %5293 = vst [vmem:[#allocation69_spill] sm:$0xff] %v3215_v28 }
  0xac   : > { %5288 = vst [vmem:[#allocation64_spill] sm:$0xff] %v3200_v39  ;;  %v3204_v41 = vpop.permute.xlu1 %532  ;;  %v3206_v16 = vpop.permute.xlu0 %530  ;;  %v3235_v39 = vsel %vm399_vm1, %v475_v46, %v476_v54  ;;  %v478_v46 = vrot.slane %v2987_v34, 2 }
  0xad   : > { %5289 = vst [vmem:[#allocation65_spill] sm:$0xff] %v3204_v41  ;;  %v3238_v41 = vsel %vm399_vm1, %v471_v56, %v473_v58 }
  0xae   : > { %5290 = vst [vmem:[#allocation66_spill] sm:$0xff] %v3206_v16 }
  0xaf   : > { %5296 = vst [vmem:[#allocation72_spill] sm:$0xff] %v3238_v41 }
  0xb1   : > { %656 = vrot.lane.b32.xlu2 %v3209_v52, %s2608_s26  ;;  %v3241_v52 = vsel %vm399_vm1, %v470_v4, %v471_v56  ;;  %v3257_v56 = vsel %vm399_vm1, %v476_v54, %v478_v46 }
  0xb2   : > { %654 = vrot.lane.b32.xlu1 %v3212_v15, %s2608_s26  ;;  %652 = vrot.lane.b32.xlu0 %v3215_v28, %s2608_s26 }
  0xb3   : > { %v3225_v30 = vpop.permute.xlu2 %558 }
  0xb4   : > { %5294 = vst [vmem:[#allocation70_spill] sm:$0xff] %v3225_v30  ;;  %v3230_v63 = vpop.permute.xlu1 %538  ;;  %v3232_v16 = vpop.permute.xlu0 %536 }
  0xb5   : > { %5295 = vst [vmem:[#allocation71_spill] sm:$0xff] %v3230_v63 }
  0xb9   : > { %662 = vrot.lane.b32.xlu2 %v3235_v39, %s2608_s26 }
  0xba   : > { %660 = vrot.lane.b32.xlu1 %v3238_v41, %s2608_s26  ;;  %658 = vrot.lane.b32.xlu0 %v3241_v52, %s2608_s26 }
  0xbb   : > { %v3249_v19 = vpop.permute.xlu2 %564 }
  0xbc   : > { %5297 = vst [vmem:[#allocation73_spill] sm:$0xff] %v3249_v19  ;;  %v3252_v30 = vpop.permute.xlu1 %544  ;;  %v3254_v58 = vpop.permute.xlu0 %542 }
  0xbd   : > { %5298 = vst [vmem:[#allocation74_spill] sm:$0xff] %v3252_v30 }
  0xc1   : > { %700 = vrot.lane.b32.xlu2 %v2677_v6, %s2609_s27 }
  0xc2   : > { %698 = vrot.lane.b32.xlu1 %v2672_v3, %s2609_s27  ;;  %664 = vrot.lane.b32.xlu0 %v3257_v56, %s2608_s26 }
  0xc3   : > { %v3265_v4 = vpop.permute.xlu2 %602 }
  0xc4   : > { %5299 = vst [vmem:[#allocation75_spill] sm:$0xff] %v3265_v4  ;;  %v3267_v34 = vpop.permute.xlu1 %550  ;;  %v3269_v19 = vpop.permute.xlu0 %548 }
  0xc5   : > { %5300 = vst [vmem:[#allocation76_spill] sm:$0xff] %v3267_v34 }
  0xc9   : > { %706 = vrot.lane.b32.xlu2 %v2733_v29, %s2609_s27 }
  0xca   : > { %704 = vrot.lane.b32.xlu1 %v2669_v2, %s2609_s27  ;;  %702 = vrot.lane.b32.xlu0 %v2666_v1, %s2609_s27 }
  0xcb   : > { %v3277_v6 = vpop.permute.xlu2 %608 }
  0xcc   : > { %5301 = vst [vmem:[#allocation77_spill] sm:$0xff] %v3277_v6  ;;  %v3279_v3 = vpop.permute.xlu1 %556  ;;  %v3281_v54 = vpop.permute.xlu0 %554 }
  0xcd   : > { %5302 = vst [vmem:[#allocation78_spill] sm:$0xff] %v3279_v3 }
  0xd1   : > { %712 = vrot.lane.b32.xlu2 %v2724_v26, %s2609_s27 }
  0xd2   : > { %710 = vrot.lane.b32.xlu1 %v2721_v25, %s2609_s27  ;;  %708 = vrot.lane.b32.xlu0 %v2727_v27, %s2609_s27 }
  0xd3   : > { %v3289_v46 = vpop.permute.xlu2 %614 }
  0xd4   : > { %5303 = vst [vmem:[#allocation79_spill] sm:$0xff] %v3289_v46  ;;  %v3291_v2 = vpop.permute.xlu1 %562  ;;  %v3293_v4 = vpop.permute.xlu0 %560 }
  0xd5   : > { %5304 = vst [vmem:[#allocation80_spill] sm:$0xff] %v3291_v2 }
  0xd6   : > { %5305 = vst [vmem:[#allocation81_spill] sm:$0xff] %v3293_v4 }
  0xd9   : > { %718 = vrot.lane.b32.xlu2 %v2798_v53, %s2609_s27 }
  0xda   : > { %716 = vrot.lane.b32.xlu1 %v2755_v38, %s2609_s27  ;;  %714 = vrot.lane.b32.xlu0 %v2761_v40, %s2609_s27 }
  0xdb   : > { %v3301_v26 = vpop.permute.xlu2 %620 }
  0xdc   : > { %5306 = vst [vmem:[#allocation82_spill] sm:$0xff] %v3301_v26  ;;  %v3303_v25 = vpop.permute.xlu1 %568  ;;  %v3305_v6 = vpop.permute.xlu0 %566 }
  0xdd   : > { %5307 = vst [vmem:[#allocation83_spill] sm:$0xff] %v3303_v25 }
  0xde   : > { %5308 = vst [vmem:[#allocation84_spill] sm:$0xff] %v3305_v6 }
  0xe1   : > { %724 = vrot.lane.b32.xlu2 %v2789_v50, %s2609_s27 }
  0xe2   : > { %722 = vrot.lane.b32.xlu1 %v2786_v49, %s2609_s27  ;;  %720 = vrot.lane.b32.xlu0 %v2792_v51, %s2609_s27 }
  0xe3   : > { %v3313_v46 = vpop.permute.xlu2 %626 }
  0xe4   : > { %5309 = vst [vmem:[#allocation85_spill] sm:$0xff] %v3313_v46  ;;  %v3315_v38 = vpop.permute.xlu1 %606  ;;  %v3317_v40 = vpop.permute.xlu0 %604 }
  0xe5   : > { %5310 = vst [vmem:[#allocation86_spill] sm:$0xff] %v3315_v38 }
  0xe6   : > { %5311 = vst [vmem:[#allocation87_spill] sm:$0xff] %v3317_v40 }
  0xe9   : > { %730 = vrot.lane.b32.xlu2 %v2864_v31, %s2609_s27 }
  0xea   : > { %728 = vrot.lane.b32.xlu1 %v2821_v62, %s2609_s27  ;;  %726 = vrot.lane.b32.xlu0 %v2827_v0, %s2609_s27 }
  0xeb   : > { %v3325_v25 = vpop.permute.xlu2 %632 }
  0xec   : > { %v3327_v26 = vpop.permute.xlu1 %612  ;;  %v3329_v2 = vpop.permute.xlu0 %610 }
  0xed   : > { %5312 = vst [vmem:[#allocation88_spill] sm:$0xff] %v3327_v26 }
  0xee   : > { %5313 = vst [vmem:[#allocation89_spill] sm:$0xff] %v3329_v2 }
  0xf1   : > { %736 = vrot.lane.b32.xlu2 %v2855_v21, %s2609_s27 }
  0xf2   : > { %734 = vrot.lane.b32.xlu1 %v2852_v20, %s2609_s27  ;;  %732 = vrot.lane.b32.xlu0 %v2858_v24, %s2609_s27 }
  0xf3   : > { %v3337_v46 = vpop.permute.xlu2 %638 }
  0xf4   : > { %v3339_v62 = vpop.permute.xlu1 %618  ;;  %v3341_v0 = vpop.permute.xlu0 %616 }
  0xf5   : > { %5314 = vst [vmem:[#allocation90_spill] sm:$0xff] %v3339_v62  ;;  %v3383_v62 = vld [vmem:[%s2662_s24 + $0x180] sm:$0xff] }
  0xf6   : > { %5315 = vst [vmem:[#allocation91_spill] sm:$0xff] %v3341_v0 }
  0xf9   : > { %742 = vrot.lane.b32.xlu2 %v2930_v7, %s2609_s27 }
  0xfa   : > { %740 = vrot.lane.b32.xlu1 %v2887_v55, %s2609_s27  ;;  %738 = vrot.lane.b32.xlu0 %v2893_v57, %s2609_s27 }
  0xfb   : > { %v3349_v26 = vpop.permute.xlu2 %644 }
  0xfc   : > { %v3351_v24 = vpop.permute.xlu1 %624  ;;  %v3353_v2 = vpop.permute.xlu0 %622 }
  0xfd   : > { %5316 = vst [vmem:[#allocation92_spill] sm:$0xff] %v3351_v24 }
  0xfe   : > { %5317 = vst [vmem:[#allocation93_spill] sm:$0xff] %v3353_v2  ;;  %v3380_v2 = vld [vmem:[%s2662_s24 + $0x188] sm:$0xff] }
  0xff   : > { %5321 = vst [vmem:[#allocation97_spill] sm:$0xff] %v3380_v2 }
 0x101   : > { %748 = vrot.lane.b32.xlu2 %v2921_v44, %s2609_s27 }
 0x102   : > { %746 = vrot.lane.b32.xlu1 %v2918_v43, %s2609_s27  ;;  %744 = vrot.lane.b32.xlu0 %v2924_v12, %s2609_s27 }
 0x103   : > { %v3361_v55 = vpop.permute.xlu2 %650 }
 0x104   : > { %v3363_v57 = vpop.permute.xlu1 %630  ;;  %v3365_v0 = vpop.permute.xlu0 %628 }
 0x109   : > { %754 = vrot.lane.b32.xlu2 %v2990_v35, %s2609_s27 }
 0x10a   : > { %752 = vrot.lane.b32.xlu1 %v2953_v42, %s2609_s27  ;;  %750 = vrot.lane.b32.xlu0 %v2959_v18, %s2609_s27 }
 0x10b   : > { %v3373_v24 = vpop.permute.xlu2 %656 }
 0x10c   : > { %5318 = vst [vmem:[#allocation94_spill] sm:$0xff] %v3373_v24  ;;  %v3375_v43 = vpop.permute.xlu1 %636  ;;  %v3377_v12 = vpop.permute.xlu0 %634 }
 0x10d   : > { %5319 = vst [vmem:[#allocation95_spill] sm:$0xff] %v3375_v43 }
 0x10e   : > { %5320 = vst [vmem:[#allocation96_spill] sm:$0xff] %v3377_v12  ;;  %v5353_v12 = vld [vmem:[#allocation20_spill] sm:$0xff] }
 0x111   : > { %760 = vrot.lane.b32.xlu2 %v3380_v2, %s2609_s27 }
 0x112   : > { %758 = vrot.lane.b32.xlu1 %v3383_v62, %s2609_s27  ;;  %756 = vrot.lane.b32.xlu0 %v2984_v32, %s2609_s27 }
 0x113   : > { %v3391_v18 = vpop.permute.xlu2 %662 }
 0x114   : > { %5322 = vst [vmem:[#allocation98_spill] sm:$0xff] %v3391_v18  ;;  %v3393_v42 = vpop.permute.xlu1 %642  ;;  %v3395_v38 = vpop.permute.xlu0 %640 }
 0x115   : > { %5323 = vst [vmem:[#allocation99_spill] sm:$0xff] %v3393_v42 }
 0x116   : > { %5324 = vst [vmem:[#allocation100_spill] sm:$0xff] %v3395_v38 }
 0x119   : > { %798 = vrot.lane.b32.xlu2 %v2693_v14, %s2610_s28 }
 0x11a   : > { %796 = vrot.lane.b32.xlu1 %v2717_v23, %s2610_s28  ;;  %794 = vrot.lane.b32.xlu0 %v2704_v17, %s2610_s28 }
 0x11b   : > { %v3403_v40 = vpop.permute.xlu2 %700 }
 0x11c   : > { %5325 = vst [vmem:[#allocation101_spill] sm:$0xff] %v3403_v40  ;;  %v3405_v3 = vpop.permute.xlu1 %648  ;;  %v3407_v32 = vpop.permute.xlu0 %646  ;;  %v5331_v40 = vld [vmem:[#allocation9_spill] sm:$0xff] }
 0x11d   : > { %5326 = vst [vmem:[#allocation102_spill] sm:$0xff] %v3405_v3 }
 0x11e   : > { %5327 = vst [vmem:[#allocation103_spill] sm:$0xff] %v3407_v32  ;;  %v5332_v32 = vld [vmem:[#allocation6_spill] sm:$0xff] }
 0x121   : > { %804 = vrot.lane.b32.xlu2 %v2749_v36, %s2610_s28 }
 0x122   : > { %802 = vrot.lane.b32.xlu1 %v2752_v37, %s2610_s28  ;;  %800 = vrot.lane.b32.xlu0 %v2714_v22, %s2610_s28 }
 0x123   : > { %v3415_v34 = vpop.permute.xlu2 %706 }
 0x124   : > { %5328 = vst [vmem:[#allocation104_spill] sm:$0xff] %v3415_v34  ;;  %v3417_v23 = vpop.permute.xlu1 %654  ;;  %v3419_v17 = vpop.permute.xlu0 %652  ;;  %v5336_v34 = vld [vmem:[#allocation11_spill] sm:$0xff] }
 0x125   : > { %5329 = vst [vmem:[#allocation105_spill] sm:$0xff] %v3417_v23 }
 0x126   : > { %5330 = vst [vmem:[#allocation106_spill] sm:$0xff] %v3419_v17  ;;  %v5337_v17 = vld [vmem:[#allocation12_spill] sm:$0xff] }
 0x129   : > { %810 = vrot.lane.b32.xlu2 %v2780_v47, %s2610_s28  ;;  %v5338_v47 = vld [vmem:[#allocation7_spill] sm:$0xff] }
 0x12a   : > { %808 = vrot.lane.b32.xlu1 %v5331_v40, %s2610_s28  ;;  %806 = vrot.lane.b32.xlu0 %v5332_v32, %s2610_s28 }
 0x12b   : > { %v3427_v3 = vpop.permute.xlu2 %712 }
 0x12c   : > { %5333 = vst [vmem:[#allocation6_spill] sm:$0xff] %v3427_v3  ;;  %v3429_v38 = vpop.permute.xlu1 %660  ;;  %v3431_v42 = vpop.permute.xlu0 %658  ;;  %v5342_v3 = vld [vmem:[#allocation14_spill] sm:$0xff] }
 0x12d   : > { %5334 = vst [vmem:[#allocation107_spill] sm:$0xff] %v3429_v38  ;;  %v5344_v38 = vld [vmem:[#allocation10_spill] sm:$0xff] }
 0x12e   : > { %5335 = vst [vmem:[#allocation108_spill] sm:$0xff] %v3431_v42  ;;  %v5343_v42 = vld [vmem:[#allocation15_spill] sm:$0xff] }
 0x131   : > { %816 = vrot.lane.b32.xlu2 %v5336_v34, %s2610_s28 }
 0x132   : > { %814 = vrot.lane.b32.xlu1 %v5337_v17, %s2610_s28  ;;  %812 = vrot.lane.b32.xlu0 %v5338_v47, %s2610_s28 }
 0x133   : > { %v3439_v23 = vpop.permute.xlu2 %718 }
 0x134   : > { %5339 = vst [vmem:[#allocation11_spill] sm:$0xff] %v3439_v23  ;;  %v3441_v40 = vpop.permute.xlu1 %698  ;;  %v3443_v18 = vpop.permute.xlu0 %664  ;;  %v5347_v23 = vld [vmem:[#allocation17_spill] sm:$0xff] }
 0x135   : > { %5340 = vst [vmem:[#allocation12_spill] sm:$0xff] %v3441_v40 }
 0x136   : > { %5341 = vst [vmem:[#allocation109_spill] sm:$0xff] %v3443_v18  ;;  %v5348_v18 = vld [vmem:[#allocation18_spill] sm:$0xff] }
 0x139   : > { %822 = vrot.lane.b32.xlu2 %v5342_v3, %s2610_s28  ;;  %v5349_v3 = vld [vmem:[#allocation13_spill] sm:$0xff] }
 0x13a   : > { %820 = vrot.lane.b32.xlu1 %v5343_v42, %s2610_s28  ;;  %818 = vrot.lane.b32.xlu0 %v5344_v38, %s2610_s28 }
 0x13b   : > { %v3451_v30 = vpop.permute.xlu2 %724 }
 0x13c   : > { %v3453_v35 = vpop.permute.xlu1 %704  ;;  %v3455_v47 = vpop.permute.xlu0 %702 }
 0x13d   : > { %5345 = vst [vmem:[#allocation10_spill] sm:$0xff] %v3453_v35  ;;  %v5354_v35 = vld [vmem:[#allocation21_spill] sm:$0xff] }
 0x13e   : > { %5346 = vst [vmem:[#allocation110_spill] sm:$0xff] %v3455_v47 }
 0x141   : > { %828 = vrot.lane.b32.xlu2 %v5347_v23, %s2610_s28  ;;  %v5355_v23 = vld [vmem:[#allocation16_spill] sm:$0xff] }
 0x142   : > { %826 = vrot.lane.b32.xlu1 %v5348_v18, %s2610_s28  ;;  %824 = vrot.lane.b32.xlu0 %v5349_v3, %s2610_s28 }
 0x143   : > { %v3463_v40 = vpop.permute.xlu2 %730 }
 0x144   : > { %5350 = vst [vmem:[#allocation111_spill] sm:$0xff] %v3463_v40  ;;  %v3465_v42 = vpop.permute.xlu1 %710  ;;  %v3467_v6 = vpop.permute.xlu0 %708 }
 0x145   : > { %5351 = vst [vmem:[#allocation112_spill] sm:$0xff] %v3465_v42  ;;  %v5359_v42 = vld [vmem:[#allocation24_spill] sm:$0xff] }
 0x146   : > { %5352 = vst [vmem:[#allocation113_spill] sm:$0xff] %v3467_v6  ;;  %v5360_v6 = vld [vmem:[#allocation25_spill] sm:$0xff] }
 0x149   : > { %834 = vrot.lane.b32.xlu2 %v5353_v12, %s2610_s28  ;;  %v5361_v12 = vld [vmem:[#allocation19_spill] sm:$0xff] }
 0x14a   : > { %832 = vrot.lane.b32.xlu1 %v5354_v35, %s2610_s28  ;;  %830 = vrot.lane.b32.xlu0 %v5355_v23, %s2610_s28 }
 0x14b   : > { %v3475_v18 = vpop.permute.xlu2 %736 }
 0x14c   : > { %5356 = vst [vmem:[#allocation16_spill] sm:$0xff] %v3475_v18  ;;  %v3477_v47 = vpop.permute.xlu1 %716  ;;  %v3479_v3 = vpop.permute.xlu0 %714  ;;  %v5365_v18 = vld [vmem:[#allocation27_spill] sm:$0xff] }
 0x14d   : > { %5357 = vst [vmem:[#allocation114_spill] sm:$0xff] %v3477_v47 }
 0x14e   : > { %5358 = vst [vmem:[#allocation115_spill] sm:$0xff] %v3479_v3 }
 0x151   : > { %840 = vrot.lane.b32.xlu2 %v5359_v42, %s2610_s28  ;;  %v5366_v42 = vld [vmem:[#allocation23_spill] sm:$0xff] }
 0x152   : > { %838 = vrot.lane.b32.xlu1 %v5360_v6, %s2610_s28  ;;  %836 = vrot.lane.b32.xlu0 %v5361_v12, %s2610_s28  ;;  %v3506_v12 = vld [vmem:[%s2662_s24 + $0x190] sm:$0x3] }
 0x153   : > { %v3487_v40 = vpop.permute.xlu2 %742  ;;  %5368 = vst [vmem:[#allocation120_spill] sm:$0xff] %v3506_v12 }
 0x154   : > { %5362 = vst [vmem:[#allocation116_spill] sm:$0xff] %v3487_v40  ;;  %v3489_v35 = vpop.permute.xlu1 %722  ;;  %v3491_v43 = vpop.permute.xlu0 %720 }
 0x155   : > { %5363 = vst [vmem:[#allocation117_spill] sm:$0xff] %v3489_v35  ;;  %v5369_v35 = vld [vmem:[#allocation31_spill] sm:$0xff] }
 0x156   : > { %5364 = vst [vmem:[#allocation118_spill] sm:$0xff] %v3491_v43  ;;  %v5370_v43 = vld [vmem:[#allocation26_spill] sm:$0xff] }
 0x159   : > { %846 = vrot.lane.b32.xlu2 %v5365_v18, %s2610_s28  ;;  %v486_v18 = vrot.slane %v3506_v12, 1 }
 0x15a   : > { %844 = vrot.lane.b32.xlu1 %v2981_v59, %s2610_s28  ;;  %842 = vrot.lane.b32.xlu0 %v5366_v42, %s2610_s28  ;;  %v484_v42 = vrot.slane %v3380_v2, 1 }
 0x15b   : > { %v3499_v47 = vpop.permute.xlu2 %748 }
 0x15c   : > { %5367 = vst [vmem:[#allocation119_spill] sm:$0xff] %v3499_v47  ;;  %v3501_v6 = vpop.permute.xlu1 %728  ;;  %v3503_v3 = vpop.permute.xlu0 %726  ;;  %v483_v47 = vrot.slane %v3383_v62, 1 }
 0x161   : > { %852 = vrot.lane.b32.xlu2 %v3005_v61, %s2610_s28  ;;  %v3524_v61 = vsel %vm318_vm0, %v484_v42, %v486_v18 }
 0x162   : > { %850 = vrot.lane.b32.xlu1 %v5369_v35, %s2610_s28  ;;  %848 = vrot.lane.b32.xlu0 %v5370_v43, %s2610_s28  ;;  %5373 = vst [vmem:[#allocation123_spill] sm:$0xff] %v3524_v61  ;;  %v3527_v35 = vsel %vm318_vm0, %v483_v47, %v484_v42  ;;  %v5377_v47 = vld [vmem:[#allocation32_spill] sm:$0xff] }
 0x163   : > { %v3514_v59 = vpop.permute.xlu2 %754  ;;  %5374 = vst [vmem:[#allocation124_spill] sm:$0xff] %v3527_v35 }
 0x164   : > { %5371 = vst [vmem:[#allocation121_spill] sm:$0xff] %v3514_v59  ;;  %v3519_v40 = vpop.permute.xlu1 %734  ;;  %v3521_v24 = vpop.permute.xlu0 %732 }
 0x165   : > { %5372 = vst [vmem:[#allocation122_spill] sm:$0xff] %v3521_v24  ;;  %v5386_v24 = vld [vmem:[#allocation36_spill] sm:$0xff] }
 0x169   : > { %890 = vrot.lane.b32.xlu2 %v3023_v11, %s2611_s29 }
 0x16a   : > { %856 = vrot.lane.b32.xlu1 %v3524_v61, %s2610_s28  ;;  %854 = vrot.lane.b32.xlu0 %v3527_v35, %s2610_s28  ;;  %v5381_v61 = vld [vmem:[#allocation34_spill] sm:$0xff] }
 0x16b   : > { %v3535_v12 = vpop.permute.xlu2 %760 }
 0x16c   : > { %5375 = vst [vmem:[#allocation125_spill] sm:$0xff] %v3535_v12  ;;  %v3537_v43 = vpop.permute.xlu1 %740  ;;  %v3539_v59 = vpop.permute.xlu0 %738  ;;  %v5380_v12 = vld [vmem:[#allocation37_spill] sm:$0xff] }
 0x16d   : > { %5376 = vst [vmem:[#allocation126_spill] sm:$0xff] %v3539_v59 }
 0x171   : > { %896 = vrot.lane.b32.xlu2 %v3042_v10, %s2611_s29 }
 0x172   : > { %894 = vrot.lane.b32.xlu1 %v3045_v48, %s2611_s29  ;;  %892 = vrot.lane.b32.xlu0 %v5377_v47, %s2611_s29 }
 0x173   : > { %v3547_v11 = vpop.permute.xlu2 %798 }
 0x174   : > { %5378 = vst [vmem:[#allocation32_spill] sm:$0xff] %v3547_v11  ;;  %v3549_v18 = vpop.permute.xlu1 %746  ;;  %v3551_v42 = vpop.permute.xlu0 %744  ;;  %v5384_v11 = vld [vmem:[#allocation40_spill] sm:$0xff] }
 0x175   : > { %5379 = vst [vmem:[#allocation127_spill] sm:$0xff] %v3551_v42  ;;  %v5385_v42 = vld [vmem:[#allocation41_spill] sm:$0xff] }
 0x179   : > { %902 = vrot.lane.b32.xlu2 %v3063_v45, %s2611_s29 }
 0x17a   : > { %900 = vrot.lane.b32.xlu1 %v5380_v12, %s2611_s29  ;;  %898 = vrot.lane.b32.xlu0 %v5381_v61, %s2611_s29 }
 0x17b   : > { %v3559_v35 = vpop.permute.xlu2 %804 }
 0x17c   : > { %5382 = vst [vmem:[#allocation37_spill] sm:$0xff] %v3559_v35  ;;  %v3561_v59 = vpop.permute.xlu1 %752  ;;  %v3563_v47 = vpop.permute.xlu0 %750  ;;  %v5390_v35 = vld [vmem:[#allocation39_spill] sm:$0xff] }
 0x17d   : > { %5383 = vst [vmem:[#allocation34_spill] sm:$0xff] %v3563_v47 }
 0x181   : > { %908 = vrot.lane.b32.xlu2 %v5384_v11, %s2611_s29 }
 0x182   : > { %906 = vrot.lane.b32.xlu1 %v5385_v42, %s2611_s29  ;;  %904 = vrot.lane.b32.xlu0 %v5386_v24, %s2611_s29 }
 0x183   : > { %v3571_v63 = vpop.permute.xlu2 %810 }
 0x184   : > { %5387 = vst [vmem:[#allocation128_spill] sm:$0xff] %v3571_v63  ;;  %v3573_v44 = vpop.permute.xlu1 %758  ;;  %v3575_v4 = vpop.permute.xlu0 %756  ;;  %v5394_v63 = vld [vmem:[#allocation52_spill] sm:$0xff] }
 0x185   : > { %5388 = vst [vmem:[#allocation129_spill] sm:$0xff] %v3573_v44 }
 0x186   : > { %5389 = vst [vmem:[#allocation130_spill] sm:$0xff] %v3575_v4  ;;  %v5395_v4 = vld [vmem:[#allocation45_spill] sm:$0xff] }
 0x189   : > { %914 = vrot.lane.b32.xlu2 %v3110_v60, %s2611_s29 }
 0x18a   : > { %912 = vrot.lane.b32.xlu1 %v3113_v5, %s2611_s29  ;;  %910 = vrot.lane.b32.xlu0 %v5390_v35, %s2611_s29 }
 0x18b   : > { %v3583_v11 = vpop.permute.xlu2 %816 }
 0x18c   : > { %5391 = vst [vmem:[#allocation39_spill] sm:$0xff] %v3583_v11  ;;  %v3585_v42 = vpop.permute.xlu1 %796  ;;  %v3587_v47 = vpop.permute.xlu0 %794  ;;  %v5398_v11 = vld [vmem:[#allocation50_spill] sm:$0xff] }
 0x18d   : > { %5392 = vst [vmem:[#allocation131_spill] sm:$0xff] %v3585_v42 }
 0x18e   : > { %5393 = vst [vmem:[#allocation132_spill] sm:$0xff] %v3587_v47 }
 0x191   : > { %920 = vrot.lane.b32.xlu2 %v3136_v33, %s2611_s29 }
 0x192   : > { %918 = vrot.lane.b32.xlu1 %v5394_v63, %s2611_s29  ;;  %916 = vrot.lane.b32.xlu0 %v5395_v4, %s2611_s29 }
 0x193   : > { %v3595_v24 = vpop.permute.xlu2 %822 }
 0x194   : > { %v3597_v44 = vpop.permute.xlu1 %802  ;;  %v3599_v60 = vpop.permute.xlu0 %800 }
 0x195   : > { %5396 = vst [vmem:[#allocation133_spill] sm:$0xff] %v3597_v44  ;;  %v5401_v44 = vld [vmem:[#allocation63_spill] sm:$0xff] }
 0x196   : > { %5397 = vst [vmem:[#allocation134_spill] sm:$0xff] %v3599_v60  ;;  %v5402_v60 = vld [vmem:[#allocation56_spill] sm:$0xff] }
 0x199   : > { %926 = vrot.lane.b32.xlu2 %v3161_v8, %s2611_s29 }
 0x19a   : > { %924 = vrot.lane.b32.xlu1 %v3164_v9, %s2611_s29  ;;  %922 = vrot.lane.b32.xlu0 %v5398_v11, %s2611_s29 }
 0x19b   : > { %v3607_v33 = vpop.permute.xlu2 %828 }
 0x19c   : > { %v3609_v63 = vpop.permute.xlu1 %808  ;;  %v3611_v42 = vpop.permute.xlu0 %806 }
 0x19d   : > { %5399 = vst [vmem:[#allocation135_spill] sm:$0xff] %v3609_v63  ;;  %v5405_v63 = vld [vmem:[#allocation61_spill] sm:$0xff] }
 0x19e   : > { %5400 = vst [vmem:[#allocation136_spill] sm:$0xff] %v3611_v42 }
 0x1a1   : > { %932 = vrot.lane.b32.xlu2 %v3187_v13, %s2611_s29 }
 0x1a2   : > { %930 = vrot.lane.b32.xlu1 %v5401_v44, %s2611_s29  ;;  %928 = vrot.lane.b32.xlu0 %v5402_v60, %s2611_s29 }
 0x1a3   : > { %v3619_v47 = vpop.permute.xlu2 %834 }
 0x1a4   : > { %v3621_v9 = vpop.permute.xlu1 %814  ;;  %v3623_v11 = vpop.permute.xlu0 %812 }
 0x1a5   : > { %5403 = vst [vmem:[#allocation56_spill] sm:$0xff] %v3621_v9  ;;  %v488_v9 = vrot.slane %v3383_v62, 2 }
 0x1a6   : > { %5404 = vst [vmem:[#allocation137_spill] sm:$0xff] %v3623_v11  ;;  %v5197_v11 = vrot.slane %v3380_v2, 2 }
 0x1a9   : > { %938 = vrot.lane.b32.xlu2 %v3212_v15, %s2611_s29  ;;  %v5407_v15 = vld [vmem:[#allocation67_spill] sm:$0xff] }
 0x1aa   : > { %936 = vrot.lane.b32.xlu1 %v3215_v28, %s2611_s29  ;;  %934 = vrot.lane.b32.xlu0 %v5405_v63, %s2611_s29 }
 0x1ab   : > { %v3631_v42 = vpop.permute.xlu2 %840 }
 0x1ac   : > { %v3633_v13 = vpop.permute.xlu1 %820  ;;  %v3635_v44 = vpop.permute.xlu0 %818 }
 0x1ad   : > { %5406 = vst [vmem:[#allocation138_spill] sm:$0xff] %v3635_v44  ;;  %v3652_v44 = vsel %vm399_vm1, %v488_v9, %v5197_v11 }
 0x1ae   : > { %5408 = vst [vmem:[#allocation139_spill] sm:$0xff] %v3652_v44 }
 0x1b1   : > { %944 = vrot.lane.b32.xlu2 %v3238_v41, %s2611_s29 }
 0x1b2   : > { %942 = vrot.lane.b32.xlu1 %v3241_v52, %s2611_s29  ;;  %940 = vrot.lane.b32.xlu0 %v5407_v15, %s2611_s29 }
 0x1b3   : > { %v3645_v28 = vpop.permute.xlu2 %846 }
 0x1b4   : > { %v3647_v63 = vpop.permute.xlu1 %826  ;;  %v825_v4 = vpop.permute.xlu0 %824 }
 0x1b9   : > { %950 = vrot.lane.b32.xlu2 %v3652_v44, %s2611_s29 }
 0x1ba   : > { %948 = vrot.lane.b32.xlu1 %v3257_v56, %s2611_s29  ;;  %946 = vrot.lane.b32.xlu0 %v3235_v39, %s2611_s29 }
 0x1bb   : > { %v3660_v62 = vpop.permute.xlu2 %852 }
 0x1bc   : > { %v3662_v15 = vpop.permute.xlu1 %832  ;;  %v831_v41 = vpop.permute.xlu0 %830 }
 0x1c1   : > { %1178 = vrot.lane.b32.xlu2 %v3045_v48, %s2612_s30  ;;  %v3679_v48 = vld [vmem:[%s2662_s24 + $0x38] sm:$0xff] }
 0x1c2   : > { %1082 = vrot.lane.b32.xlu1 %v2693_v14, %s2613_s6  ;;  %986 = vrot.lane.b32.xlu0 %v2666_v1, %s2614_s7  ;;  %5409 = vst [vmem:[#allocation140_spill] sm:$0xff] %v3679_v48 }
 0x1c3   : > { %v3670_v9 = vpop.permute.xlu2 %890 }
 0x1c4   : > { %v3672_v11 = vpop.permute.xlu1 %838  ;;  %v837_v2 = vpop.permute.xlu0 %836 }
 0x1c9   : > { %1180 = vrot.lane.b32.xlu2 %v3042_v10, %s2612_s30 }
 0x1ca   : > { %1084 = vrot.lane.b32.xlu1 %v2714_v22, %s2613_s6  ;;  %988 = vrot.lane.b32.xlu0 %v3679_v48, %s2614_s7 }
 0x1cb   : > { %v3683_v14 = vpop.permute.xlu2 %896 }
 0x1cc   : > { %v3685_v44 = vpop.permute.xlu1 %844  ;;  %v3687_v1 = vpop.permute.xlu0 %842 }
 0x1d1   : > { %1086 = vrot.lane.b32.xlu2 %v2752_v37, %s2613_s6 }
 0x1d2   : > { %1002 = vrot.lane.b32.xlu1 %v2798_v53, %s2614_s7  ;;  %990 = vrot.lane.b32.xlu0 %v2733_v29, %s2614_s7 }
 0x1d3   : > { %v3695_v22 = vpop.permute.xlu2 %902 }
 0x1d4   : > { %v3697_v10 = vpop.permute.xlu1 %850  ;;  %v3699_v48 = vpop.permute.xlu0 %848 }
 0x1d9   : > { %1194 = vrot.lane.b32.xlu2 %v5390_v35, %s2612_s30 }
 0x1da   : > { %1182 = vrot.lane.b32.xlu1 %v5381_v61, %s2612_s30  ;;  %1098 = vrot.lane.b32.xlu0 %v5337_v17, %s2613_s6 }
 0x1db   : > { %v3707_v37 = vpop.permute.xlu2 %908 }
 0x1dc   : > { %v3709_v53 = vpop.permute.xlu1 %856  ;;  %v3711_v29 = vpop.permute.xlu0 %854 }
 0x1dd   : > { %5410 = vst [vmem:[#allocation141_spill] sm:$0xff] %v3709_v53  ;;  %v1290_v53 = vsel %vm1274_vm2, %v2789_v50, %v3232_v16 }
 0x1e1   : > { %1088 = vrot.lane.b32.xlu2 %v2749_v36, %s2613_s6  ;;  %v1323_v36 = vsel %vm1307_vm3, %v1290_v53, %v3325_v25 }
 0x1e2   : > { %1004 = vrot.lane.b32.xlu1 %v2792_v51, %s2614_s7  ;;  %992 = vrot.lane.b32.xlu0 %v2727_v27, %s2614_s7  ;;  %v1356_v27 = vsel %vm1340_vm4, %v1323_v36, %v3501_v6  ;;  %v1293_v6 = vsel %vm1274_vm2, %v2864_v31, %v3254_v58 }
 0x1e3   : > { %v3719_v35 = vpop.permute.xlu2 %914  ;;  %v1389_v50 = vsel %vm1373_vm5, %v1356_v27, %v825_v4  ;;  %v5411_v27 = vld [vmem:[#allocation47_spill] sm:$0xff] }
 0x1e4   : > { %v3721_v61 = vpop.permute.xlu1 %894  ;;  %v3723_v17 = vpop.permute.xlu0 %892 }
 0x1e9   : > { %1184 = vrot.lane.b32.xlu2 %v5380_v12, %s2612_s30 }
 0x1ea   : > { %1018 = vrot.lane.b32.xlu1 %v2852_v20, %s2614_s7  ;;  %1100 = vrot.lane.b32.xlu0 %v5336_v34, %s2613_s6  ;;  %v1326_v20 = vsel %vm1307_vm3, %v1293_v6, %v3337_v46  ;;  %v5412_v6 = vld [vmem:[#allocation65_spill] sm:$0xff] }
 0x1eb   : > { %v921_v51 = vpop.permute.xlu2 %920  ;;  %v1359_v4 = vsel %vm1340_vm4, %v1326_v20, %v3519_v40 }
 0x1ec   : > { %v3739_v16 = vpop.permute.xlu1 %900  ;;  %v3742_v25 = vsel %vm1406_vm6, %v1389_v50, %v921_v51  ;;  %v3744_v12 = vpop.permute.xlu0 %898  ;;  %v1392_v34 = vsel %vm1373_vm5, %v1359_v4, %v831_v41  ;;  %v3779_v41 = vld [vmem:[%s2662_s24 + $0x60] sm:$0xff]  ;;  %v2534_v51 = vld [vmem:[%s2662_s24 + $0x98] sm:$0xff] }
 0x1f1   : > { %1210 = vrot.lane.b32.xlu2 %v3161_v8, %s2612_s30  ;;  %v1296_v8 = vsel %vm1274_vm2, %v2855_v21, %v3269_v19 }
 0x1f2   : > { %1114 = vrot.lane.b32.xlu1 %v5355_v23, %s2613_s6  ;;  %1196 = vrot.lane.b32.xlu0 %v3113_v5, %s2612_s30  ;;  %v1329_v40 = vsel %vm1307_vm3, %v1296_v8, %v3349_v26  ;;  %v5413_v8 = vld [vmem:[#allocation81_spill] sm:$0xff] }
 0x1f3   : > { %v927_v53 = vpop.permute.xlu2 %926  ;;  %v1362_v5 = vsel %vm1340_vm4, %v1329_v40, %v3537_v43  ;;  %v1299_v43 = vsel %vm1274_vm2, %v2930_v7, %v3281_v54 }
 0x1f4   : > { %v3760_v31 = vpop.permute.xlu1 %906  ;;  %v3763_v58 = vsel %vm1406_vm6, %v1392_v34, %v927_v53  ;;  %v3765_v46 = vpop.permute.xlu0 %904  ;;  %v1395_v23 = vsel %vm1373_vm5, %v1362_v5, %v837_v2  ;;  %v1288_v2 = vsel %vm1274_vm2, %v2534_v51, %v5412_v6  ;;  %v1332_v20 = vsel %vm1307_vm3, %v1299_v43, %v3361_v55  ;;  %v3837_v5 = vld [vmem:[%s2662_s24 + $0xc8] sm:$0xff]  ;;  %v5419_v6 = vld [vmem:[#allocation96_spill] sm:$0xff] }
 0x1f5   : > { %v1321_v7 = vsel %vm1307_vm3, %v1288_v2, %v3365_v0  ;;  %v1365_v54 = vsel %vm1340_vm4, %v1332_v20, %v3549_v18 }
 0x1f6   : > { %v1398_v0 = vsel %vm1373_vm5, %v1365_v54, %v3687_v1  ;;  %v5414_v1 = vld [vmem:[#allocation22_spill] sm:$0xff]  ;;  %v5422_v54 = vld [vmem:[#allocation111_spill] sm:$0xff] }
 0x1f7   : > { %v1302_v40 = vsel %vm1274_vm2, %v5414_v1, %v5413_v8 }
 0x1f9   : > { %1090 = vrot.lane.b32.xlu2 %v5332_v32, %s2613_s6 }
 0x1fa   : > { %1006 = vrot.lane.b32.xlu1 %v2786_v49, %s2614_s7  ;;  %994 = vrot.lane.b32.xlu0 %v3779_v41, %s2614_s7  ;;  %v2533_v49 = vld [vmem:[%s2662_s24 + $0xa8] sm:$0xff] }
 0x1fb   : > { %v933_v19 = vpop.permute.xlu2 %932  ;;  %v1289_v50 = vsel %vm1274_vm2, %v2533_v49, %v5411_v27  ;;  %v5417_v49 = vld [vmem:[#allocation94_spill] sm:$0xff] }
 0x1fc   : > { %v3784_v36 = vpop.permute.xlu1 %912  ;;  %v3787_v26 = vsel %vm1406_vm6, %v1395_v23, %v933_v19  ;;  %v3789_v32 = vpop.permute.xlu0 %910  ;;  %v1322_v4 = vsel %vm1307_vm3, %v1289_v50, %v3363_v57  ;;  %v3843_v23 = vld [vmem:[%s2662_s24 + $0xc0] sm:$0xff]  ;;  %v5416_v19 = vld [vmem:[#allocation71_spill] sm:$0xff]  ;;  %v1335_v27 = vsel %vm1307_vm3, %v1302_v40, %v5417_v49 }
 0x1fd   : > { %v1355_v55 = vsel %vm1340_vm4, %v1322_v4, %v3503_v3  ;;  %v1291_v43 = vsel %vm1274_vm2, %v3843_v23, %v5416_v19  ;;  %v5418_v50 = vld [vmem:[#allocation95_spill] sm:$0xff]  ;;  %v1368_v20 = vsel %vm1340_vm4, %v1335_v27, %v3561_v59  ;;  %v5420_v4 = vld [vmem:[#allocation21_spill] sm:$0xff]  ;;  %v5426_v19 = vld [vmem:[#allocation58_spill] sm:$0xff] }
 0x1fe   : > { %v1388_v18 = vsel %vm1373_vm5, %v1355_v55, %v3595_v24  ;;  %v5415_v24 = vld [vmem:[#allocation53_spill] sm:$0xff]  ;;  %v1324_v2 = vsel %vm1307_vm3, %v1291_v43, %v5419_v6  ;;  %v5423_v55 = vld [vmem:[#allocation122_spill] sm:$0xff] }
 0x1ff   : > { %v5425_v40 = vld [vmem:[#allocation29_spill] sm:$0xff]  ;;  %v5427_v27 = vld [vmem:[#allocation74_spill] sm:$0xff] }
 0x200   : > { %v3894_v49 = vld [vmem:[%s2662_s24 + $0xe0] sm:$0xff] }
 0x201   : > { %1186 = vrot.lane.b32.xlu2 %v3063_v45, %s2612_s30  ;;  %v1354_v45 = vsel %vm1340_vm4, %v1321_v7, %v3451_v30  ;;  %v5421_v7 = vld [vmem:[#allocation46_spill] sm:$0xff] }
 0x202   : > { %1020 = vrot.lane.b32.xlu1 %v2855_v21, %s2614_s7  ;;  %1102 = vrot.lane.b32.xlu0 %v5344_v38, %s2613_s6  ;;  %v1387_v21 = vsel %vm1373_vm5, %v1354_v45, %v3633_v13  ;;  %v1292_v13 = vsel %vm1274_vm2, %v3837_v5, %v5415_v24  ;;  %v1357_v45 = vsel %vm1340_vm4, %v1324_v2, %v5422_v54  ;;  %v5429_v2 = vld [vmem:[#allocation9_spill] sm:$0xff] }
 0x203   : > { %v939_v57 = vpop.permute.xlu2 %938  ;;  %v1325_v51 = vsel %vm1307_vm3, %v1292_v13, %v5418_v50  ;;  %v1390_v59 = vsel %vm1373_vm5, %v1357_v45, %v3647_v63  ;;  %v1541_v63 = vld [vmem:[%s5108_s1 + $0x18] sm:$0xff]  ;;  %v2537_v13 = vld [vmem:[%s2662_s24 + $0xf0] sm:$0xff]  ;;  %v1294_v50 = vsel %vm1274_vm2, %v3894_v49, %v5427_v27  ;;  %v1539_v27 = vld [vmem:[%s5108_s1 + $0x8] sm:$0xff] }
 0x204   : > { %v919_v34 = vpop.permute.xlu1 %918  ;;  %v3825_v53 = vsel %vm1406_vm6, %v1398_v0, %v939_v57  ;;  %v917_v38 = vpop.permute.xlu0 %916  ;;  %v1401_v0 = vsel %vm1373_vm5, %v1368_v20, %v3699_v48  ;;  %v5424_v48 = vld [vmem:[#allocation84_spill] sm:$0xff]  ;;  %v1295_v43 = vsel %vm1274_vm2, %v2537_v13, %v5426_v19  ;;  %v5430_v20 = vld [vmem:[#allocation99_spill] sm:$0xff]  ;;  %v5432_v45 = vld [vmem:[#allocation129_spill] sm:$0xff] }
 0x205   : > { %v3828_v30 = vsel %vm1406_vm6, %v1388_v18, %v919_v34  ;;  %v3831_v3 = vsel %vm1406_vm6, %v1387_v21, %v917_v38  ;;  %v1305_v24 = vsel %vm1274_vm2, %v5425_v40, %v5424_v48 }
 0x209   : > { %1212 = vrot.lane.b32.xlu2 %v5402_v60, %s2612_s30  ;;  %v1358_v60 = vsel %vm1340_vm4, %v1325_v51, %v5423_v55  ;;  %v5428_v51 = vld [vmem:[#allocation98_spill] sm:$0xff] }
 0x20a   : > { %1116 = vrot.lane.b32.xlu1 %v5420_v4, %s2613_s6  ;;  %1198 = vrot.lane.b32.xlu0 %v5421_v7, %s2612_s30  ;;  %v1391_v18 = vsel %vm1373_vm5, %v1358_v60, %v3607_v33  ;;  %v1542_v33 = vld [vmem:[%s5108_s1 + $0x20] sm:$0xf]  ;;  %v1338_v6 = vsel %vm1307_vm3, %v1305_v24, %v5428_v51  ;;  %v1328_v4 = vsel %vm1307_vm3, %v1295_v43, %v5430_v20  ;;  %v5431_v7 = vld [vmem:[#allocation100_spill] sm:$0xff] }
 0x20b   : > { %v945_v57 = vpop.permute.xlu2 %944  ;;  %2450 = vmatpush.msk.msra.mxu0 %vm1644_vm7, %v1542_v33  ;;  %2489 = vmatpush.msk.msra.mxu1 %vm1644_vm7, %v1542_v33  ;;  %v1327_v54 = vsel %vm1307_vm3, %v1294_v50, %v5431_v7  ;;  %v1371_v55 = vsel %vm1340_vm4, %v1338_v6, %v5432_v45  ;;  %v2539_v60 = vld [vmem:[%s2662_s24 + $0xb0] sm:$0xff]  ;;  %v2542_v6 = vld [vmem:[%s2662_s24 + $0x108] sm:$0xff] }
 0x20c   : > { %v925_v21 = vpop.permute.xlu1 %924  ;;  %v3873_v34 = vsel %vm1406_vm6, %v1401_v0, %v945_v57  ;;  %v923_v38 = vpop.permute.xlu0 %922  ;;  %2490 = vmatpush.msk.msra.mxu2 %vm1644_vm7, %v1542_v33  ;;  %2491 = vmatpush.msk.msra.mxu3 %vm1644_vm7, %v1542_v33  ;;  %v3912_v0 = vld [vmem:[%s2662_s24 + $0x68] sm:$0xff]  ;;  %v1540_v57 = vld [vmem:[%s5108_s1 + $0x10] sm:$0xff]  ;;  %v1404_v33 = vsel %vm1373_vm5, %v1371_v55, %v3711_v29 }
 0x20d   : > { %v3876_v8 = vsel %vm1406_vm6, %v1391_v18, %v925_v21  ;;  %v3879_v1 = vsel %vm1406_vm6, %v1390_v59, %v923_v38  ;;  %1660 = vmatpush.msra.mxu0 %v1541_v63  ;;  %2492 = vmatpush.msra.mxu1 %v1541_v63  ;;  %v5433_v18 = vld [vmem:[#allocation16_spill] sm:$0xff]  ;;  %v5434_v21 = vld [vmem:[#allocation126_spill] sm:$0xff]  ;;  %v5438_v45 = vld [vmem:[#allocation103_spill] sm:$0xff] }
 0x20e   : > { %2493 = vmatpush.msra.mxu2 %v1541_v63  ;;  %v1360_v59 = vsel %vm1340_vm4, %v1327_v54, %v5433_v18  ;;  %v1361_v38 = vsel %vm1340_vm4, %v1328_v4, %v5434_v21  ;;  %2494 = vmatpush.msra.mxu3 %v1541_v63  ;;  %v3945_v63 = vld [vmem:[%s2662_s24 + $0x110] sm:$0xff]  ;;  %v5437_v7 = vld [vmem:[#allocation102_spill] sm:$0xff] }
 0x20f   : > { %1661 = vmatpush.msra.mxu0 %v1540_v57  ;;  %2495 = vmatpush.msra.mxu1 %v1540_v57  ;;  %v1394_v40 = vsel %vm1373_vm5, %v1361_v38, %v3619_v47  ;;  %v1393_v24 = vsel %vm1373_vm5, %v1360_v59, %v3662_v15  ;;  %v1538_v15 = vld [vmem:[%s5108_s1] sm:$0xff]  ;;  %v5435_v50 = vld [vmem:[#allocation64_spill] sm:$0xff]  ;;  %v5441_v59 = vld [vmem:[#allocation127_spill] sm:$0xff] }
 0x210   : > { %2496 = vmatpush.msra.mxu2 %v1540_v57  ;;  %2497 = vmatpush.msra.mxu3 %v1540_v57  ;;  %v1298_v51 = vsel %vm1274_vm2, %v3945_v63, %v5435_v50  ;;  %v2543_v4 = vld [vmem:[%s2662_s24 + $0x150] sm:$0xff]  ;;  %v5442_v50 = vld [vmem:[#allocation70_spill] sm:$0xff] }
 0x211   : > { %1092 = vrot.lane.b32.xlu2 %v5429_v2, %s2613_s6  ;;  %1662 = vmatpush.msra.mxu0 %v1539_v27  ;;  %v5436_v2 = vld [vmem:[#allocation76_spill] sm:$0xff]  ;;  %v1331_v54 = vsel %vm1307_vm3, %v1298_v51, %v5437_v7  ;;  %v3985_v51 = vld [vmem:[%s2662_s24 + $0x128] sm:$0xff] }
 0x212   : > { %1008 = vrot.lane.b32.xlu1 %v2539_v60, %s2614_s7  ;;  %996 = vrot.lane.b32.xlu0 %v3912_v0, %s2614_s7  ;;  %v1297_v20 = vsel %vm1274_vm2, %v2542_v6, %v5436_v2  ;;  %v5439_v60 = vld [vmem:[#allocation15_spill] sm:$0xff]  ;;  %v5440_v57 = vld [vmem:[#allocation116_spill] sm:$0xff]  ;;  %v1364_v21 = vsel %vm1340_vm4, %v1331_v54, %v5441_v59  ;;  %v5445_v2 = vld [vmem:[#allocation105_spill] sm:$0xff] }
 0x213   : > { %v951_v48 = vpop.permute.xlu2 %950  ;;  %2498 = vmatpush.msra.mxu1 %v1539_v27  ;;  %2499 = vmatpush.msra.mxu2 %v1539_v27  ;;  %v1330_v55 = vsel %vm1307_vm3, %v1297_v20, %v5438_v45  ;;  %v5446_v7 = vld [vmem:[#allocation106_spill] sm:$0xff]  ;;  %v5447_v45 = vld [vmem:[#allocation45_spill] sm:$0xff] }
 0x214   : > { %v931_v13 = vpop.permute.xlu1 %930  ;;  %v3930_v19 = vsel %vm1406_vm6, %v1404_v33, %v951_v48  ;;  %v929_v43 = vpop.permute.xlu0 %928  ;;  %1663 = vmatpush.msra.mxu0 %v1538_v15  ;;  %2500 = vmatpush.msra.mxu3 %v1539_v27  ;;  %v1363_v18 = vsel %vm1340_vm4, %v1330_v55, %v5440_v57  ;;  %v1397_v33 = vsel %vm1373_vm5, %v1364_v21, %v3631_v42  ;;  %v3979_v27 = vld [vmem:[%s2662_s24 + $0x138] sm:$0xff]  ;;  %v5443_v42 = vld [vmem:[#allocation78_spill] sm:$0xff] }
 0x215   : > { %v3936_v29 = vsel %vm1406_vm6, %v1394_v40, %v931_v13  ;;  %v3939_v47 = vsel %vm1406_vm6, %v1393_v24, %v929_v43  ;;  %2501 = vmatpush.msra.mxu1 %v1538_v15  ;;  %2502 = vmatpush.msra.mxu2 %v1538_v15  ;;  %v1396_v48 = vsel %vm1373_vm5, %v1363_v18, %v3672_v11  ;;  %v5448_v55 = vld [vmem:[#allocation36_spill] sm:$0xff]  ;;  %v5450_v18 = vld [vmem:[#allocation34_spill] sm:$0xff] }
 0x216   : > { %2503 = vmatpush.msra.mxu3 %v1538_v15  ;;  %v1301_v15 = vsel %vm1274_vm2, %v3979_v27, %v5442_v50  ;;  %v1300_v11 = vsel %vm1274_vm2, %v3985_v51, %v5443_v42  ;;  %v2546_v42 = vld [vmem:[%s2662_s24 + $0x158] sm:$0xff] }
 0x217   : > { %v1334_v20 = vsel %vm1307_vm3, %v1301_v15, %v5445_v2  ;;  %v1333_v54 = vsel %vm1307_vm3, %v1300_v11, %v5446_v7  ;;  %v5451_v11 = vld [vmem:[#allocation73_spill] sm:$0xff]  ;;  %v5452_v2 = vld [vmem:[#allocation80_spill] sm:$0xff] }
 0x218   : > { %v1367_v59 = vsel %vm1340_vm4, %v1334_v20, %v5450_v18  ;;  %v1303_v20 = vsel %vm1274_vm2, %v2543_v4, %v5452_v2  ;;  %v5454_v7 = vld [vmem:[#allocation108_spill] sm:$0xff] }
 0x219   : > { %1034 = vrot.lane.b32.xlu2 %v2543_v4, %s2614_s7  ;;  %v5458_v4 = vld [vmem:[#allocation130_spill] sm:$0xff]  ;;  %v5459_v2 = vld [vmem:[#allocation44_spill] sm:$0xff] }
 0x21a   : > { %1022 = vrot.lane.b32.xlu1 %v2542_v6, %s2614_s7  ;;  %1104 = vrot.lane.b32.xlu0 %v5439_v60, %s2613_s6  ;;  %v5444_v6 = vld [vmem:[#allocation20_spill] sm:$0xff]  ;;  %v5449_v60 = vld [vmem:[#allocation119_spill] sm:$0xff] }
 0x21b   : > { %v3966_v38 = vpop.permute.xlu2 %1178  ;;  %v1366_v57 = vsel %vm1340_vm4, %v1333_v54, %v5449_v60  ;;  %v1336_v54 = vsel %vm1307_vm3, %v1303_v20, %v5454_v7  ;;  %v5457_v60 = vld [vmem:[#allocation121_spill] sm:$0xff]  ;;  %v5462_v7 = vld [vmem:[#allocation12_spill] sm:$0xff] }
 0x21c   : > { %v937_v40 = vpop.permute.xlu1 %936  ;;  %v935_v24 = vpop.permute.xlu0 %934 }
 0x21d   : > { %v3973_v13 = vsel %vm1406_vm6, %v1397_v33, %v937_v40  ;;  %v3976_v43 = vsel %vm1406_vm6, %v1396_v48, %v935_v24  ;;  %v1400_v33 = vsel %vm1373_vm5, %v1367_v59, %v3645_v28  ;;  %v1399_v48 = vsel %vm1373_vm5, %v1366_v57, %v3685_v44  ;;  %v5453_v44 = vld [vmem:[#allocation107_spill] sm:$0xff] }
 0x21e   : > { %v1369_v57 = vsel %vm1340_vm4, %v1336_v54, %v5457_v60  ;;  %v4057_v54 = vld [vmem:[%s2662_s24 + $0x78] sm:$0xff] }
 0x221   : > { %1118 = vrot.lane.b32.xlu2 %v5444_v6, %s2613_s6  ;;  %v1304_v6 = vsel %vm1274_vm2, %v2546_v42, %v5451_v11 }
 0x222   : > { %1200 = vrot.lane.b32.xlu1 %v5447_v45, %s2612_s30  ;;  %1188 = vrot.lane.b32.xlu0 %v5448_v55, %s2612_s30  ;;  %v1337_v28 = vsel %vm1307_vm3, %v1304_v6, %v5453_v44  ;;  %v5455_v45 = vld [vmem:[#allocation63_spill] sm:$0xff]  ;;  %v2547_v6 = vld [vmem:[%s2662_s24] sm:$0xff] }
 0x223   : > { %v1181_v21 = vpop.permute.xlu2 %1180  ;;  %v5456_v55 = vld [vmem:[#allocation27_spill] sm:$0xff]  ;;  %v1370_v18 = vsel %vm1340_vm4, %v1337_v28, %v5458_v4  ;;  %v1275_v20 = vsel %vm1274_vm2, %v2547_v6, %v5459_v2 }
 0x224   : > { %v943_v40 = vpop.permute.xlu1 %942  ;;  %v941_v24 = vpop.permute.xlu0 %940  ;;  %v1403_v59 = vsel %vm1373_vm5, %v1370_v18, %v3660_v62  ;;  %v5460_v44 = vld [vmem:[#allocation75_spill] sm:$0xff]  ;;  %v5461_v62 = vld [vmem:[#allocation8_spill] sm:$0xff] }
 0x225   : > { %v4009_v50 = vsel %vm1406_vm6, %v1400_v33, %v943_v40  ;;  %v4012_v15 = vsel %vm1406_vm6, %v1399_v48, %v941_v24  ;;  %v1402_v33 = vsel %vm1373_vm5, %v1369_v57, %v3697_v10  ;;  %v1308_v28 = vsel %vm1307_vm3, %v1275_v20, %v5460_v44  ;;  %v5465_v2 = vld [vmem:[#allocation87_spill] sm:$0xff]  ;;  %v5466_v20 = vld [vmem:[#allocation101_spill] sm:$0xff] }
 0x226   : > { %v1341_v10 = vsel %vm1340_vm4, %v1308_v28, %v5462_v7  ;;  %v5468_v28 = vld [vmem:[#allocation131_spill] sm:$0xff] }
 0x229   : > { %1226 = vrot.lane.b32.xlu2 %v3241_v52, %s2612_s30 }
 0x22a   : > { %1214 = vrot.lane.b32.xlu1 %v5455_v45, %s2612_s30  ;;  %1130 = vrot.lane.b32.xlu0 %v5456_v55, %s2613_s6  ;;  %v5463_v45 = vld [vmem:[#allocation132_spill] sm:$0xff] }
 0x22b   : > { %v4033_v52 = vpop.permute.xlu2 %1086  ;;  %v1374_v55 = vsel %vm1373_vm5, %v1341_v10, %v5463_v45 }
 0x22c   : > { %v949_v48 = vpop.permute.xlu1 %948  ;;  %v947_v40 = vpop.permute.xlu0 %946  ;;  %v1407_v57 = vsel %vm1406_vm6, %v1374_v55, %v3670_v9 }
 0x22d   : > { %v4040_v24 = vsel %vm1406_vm6, %v1403_v59, %v949_v48  ;;  %v4043_v11 = vsel %vm1406_vm6, %v1402_v33, %v947_v40  ;;  %v2549_v48 = vld [vmem:[%s2662_s24 + $0x8] sm:$0xff]  ;;  %v5464_v40 = vld [vmem:[#allocation49_spill] sm:$0xff] }
 0x22e   : > { %v1276_v6 = vsel %vm1274_vm2, %v2549_v48, %v5464_v40 }
 0x22f   : > { %v1309_v9 = vsel %vm1307_vm3, %v1276_v6, %v5465_v2  ;;  %v5473_v2 = vld [vmem:[#allocation86_spill] sm:$0xff] }
 0x230   : > { %v1342_v44 = vsel %vm1340_vm4, %v1309_v9, %v5466_v20  ;;  %v5474_v9 = vld [vmem:[#allocation110_spill] sm:$0xff] }
 0x231   : > { %1094 = vrot.lane.b32.xlu2 %v5461_v62, %s2613_s6  ;;  %v1375_v62 = vsel %vm1373_vm5, %v1342_v44, %v5468_v28  ;;  %v5475_v44 = vld [vmem:[#allocation38_spill] sm:$0xff]  ;;  %v5476_v28 = vld [vmem:[#allocation32_spill] sm:$0xff] }
 0x232   : > { %1010 = vrot.lane.b32.xlu1 %v3843_v23, %s2614_s7  ;;  %998 = vrot.lane.b32.xlu0 %v4057_v54, %s2614_s7  ;;  %v1408_v10 = vsel %vm1406_vm6, %v1375_v62, %v3723_v17 }
 0x233   : > { %v1195_v60 = vpop.permute.xlu2 %1194 }
 0x234   : > { %v1083_v4 = vpop.permute.xlu1 %1082  ;;  %v987_v18 = vpop.permute.xlu0 %986 }
 0x235   : > { %v1440_v59 = vsel %vm1439_vm8, %v1407_v57, %v987_v18  ;;  %v5470_v18 = vld [vmem:[#allocation52_spill] sm:$0xff] }
 0x236   : > { %v1473_v23 = vsel %vm1472_vm9, %v1440_v59, %v1083_v4  ;;  %v5471_v59 = vld [vmem:[#allocation41_spill] sm:$0xff] }
 0x237   : > { %v1506_v33 = vsel %vm1505_vm10, %v1473_v23, %v3966_v38  ;;  %v5467_v38 = vld [vmem:[#allocation14_spill] sm:$0xff]  ;;  %v2550_v23 = vld [vmem:[%s2662_s24 + $0x18] sm:$0xff] }
 0x238   : > { %2451 = vmatmul.msk.f32.vlgmr.msra.gmra.mxu0 %vm1547_vm11, %v1506_v33  ;;  %v5472_v33 = vld [vmem:[#allocation43_spill] sm:$0xff] }
 0x239   : > { %1036 = vrot.lane.b32.xlu2 %v2546_v42, %s2614_s7  ;;  %v1277_v48 = vsel %vm1274_vm2, %v2550_v23, %v5472_v33  ;;  %v5482_v23 = vld [vmem:[#allocation26_spill] sm:$0xff] }
 0x23a   : > { %1024 = vrot.lane.b32.xlu1 %v3945_v63, %s2614_s7  ;;  %1106 = vrot.lane.b32.xlu0 %v5467_v38, %s2613_s6  ;;  %v5469_v63 = vld [vmem:[#allocation19_spill] sm:$0xff]  ;;  %v1283_v38 = vsel %vm1274_vm2, %v3779_v41, %v5475_v44 }
 0x23b   : > { %v1089_v7 = vpop.permute.xlu2 %1088 }
 0x23c   : > { %v1085_v45 = vpop.permute.xlu1 %1084  ;;  %v989_v55 = vpop.permute.xlu0 %988 }
 0x23d   : > { %v1441_v42 = vsel %vm1439_vm8, %v1408_v10, %v989_v55  ;;  %v5477_v10 = vld [vmem:[#allocation90_spill] sm:$0xff] }
 0x23e   : > { %v1474_v57 = vsel %vm1472_vm9, %v1441_v42, %v1085_v45  ;;  %v1316_v45 = vsel %vm1307_vm3, %v1283_v38, %v5477_v10  ;;  %v5478_v42 = vld [vmem:[#allocation115_spill] sm:$0xff]  ;;  %v5483_v38 = vld [vmem:[#allocation48_spill] sm:$0xff]  ;;  %v5486_v10 = vld [vmem:[#allocation10_spill] sm:$0xff] }
 0x23f   : > { %v1507_v4 = vsel %vm1505_vm10, %v1474_v57, %v1181_v21  ;;  %v1310_v21 = vsel %vm1307_vm3, %v1277_v48, %v5473_v2  ;;  %v1349_v57 = vsel %vm1340_vm4, %v1316_v45, %v5478_v42 }
 0x240   : > { %2452 = vmatmul.msk.f32.gmra.mxu0 %vm1547_vm11, %v1507_v4  ;;  %v1343_v20 = vsel %vm1340_vm4, %v1310_v21, %v5474_v9 }
 0x241   : > { %1120 = vrot.lane.b32.xlu2 %v5469_v63, %s2613_s6  ;;  %v1376_v62 = vsel %vm1373_vm5, %v1343_v20, %v5476_v28  ;;  %v5479_v63 = vld [vmem:[#allocation72_spill] sm:$0xff] }
 0x242   : > { %1202 = vrot.lane.b32.xlu1 %v5470_v18, %s2612_s30  ;;  %1190 = vrot.lane.b32.xlu0 %v5471_v59, %s2612_s30  ;;  %v1409_v55 = vsel %vm1406_vm6, %v1376_v62, %v3721_v61  ;;  %v5480_v18 = vld [vmem:[#allocation128_spill] sm:$0xff]  ;;  %v5481_v59 = vld [vmem:[#allocation62_spill] sm:$0xff] }
 0x243   : > { %v1185_v17 = vpop.permute.xlu2 %1184  ;;  %v1382_v41 = vsel %vm1373_vm5, %v1349_v57, %v5480_v18 }
 0x244   : > { %v1003_v40 = vpop.permute.xlu1 %1002  ;;  %v991_v6 = vpop.permute.xlu0 %990  ;;  %v1415_v61 = vsel %vm1406_vm6, %v1382_v41, %v3760_v31  ;;  %v2551_v31 = vld [vmem:[%s2662_s24 + $0x20] sm:$0xff] }
 0x245   : > { %v1442_v4 = vsel %vm1439_vm8, %v1409_v55, %v991_v6  ;;  %v1448_v48 = vsel %vm1439_vm8, %v1415_v61, %v1003_v40  ;;  %v1278_v28 = vsel %vm1274_vm2, %v2551_v31, %v5483_v38  ;;  %v5484_v40 = vld [vmem:[#allocation77_spill] sm:$0xff]  ;;  %v5487_v55 = vld [vmem:[#allocation134_spill] sm:$0xff] }
 0x246   : > { %v1475_v21 = vsel %vm1472_vm9, %v1442_v4, %v4033_v52  ;;  %v1311_v62 = vsel %vm1307_vm3, %v1278_v28, %v5484_v40  ;;  %v5485_v52 = vld [vmem:[#allocation7_spill] sm:$0xff]  ;;  %v2554_v61 = vld [vmem:[%s2662_s24 + $0x120] sm:$0xff] }
 0x247   : > { %v1344_v45 = vsel %vm1340_vm4, %v1311_v62, %v5486_v10  ;;  %v5492_v31 = vld [vmem:[#allocation137_spill] sm:$0xff]  ;;  %v5494_v62 = vld [vmem:[#allocation51_spill] sm:$0xff] }
 0x248   : > { %v1377_v42 = vsel %vm1373_vm5, %v1344_v45, %v5487_v55  ;;  %v5493_v28 = vld [vmem:[#allocation25_spill] sm:$0xff] }
 0x249   : > { %1228 = vrot.lane.b32.xlu2 %v5479_v63, %s2612_s30  ;;  %v1410_v4 = vsel %vm1406_vm6, %v1377_v42, %v3683_v14 }
 0x24a   : > { %1216 = vrot.lane.b32.xlu1 %v5481_v59, %s2612_s30  ;;  %1132 = vrot.lane.b32.xlu0 %v5482_v23, %s2613_s6  ;;  %v2553_v23 = vld [vmem:[%s2662_s24 + $0x168] sm:$0xff] }
 0x24b   : > { %v1211_v33 = vpop.permute.xlu2 %1210 }
 0x24c   : > { %v1183_v6 = vpop.permute.xlu1 %1182  ;;  %v1099_v2 = vpop.permute.xlu0 %1098 }
 0x24d   : > { %v1481_v9 = vsel %vm1472_vm9, %v1448_v48, %v1099_v2  ;;  %v1508_v20 = vsel %vm1505_vm10, %v1475_v21, %v1183_v6  ;;  %v5488_v48 = vld [vmem:[#allocation13_spill] sm:$0xff]  ;;  %v5489_v21 = vld [vmem:[#allocation60_spill] sm:$0xff] }
 0x24e   : > { %2453 = vmatmul.msk.f32.gmra.mxu0 %vm1547_vm11, %v1508_v20  ;;  %v1514_v44 = vsel %vm1505_vm10, %v1481_v9, %v1195_v60  ;;  %v4145_v60 = vld [vmem:[%s2662_s24 + $0x80] sm:$0xff] }
 0x24f   : > { %2459 = vmatmul.msk.f32.vlgmr.msra.gmra.mxu1 %vm1547_vm11, %v1514_v44  ;;  %v5490_v9 = vld [vmem:[#allocation82_spill] sm:$0xff] }
 0x250   : > { %v5491_v20 = vld [vmem:[#allocation114_spill] sm:$0xff] }
 0x251   : > { %1096 = vrot.lane.b32.xlu2 %v5485_v52, %s2613_s6 }
 0x252   : > { %1012 = vrot.lane.b32.xlu1 %v3837_v5, %s2614_s7  ;;  %1000 = vrot.lane.b32.xlu0 %v4145_v60, %s2614_s7 }
 0x253   : > { %v1091_v57 = vpop.permute.xlu2 %1090 }
 0x254   : > { %v1005_v63 = vpop.permute.xlu1 %1004  ;;  %v993_v18 = vpop.permute.xlu0 %992 }
 0x255   : > { %v1443_v41 = vsel %vm1439_vm8, %v1410_v4, %v993_v18 }
 0x256   : > { %v1476_v59 = vsel %vm1472_vm9, %v1443_v41, %v1089_v7  ;;  %v1284_v7 = vsel %vm1274_vm2, %v3912_v0, %v5489_v21  ;;  %v5495_v0 = vld [vmem:[#allocation40_spill] sm:$0xff] }
 0x257   : > { %v1509_v5 = vsel %vm1505_vm10, %v1476_v59, %v1185_v17  ;;  %v1317_v17 = vsel %vm1307_vm3, %v1284_v7, %v5490_v9  ;;  %v2555_v59 = vld [vmem:[%s2662_s24 + $0x30] sm:$0xff] }
 0x258   : > { %2454 = vmatmul.msk.f32.gmra.mxu0 %vm1547_vm11, %v1509_v5  ;;  %v1350_v44 = vsel %vm1340_vm4, %v1317_v17, %v5491_v20 }
 0x259   : > { %1038 = vrot.lane.b32.xlu2 %v2553_v23, %s2614_s7  ;;  %v1383_v38 = vsel %vm1373_vm5, %v1350_v44, %v5492_v31  ;;  %v5497_v23 = vld [vmem:[#allocation89_spill] sm:$0xff] }
 0x25a   : > { %1026 = vrot.lane.b32.xlu1 %v2554_v61, %s2614_s7  ;;  %1108 = vrot.lane.b32.xlu0 %v5488_v48, %s2613_s6  ;;  %v1416_v40 = vsel %vm1406_vm6, %v1383_v38, %v3707_v37  ;;  %v5498_v61 = vld [vmem:[#allocation104_spill] sm:$0xff]  ;;  %v5502_v38 = vld [vmem:[#allocation18_spill] sm:$0xff] }
 0x25b   : > { %v1187_v14 = vpop.permute.xlu2 %1186  ;;  %v1449_v52 = vsel %vm1439_vm8, %v1416_v40, %v1005_v63  ;;  %v5496_v63 = vld [vmem:[#allocation33_spill] sm:$0xff] }
 0x25c   : > { %v1019_v6 = vpop.permute.xlu1 %1018  ;;  %v1101_v2 = vpop.permute.xlu0 %1100  ;;  %v1279_v5 = vsel %vm1274_vm2, %v2555_v59, %v5496_v63 }
 0x25d   : > { %v1456_v45 = vsel %vm1439_vm8, %v3879_v1, %v1019_v6  ;;  %v1482_v55 = vsel %vm1472_vm9, %v1449_v52, %v1101_v2  ;;  %v1312_v1 = vsel %vm1307_vm3, %v1279_v5, %v5497_v23  ;;  %v5499_v6 = vld [vmem:[#allocation61_spill] sm:$0xff] }
 0x25e   : > { %v1345_v48 = vsel %vm1340_vm4, %v1312_v1, %v5498_v61  ;;  %v5501_v2 = vld [vmem:[#allocation133_spill] sm:$0xff] }
 0x25f   : > { %v1378_v21 = vsel %vm1373_vm5, %v1345_v48, %v5501_v2 }
 0x260   : > { %v1411_v9 = vsel %vm1406_vm6, %v1378_v21, %v3744_v12 }
 0x261   : > { %1122 = vrot.lane.b32.xlu2 %v5493_v28, %s2613_s6  ;;  %v2556_v28 = vld [vmem:[%s2662_s24 + $0xd8] sm:$0xff] }
 0x262   : > { %1204 = vrot.lane.b32.xlu1 %v5494_v62, %s2612_s30  ;;  %1192 = vrot.lane.b32.xlu0 %v5495_v0, %s2612_s30  ;;  %v5503_v0 = vld [vmem:[#allocation59_spill] sm:$0xff] }
 0x263   : > { %v1213_v10 = vpop.permute.xlu2 %1212 }
 0x264   : > { %v1115_v42 = vpop.permute.xlu1 %1114  ;;  %v1197_v4 = vpop.permute.xlu0 %1196 }
 0x265   : > { %v1489_v18 = vsel %vm1472_vm9, %v1456_v45, %v1115_v42  ;;  %v1515_v37 = vsel %vm1505_vm10, %v1482_v55, %v1197_v4  ;;  %v5505_v45 = vld [vmem:[#allocation11_spill] sm:$0xff]  ;;  %v5506_v55 = vld [vmem:[#allocation56_spill] sm:$0xff] }
 0x266   : > { %2460 = vmatmul.msk.f32.gmra.mxu1 %vm1547_vm11, %v1515_v37  ;;  %v1522_v41 = vsel %vm1505_vm10, %v1489_v18, %v1211_v33  ;;  %v5500_v33 = vld [vmem:[#allocation31_spill] sm:$0xff]  ;;  %v5507_v4 = vld [vmem:[#allocation24_spill] sm:$0xff]  ;;  %v5508_v37 = vld [vmem:[#allocation50_spill] sm:$0xff] }
 0x267   : > { %2467 = vmatmul.msk.f32.vlgmr.msra.gmra.mxu2 %vm1547_vm11, %v1522_v41  ;;  %v4236_v41 = vld [vmem:[%s2662_s24 + $0x170] sm:$0xff] }
 0x269   : > { %1230 = vrot.lane.b32.xlu2 %v3235_v39, %s2612_s30 }
 0x26a   : > { %1218 = vrot.lane.b32.xlu1 %v5499_v6, %s2612_s30  ;;  %1134 = vrot.lane.b32.xlu0 %v5500_v33, %s2613_s6  ;;  %v5509_v6 = vld [vmem:[#allocation69_spill] sm:$0xff] }
 0x26b   : > { %v4204_v7 = vpop.permute.xlu2 %1092 }
 0x26c   : > { %v1007_v17 = vpop.permute.xlu1 %1006  ;;  %v995_v20 = vpop.permute.xlu0 %994 }
 0x26d   : > { %v1444_v39 = vsel %vm1439_vm8, %v1411_v9, %v995_v20  ;;  %v5511_v9 = vld [vmem:[#allocation17_spill] sm:$0xff] }
 0x26e   : > { %v1477_v44 = vsel %vm1472_vm9, %v1444_v39, %v1091_v57  ;;  %v1285_v57 = vsel %vm1274_vm2, %v4057_v54, %v5503_v0 }
 0x26f   : > { %v1510_v31 = vsel %vm1505_vm10, %v1477_v44, %v1187_v14  ;;  %v5504_v14 = vld [vmem:[#allocation93_spill] sm:$0xff] }
 0x270   : > { %2455 = vmatmul.msk.f32.gmra.mxu0 %vm1547_vm11, %v1510_v31  ;;  %v1318_v52 = vsel %vm1307_vm3, %v1285_v57, %v5504_v14  ;;  %v5514_v31 = vld [vmem:[#allocation88_spill] sm:$0xff]  ;;  %v5518_v57 = vld [vmem:[#allocation37_spill] sm:$0xff] }
 0x271   : > { %1028 = vrot.lane.b32.xlu2 %v3985_v51, %s2614_s7  ;;  %v1351_v51 = vsel %vm1340_vm4, %v1318_v52, %v5505_v45  ;;  %v5519_v52 = vld [vmem:[#allocation118_spill] sm:$0xff] }
 0x272   : > { %1110 = vrot.lane.b32.xlu1 %v5502_v38, %s2613_s6  ;;  %1014 = vrot.lane.b32.xlu0 %v2556_v28, %s2614_s7  ;;  %v1384_v42 = vsel %vm1373_vm5, %v1351_v51, %v5506_v55  ;;  %v5515_v28 = vld [vmem:[#allocation42_spill] sm:$0xff]  ;;  %v5520_v55 = vld [vmem:[#allocation39_spill] sm:$0xff] }
 0x273   : > { %v4218_v12 = vpop.permute.xlu2 %1034  ;;  %v1417_v18 = vsel %vm1406_vm6, %v1384_v42, %v3789_v32 }
 0x274   : > { %v1021_v40 = vpop.permute.xlu1 %1020  ;;  %v1103_v62 = vpop.permute.xlu0 %1102  ;;  %v1450_v54 = vsel %vm1439_vm8, %v1417_v18, %v1007_v17  ;;  %v5513_v17 = vld [vmem:[#allocation140_spill] sm:$0xff] }
 0x275   : > { %v1457_v63 = vsel %vm1439_vm8, %v3876_v8, %v1021_v40  ;;  %v1483_v5 = vsel %vm1472_vm9, %v1450_v54, %v1103_v62  ;;  %v5510_v8 = vld [vmem:[#allocation30_spill] sm:$0xff]  ;;  %v5516_v40 = vld [vmem:[#allocation113_spill] sm:$0xff] }
 0x276   : > { %v2558_v54 = vld [vmem:[%s2662_s24 + $0x180] sm:$0xff] }
 0x279   : > { %1124 = vrot.lane.b32.xlu2 %v5507_v4, %s2613_s6  ;;  %v5521_v4 = vld [vmem:[#allocation23_spill] sm:$0xff] }
 0x27a   : > { %1206 = vrot.lane.b32.xlu1 %v5508_v37, %s2612_s30  ;;  %1040 = vrot.lane.b32.xlu0 %v4236_v41, %s2614_s7  ;;  %v5522_v37 = vld [vmem:[#allocation57_spill] sm:$0xff] }
 0x27b   : > { %v1119_v59 = vpop.permute.xlu2 %1118 }
 0x27c   : > { %v1117_v23 = vpop.permute.xlu1 %1116  ;;  %v1199_v1 = vpop.permute.xlu0 %1198 }
 0x27d   : > { %v1490_v32 = vsel %vm1472_vm9, %v1457_v63, %v1117_v23  ;;  %v1516_v61 = vsel %vm1505_vm10, %v1483_v5, %v1199_v1 }
 0x27e   : > { %2461 = vmatmul.msk.f32.gmra.mxu1 %vm1547_vm11, %v1516_v61  ;;  %v1523_v48 = vsel %vm1505_vm10, %v1490_v32, %v1213_v10 }
 0x27f   : > { %2468 = vmatmul.msk.f32.gmra.mxu2 %vm1547_vm11, %v1523_v48 }
 0x281   : > { %1232 = vrot.lane.b32.xlu2 %v3257_v56, %s2612_s30  ;;  %v5512_v56 = vld [vmem:[#allocation35_spill] sm:$0xff] }
 0x282   : > { %1220 = vrot.lane.b32.xlu1 %v5509_v6, %s2612_s30  ;;  %1136 = vrot.lane.b32.xlu0 %v5510_v8, %s2613_s6  ;;  %v1280_v20 = vsel %vm1274_vm2, %v5513_v17, %v5512_v56  ;;  %v5523_v6 = vld [vmem:[#allocation139_spill] sm:$0xff]  ;;  %v5524_v8 = vld [vmem:[#allocation68_spill] sm:$0xff] }
 0x283   : > { %v1227_v33 = vpop.permute.xlu2 %1226  ;;  %v1313_v38 = vsel %vm1307_vm3, %v1280_v20, %v5514_v31 }
 0x284   : > { %v1009_v2 = vpop.permute.xlu1 %1008  ;;  %v997_v21 = vpop.permute.xlu0 %996  ;;  %v1346_v62 = vsel %vm1340_vm4, %v1313_v38, %v5516_v40  ;;  %v5527_v38 = vld [vmem:[#allocation120_spill] sm:$0xff]  ;;  %v4332_v40 = vld [vmem:[%s2662_s24 + $0x1a0] sm:$0xff] }
 0x285   : > { %v1379_v14 = vsel %vm1373_vm5, %v1346_v62, %v5518_v57  ;;  %v5528_v62 = vld [vmem:[#allocation97_spill] sm:$0xff]  ;;  %v5530_v57 = vld [vmem:[#allocation67_spill] sm:$0xff] }
 0x286   : > { %v1412_v51 = vsel %vm1406_vm6, %v1379_v14, %v3739_v16  ;;  %v5531_v14 = vld [vmem:[#allocation123_spill] sm:$0xff] }
 0x289   : > { %1030 = vrot.lane.b32.xlu2 %v3979_v27, %s2614_s7  ;;  %v1286_v27 = vsel %vm1274_vm2, %v4145_v60, %v5515_v28  ;;  %v1445_v60 = vsel %vm1439_vm8, %v1412_v51, %v997_v21  ;;  %v1464_v21 = vsel %vm1439_vm8, %v3825_v53, %v4218_v12  ;;  %v2559_v53 = vld [vmem:[%s2662_s24 + $0x188] sm:$0xff]  ;;  %v2560_v12 = vld [vmem:[%s2662_s24 + $0x140] sm:$0xff]  ;;  %v491_v28 = vrot.slane %v5527_v38, 2 }
 0x28a   : > { %1112 = vrot.lane.b32.xlu1 %v5511_v9, %s2613_s6  ;;  %1016 = vrot.lane.b32.xlu0 %v3894_v49, %s2614_s7  ;;  %v5517_v49 = vld [vmem:[#allocation92_spill] sm:$0xff]  ;;  %v1478_v32 = vsel %vm1472_vm9, %v1445_v60, %v4204_v7  ;;  %v497_v51 = vrot.slane %v4332_v40, 1  ;;  %v4378_v38 = vld [vmem:[%s5109_s2] ss:$0 sm:$0xff] }
 0x28b   : > { %v4261_v10 = vpop.permute.xlu2 %1094  ;;  %v1319_v0 = vsel %vm1307_vm3, %v1286_v27, %v5517_v49  ;;  %v5525_v7 = vld [vmem:[#allocation124_spill] sm:$0xff]  ;;  %v5529_v49 = vrot.slane %v5528_v62, 2 }
 0x28c   : > { %v1023_v39 = vpop.permute.xlu1 %1022  ;;  %v1105_v44 = vpop.permute.xlu0 %1104  ;;  %v1352_v45 = vsel %vm1340_vm4, %v1319_v0, %v5519_v52 }
 0x28d   : > { %v1385_v42 = vsel %vm1373_vm5, %v1352_v45, %v5520_v55  ;;  %v1458_v48 = vsel %vm1439_vm8, %v3763_v58, %v1023_v39  ;;  %v492_v0 = vsel %vm399_vm1, %v5529_v49, %v491_v28  ;;  %v2561_v55 = vld [vmem:[%s2662_s24 + $0x48] sm:$0xff] }
 0x28e   : > { %v1418_v18 = vsel %vm1406_vm6, %v1385_v42, %v3784_v36  ;;  %v1491_v58 = vsel %vm1472_vm9, %v1458_v48, %v1119_v59  ;;  %v5532_v42 = vld [vmem:[#allocation55_spill] sm:$0xff]  ;;  %v5536_v48 = vld [vmem:[#allocation85_spill] sm:$0xff] }
 0x28f   : > { %v1451_v63 = vsel %vm1439_vm8, %v1418_v18, %v1009_v2  ;;  %v1281_v60 = vsel %vm1274_vm2, %v2561_v55, %v5532_v42 }
 0x290   : > { %v1484_v5 = vsel %vm1472_vm9, %v1451_v63, %v1105_v44  ;;  %v5526_v44 = vld [vmem:[#allocation28_spill] sm:$0xff] }
 0x291   : > { %1126 = vrot.lane.b32.xlu2 %v5521_v4, %s2613_s6 }
 0x292   : > { %1208 = vrot.lane.b32.xlu1 %v5522_v37, %s2612_s30  ;;  %1042 = vrot.lane.b32.xlu0 %v2558_v54, %s2614_s7  ;;  %v502_v37 = vrot.slane %v4332_v40, 2  ;;  %v5533_v54 = vld [vmem:[#allocation79_spill] sm:$0xff] }
 0x293   : > { %v4293_v16 = vpop.permute.xlu2 %1036  ;;  %v1314_v63 = vsel %vm1307_vm3, %v1281_v60, %v5533_v54 }
 0x294   : > { %v1201_v23 = vpop.permute.xlu1 %1200  ;;  %v1189_v1 = vpop.permute.xlu0 %1188 }
 0x295   : > { %v1511_v61 = vsel %vm1505_vm10, %v1478_v32, %v1189_v1  ;;  %v1517_v36 = vsel %vm1505_vm10, %v1484_v5, %v1201_v23  ;;  %v2562_v5 = vld [vmem:[%s2662_s24 + $0x90] sm:$0xff]  ;;  %v5534_v23 = vld [vmem:[#allocation66_spill] sm:$0xff] }
 0x296   : > { %2456 = vmatmul.msk.f32.gmra.mxu0 %vm1547_vm11, %v1511_v61  ;;  %2462 = vmatmul.msk.f32.gmra.mxu1 %vm1547_vm11, %v1517_v36  ;;  %v1287_v1 = vsel %vm1274_vm2, %v2562_v5, %v5534_v23  ;;  %v5535_v32 = vld [vmem:[#allocation112_spill] sm:$0xff] }
 0x297   : > { %v1347_v61 = vsel %vm1340_vm4, %v1314_v63, %v5535_v32 }
 0x299   : > { %1234 = vrot.lane.b32.xlu2 %v5523_v6, %s2612_s30  ;;  %v1320_v6 = vsel %vm1307_vm3, %v1287_v1, %v5536_v48 }
 0x29a   : > { %1222 = vrot.lane.b32.xlu1 %v5524_v8, %s2612_s30  ;;  %1138 = vrot.lane.b32.xlu0 %v5525_v7, %s2613_s6  ;;  %v5537_v8 = vld [vmem:[#allocation136_spill] sm:$0xff] }
 0x29b   : > { %v4310_v2 = vpop.permute.xlu2 %1120  ;;  %v1380_v7 = vsel %vm1373_vm5, %v1347_v61, %v5537_v8 }
 0x29c   : > { %v1215_v9 = vpop.permute.xlu1 %1214  ;;  %v1131_v56 = vpop.permute.xlu0 %1130 }
 0x29d   : > { %v1497_v17 = vsel %vm1472_vm9, %v1464_v21, %v1131_v56  ;;  %v1524_v20 = vsel %vm1505_vm10, %v1491_v58, %v1215_v9  ;;  %v5538_v56 = vld [vmem:[#allocation117_spill] sm:$0xff] }
 0x29e   : > { %2469 = vmatmul.msk.f32.gmra.mxu2 %vm1547_vm11, %v1524_v20  ;;  %v1530_v39 = vsel %vm1505_vm10, %v1497_v17, %v1227_v33  ;;  %v267_v33 = vld [vmem:[%s2662_s24 + $0x198] sm:$0xff]  ;;  %v1353_v58 = vsel %vm1340_vm4, %v1320_v6, %v5538_v56  ;;  %v1413_v17 = vsel %vm1406_vm6, %v1380_v7, %v3695_v22  ;;  %v5539_v20 = vld [vmem:[#allocation138_spill] sm:$0xff]  ;;  %v5541_v56 = vld [vmem:[#allocation91_spill] sm:$0xff] }
 0x29f   : > { %2475 = vmatmul.msk.f32.vlgmr.msra.gmra.mxu3 %vm1547_vm11, %v1530_v39  ;;  %v501_v52 = vrot.slane %v267_v33, 2  ;;  %v496_v45 = vrot.slane %v267_v33, 1  ;;  %v1386_v39 = vsel %vm1373_vm5, %v1353_v58, %v5539_v20  ;;  %v5540_v6 = vld [vmem:[#allocation54_spill] sm:$0xff] }
 0x2a0   : > { %v5542_v20 = vld [vmem:[#allocation6_spill] sm:$0xff] }
 0x2a1   : > { %1128 = vrot.lane.b32.xlu2 %v5526_v44, %s2613_s6  ;;  %v503_v36 = vsel %vm399_vm1, %v501_v52, %v502_v37  ;;  %v498_v9 = vsel %vm318_vm0, %v496_v45, %v497_v51 }
 0x2a2   : > { %1044 = vrot.lane.b32.xlu1 %v2559_v53, %s2614_s7  ;;  %1032 = vrot.lane.b32.xlu0 %v2560_v12, %s2614_s7  ;;  %v269_v53 = vld [vmem:[%s2662_s24 + $0x1a8] sm:$0x3]  ;;  %v1419_v12 = vsel %vm1406_vm6, %v1386_v39, %v3719_v35 }
 0x2a3   : > { %v4328_v27 = vpop.permute.xlu2 %1228  ;;  %v499_v22 = vrot.slane %v269_v53, 1 }
 0x2a4   : > { %v1011_v59 = vpop.permute.xlu1 %1010  ;;  %v999_v31 = vpop.permute.xlu0 %998 }
 0x2a5   : > { %v1446_v44 = vsel %vm1439_vm8, %v1413_v17, %v999_v31  ;;  %v1452_v28 = vsel %vm1439_vm8, %v1419_v12, %v1011_v59  ;;  %v500_v59 = vsel %vm318_vm0, %v497_v51, %v499_v22  ;;  %v1465_v51 = vsel %vm1439_vm8, %v4012_v15, %v4293_v16 }
 0x2a6   : > { %v1479_v35 = vsel %vm1472_vm9, %v1446_v44, %v4261_v10  ;;  %v504_v10 = vrot.slane %v269_v53, 2  ;;  %v5543_v53 = vld [vmem:[#allocation135_spill] sm:$0xff] }
 0x2a8   : > { %v505_v15 = vsel %vm399_vm1, %v502_v37, %v504_v10 }
 0x2a9   : > { %1236 = vrot.lane.b32.xlu2 %v492_v0, %s2612_s30 }
 0x2aa   : > { %1224 = vrot.lane.b32.xlu1 %v5530_v57, %s2612_s30  ;;  %1140 = vrot.lane.b32.xlu0 %v5531_v14, %s2613_s6 }
 0x2ab   : > { %v4359_v21 = vpop.permute.xlu2 %1096 }
 0x2ac   : > { %v1025_v4 = vpop.permute.xlu1 %1024  ;;  %v1107_v18 = vpop.permute.xlu0 %1106 }
 0x2ad   : > { %v1485_v31 = vsel %vm1472_vm9, %v1452_v28, %v1107_v18  ;;  %v1459_v55 = vsel %vm1439_vm8, %v3939_v47, %v1025_v4 }
 0x2ae   : > { %v1492_v4 = vsel %vm1472_vm9, %v1459_v55, %v4310_v2 }
 0x2b1   : > { %1238 = vrot.lane.b32.xlu2 %v503_v36, %s2612_s30 }
 0x2b2   : > { %1046 = vrot.lane.b32.xlu0 %v267_v33, %s2614_s7  ;;  %1142 = vrot.lane.b32.xlu1 %v498_v9, %s2613_s6 }
 0x2b3   : > { %v4393_v42 = vpop.permute.xlu2 %1038 }
 0x2b4   : > { %v1203_v62 = vpop.permute.xlu1 %1202  ;;  %v1191_v49 = vpop.permute.xlu0 %1190 }
 0x2b5   : > { %v1665_v57 = vpop.f32.mrf.mxu0  ;;  %v1512_v33 = vsel %vm1505_vm10, %v1479_v35, %v1191_v49  ;;  %v1518_v14 = vsel %vm1505_vm10, %v1485_v31, %v1203_v62 }
 0x2b6   : > { %v1666_v52 = vadd.f32 %v4378_v38, %v1665_v57  ;;  %2457 = vmatmul.msk.f32.gmra.mxu0 %vm1547_vm11, %v1512_v33  ;;  %2463 = vmatmul.msk.f32.gmra.mxu1 %vm1547_vm11, %v1518_v14 }
 0x2b8   : > { %v1761_v45 = vmax.f32 %v1666_v52, 0.0 }
 0x2b9   : > { %1144 = vrot.lane.b32.xlu2 %v500_v59, %s2613_s6 }
 0x2ba   : > { %1795 = vst [vmem:[%s4396_s23] sm:$0xff] %v1761_v45  ;;  %952 = vrot.lane.b32.xlu0 %v492_v0, %s2611_s29  ;;  %1048 = vrot.lane.b32.xlu1 %v4332_v40, %s2614_s7 }
 0x2bb   : > { %v1123_v5 = vpop.permute.xlu2 %1122 }
 0x2bc   : > { %v1217_v47 = vpop.permute.xlu1 %1216  ;;  %v1133_v60 = vpop.permute.xlu0 %1132 }
 0x2bd   : > { %v1498_v18 = vsel %vm1472_vm9, %v1465_v51, %v1133_v60  ;;  %v1668_v54 = vpop.f32.mrf.mxu0  ;;  %v1525_v63 = vsel %vm1505_vm10, %v1492_v4, %v1217_v47  ;;  %v1466_v47 = vsel %vm1439_vm8, %v4009_v50, %v4393_v42 }
 0x2be   : > { %v1669_v0 = vadd.f32 %v4378_v38, %v1668_v54  ;;  %2470 = vmatmul.msk.f32.gmra.mxu2 %vm1547_vm11, %v1525_v63  ;;  %v1531_v40 = vsel %vm1505_vm10, %v1498_v18, %v4328_v27  ;;  %v2563_v27 = vld [vmem:[%s2662_s24 + $0x50] sm:$0xff] }
 0x2bf   : > { %2476 = vmatmul.msk.f32.gmra.mxu3 %vm1547_vm11, %v1531_v40  ;;  %v1282_v8 = vsel %vm1274_vm2, %v2563_v27, %v5540_v6 }
 0x2c0   : > { %v1762_v16 = vmax.f32 %v1669_v0, 0.0  ;;  %v1315_v58 = vsel %vm1307_vm3, %v1282_v8, %v5541_v56 }
 0x2c1   : > { %v1348_v39 = vsel %vm1340_vm4, %v1315_v58, %v5542_v20 }
 0x2c2   : > { %1796 = vst [vmem:[%s4396_s23 + $0x8] sm:$0xff] %v1762_v16  ;;  %v1828_v2 = vadd.f32 %v1762_v16, %v1761_v45  ;;  %1240 = vrot.lane.b32.xlu0 %v505_v15, %s2612_s30  ;;  %v1381_v12 = vsel %vm1373_vm5, %v1348_v39, %v5543_v53 }
 0x2c3   : > { %v1231_v37 = vpop.permute.xlu2 %1230  ;;  %v1414_v28 = vsel %vm1406_vm6, %v1381_v12, %v3765_v46 }
 0x2c4   : > { %v1013_v23 = vpop.permute.xlu1 %1012  ;;  %v1001_v1 = vpop.permute.xlu0 %1000 }
 0x2c5   : > { %v1447_v31 = vsel %vm1439_vm8, %v1414_v28, %v1001_v1  ;;  %v1453_v62 = vsel %vm1439_vm8, %v3831_v3, %v1013_v23 }
 0x2c6   : > { %v1480_v14 = vsel %vm1472_vm9, %v1447_v31, %v4359_v21 }
 0x2cb   : > { %v1671_v32 = vpop.f32.mrf.mxu0  ;;  %v1029_v45 = vpop.permute.xlu2 %1028 }
 0x2cc   : > { %v1672_v61 = vadd.f32 %v4378_v38, %v1671_v32  ;;  %v1027_v36 = vpop.permute.xlu1 %1026  ;;  %v1689_v48 = vpop.f32.mrf.mxu1  ;;  %v1461_v8 = vsel %vm1439_vm8, %v3787_v26, %v1029_v45 }
 0x2cd   : > { %v4422_v7 = vadd.f32 %v4378_v38, %v1689_v48  ;;  %v1109_v9 = vpop.permute.xlu0 %1108  ;;  %v1460_v55 = vsel %vm1439_vm8, %v3936_v29, %v1027_v36 }
 0x2ce   : > { %v1763_v17 = vmax.f32 %v1672_v61, 0.0  ;;  %v1486_v49 = vsel %vm1472_vm9, %v1453_v62, %v1109_v9  ;;  %v1493_v21 = vsel %vm1472_vm9, %v1460_v55, %v1123_v5 }
 0x2cf   : > { %v1769_v44 = vmax.f32 %v4422_v7, 0.0 }
 0x2d0   : > { %1797 = vst [vmem:[%s4396_s23 + $0x10] sm:$0xff] %v1763_v17  ;;  %v1829_v22 = vadd.f32 %v1828_v2, %v1763_v17 }
 0x2d1   : > { %1803 = vst [vmem:[%s4396_s23 + $0x40] sm:$0xff] %v1769_v44 }
 0x2d3   : > { %v1125_v29 = vpop.permute.xlu2 %1124 }
 0x2d4   : > { %v1205_v35 = vpop.permute.xlu1 %1204 }
 0x2d5   : > { %v1193_v57 = vpop.permute.xlu0 %1192  ;;  %v1674_v33 = vpop.f32.mrf.mxu0  ;;  %v1519_v52 = vsel %vm1505_vm10, %v1486_v49, %v1205_v35 }
 0x2d6   : > { %v1675_v46 = vadd.f32 %v4378_v38, %v1674_v33  ;;  %v1513_v59 = vsel %vm1505_vm10, %v1480_v14, %v1193_v57  ;;  %2464 = vmatmul.msk.f32.gmra.mxu1 %vm1547_vm11, %v1519_v52 }
 0x2d7   : > { %2458 = vmatmul.msk.f32.gmra.mxu0 %vm1547_vm11, %v1513_v59 }
 0x2d8   : > { %v1764_v3 = vmax.f32 %v1675_v46, 0.0 }
 0x2da   : > { %1798 = vst [vmem:[%s4396_s23 + $0x18] sm:$0xff] %v1764_v3  ;;  %v1830_v10 = vadd.f32 %v1829_v22, %v1764_v3 }
 0x2db   : > { %v1233_v2 = vpop.permute.xlu2 %1232 }
 0x2dc   : > { %v1219_v51 = vpop.permute.xlu1 %1218 }
 0x2dd   : > { %v1135_v60 = vpop.permute.xlu0 %1134  ;;  %v1526_v4 = vsel %vm1505_vm10, %v1493_v21, %v1219_v51 }
 0x2de   : > { %v1499_v18 = vsel %vm1472_vm9, %v1466_v47, %v1135_v60  ;;  %2471 = vmatmul.msk.f32.gmra.mxu2 %vm1547_vm11, %v1526_v4 }
 0x2df   : > { %v1532_v54 = vsel %vm1505_vm10, %v1499_v18, %v1231_v37  ;;  %v1494_v37 = vsel %vm1472_vm9, %v1461_v8, %v1125_v29 }
 0x2e0   : > { %2477 = vmatmul.msk.f32.gmra.mxu3 %vm1547_vm11, %v1532_v54 }
 0x2e3   : > { %v1692_v63 = vpop.f32.mrf.mxu1  ;;  %v1031_v56 = vpop.permute.xlu2 %1030 }
 0x2e4   : > { %v4461_v0 = vadd.f32 %v4378_v38, %v1692_v63  ;;  %v1111_v40 = vpop.permute.xlu1 %1110 }
 0x2e5   : > { %v1015_v15 = vpop.permute.xlu0 %1014 }
 0x2e6   : > { %v1770_v50 = vmax.f32 %v4461_v0, 0.0  ;;  %v1454_v42 = vsel %vm1439_vm8, %v3828_v30, %v1015_v15 }
 0x2e7   : > { %v1487_v1 = vsel %vm1472_vm9, %v1454_v42, %v1111_v40 }
 0x2e8   : > { %1804 = vst [vmem:[%s4396_s23 + $0x48] sm:$0xff] %v1770_v50 }
 0x2ea   : > { %v1713_v16 = vpop.f32.mrf.mxu2 }
 0x2eb   : > { %v4470_v5 = vadd.f32 %v4378_v38, %v1713_v16  ;;  %v1127_v31 = vpop.permute.xlu2 %1126 }
 0x2ec   : > { %v1207_v23 = vpop.permute.xlu1 %1206 }
 0x2ed   : > { %v1777_v32 = vmax.f32 %v4470_v5, 0.0  ;;  %v1041_v61 = vpop.permute.xlu0 %1040  ;;  %v1677_v36 = vpop.f32.mrf.mxu0  ;;  %v1520_v48 = vsel %vm1505_vm10, %v1487_v1, %v1207_v23 }
 0x2ee   : > { %v1678_v27 = vadd.f32 %v4378_v38, %v1677_v36  ;;  %2465 = vmatmul.msk.f32.gmra.mxu1 %vm1547_vm11, %v1520_v48  ;;  %v1467_v58 = vsel %vm1439_vm8, %v3873_v34, %v1041_v61 }
 0x2ef   : > { %1811 = vst [vmem:[%s4396_s23 + $0x80] sm:$0xff] %v1777_v32 }
 0x2f0   : > { %v1765_v30 = vmax.f32 %v1678_v27, 0.0 }
 0x2f2   : > { %1799 = vst [vmem:[%s4396_s23 + $0x20] sm:$0xff] %v1765_v30  ;;  %v1831_v6 = vadd.f32 %v1830_v10, %v1765_v30 }
 0x2f3   : > { %v1235_v59 = vpop.permute.xlu2 %1234 }
 0x2f4   : > { %v1221_v9 = vpop.permute.xlu1 %1220 }
 0x2f5   : > { %v1137_v17 = vpop.permute.xlu0 %1136  ;;  %v1527_v20 = vsel %vm1505_vm10, %v1494_v37, %v1221_v9 }
 0x2f6   : > { %v1500_v39 = vsel %vm1472_vm9, %v1467_v58, %v1137_v17  ;;  %2472 = vmatmul.msk.f32.gmra.mxu2 %vm1547_vm11, %v1527_v20 }
 0x2f7   : > { %v1533_v53 = vsel %vm1505_vm10, %v1500_v39, %v1233_v2 }
 0x2f8   : > { %2478 = vmatmul.msk.f32.gmra.mxu3 %vm1547_vm11, %v1533_v53  ;;  %v5544_v53 = vld [vmem:[#allocation83_spill] sm:$0xff] }
 0x2fb   : > { %v1695_v26 = vpop.f32.mrf.mxu1 }
 0x2fc   : > { %v4492_v12 = vadd.f32 %v4378_v38, %v1695_v26  ;;  %v1113_v22 = vpop.permute.xlu1 %1112  ;;  %v1306_v26 = vsel %vm1274_vm2, %v4236_v41, %v5544_v53 }
 0x2fd   : > { %v1017_v28 = vpop.permute.xlu0 %1016 }
 0x2fe   : > { %v1771_v34 = vmax.f32 %v4492_v12, 0.0  ;;  %v1455_v62 = vsel %vm1439_vm8, %v3742_v25, %v1017_v28  ;;  %v1462_v25 = vsel %vm1439_vm8, %v3976_v43, %v1031_v56  ;;  %v1129_v43 = vpop.permute.xlu2 %1128 }
 0x2ff   : > { %v1488_v33 = vsel %vm1472_vm9, %v1455_v62, %v1113_v22  ;;  %v1495_v45 = vsel %vm1472_vm9, %v1462_v25, %v1127_v31  ;;  %v5545_v22 = vld [vmem:[#allocation109_spill] sm:$0xff] }
 0x300   : > { %1805 = vst [vmem:[%s4396_s23 + $0x50] sm:$0xff] %v1771_v34  ;;  %v1339_v28 = vsel %vm1307_vm3, %v1306_v26, %v5545_v22  ;;  %v5546_v31 = vld [vmem:[#allocation125_spill] sm:$0xff] }
 0x301   : > { %v1372_v62 = vsel %vm1340_vm4, %v1339_v28, %v5546_v31 }
 0x302   : > { %v1716_v49 = vpop.f32.mrf.mxu2 }
 0x303   : > { %v4501_v35 = vadd.f32 %v4378_v38, %v1716_v49  ;;  %v5547_v49 = vld [vmem:[#allocation141_spill] sm:$0xff] }
 0x304   : > { %v1209_v57 = vpop.permute.xlu1 %1208 }
 0x305   : > { %v1778_v14 = vmax.f32 %v4501_v35, 0.0  ;;  %v1043_v52 = vpop.permute.xlu0 %1042  ;;  %v1521_v46 = vsel %vm1505_vm10, %v1488_v33, %v1209_v57  ;;  %v1405_v57 = vsel %vm1373_vm5, %v1372_v62, %v5547_v49 }
 0x306   : > { %2466 = vmatmul.msk.f32.gmra.mxu1 %vm1547_vm11, %v1521_v46  ;;  %v1468_v55 = vsel %vm1439_vm8, %v4043_v11, %v1043_v52  ;;  %v1237_v16 = vpop.permute.xlu2 %1236 }
 0x307   : > { %1812 = vst [vmem:[%s4396_s23 + $0x88] sm:$0xff] %v1778_v14 }
 0x30c   : > { %v1223_v3 = vpop.permute.xlu1 %1222 }
 0x30d   : > { %v1139_v10 = vpop.permute.xlu0 %1138  ;;  %v1528_v51 = vsel %vm1505_vm10, %v1495_v45, %v1223_v3 }
 0x30e   : > { %v1501_v21 = vsel %vm1472_vm9, %v1468_v55, %v1139_v10  ;;  %2473 = vmatmul.msk.f32.gmra.mxu2 %vm1547_vm11, %v1528_v51  ;;  %v1239_v58 = vpop.permute.xlu2 %1238 }
 0x30f   : > { %v1534_v47 = vsel %vm1505_vm10, %v1501_v21, %v1235_v59 }
 0x310   : > { %2479 = vmatmul.msk.f32.gmra.mxu3 %vm1547_vm11, %v1534_v47 }
 0x313   : > { %v1680_v60 = vpop.f32.mrf.mxu0  ;;  %v1698_v4 = vpop.f32.mrf.mxu1 }
 0x314   : > { %v1681_v18 = vadd.f32 %v4378_v38, %v1680_v60  ;;  %v4522_v11 = vadd.f32 %v4378_v38, %v1698_v4  ;;  %v1045_v54 = vpop.permute.xlu1 %1044 }
 0x315   : > { %v1033_v29 = vpop.permute.xlu0 %1032  ;;  %v1469_v1 = vsel %vm1439_vm8, %v4040_v24, %v1045_v54 }
 0x316   : > { %v1766_v63 = vmax.f32 %v1681_v18, 0.0  ;;  %v1772_v40 = vmax.f32 %v4522_v11, 0.0  ;;  %v1463_v42 = vsel %vm1439_vm8, %v3973_v13, %v1033_v29  ;;  %v1145_v59 = vpop.permute.xlu2 %1144 }
 0x317   : > { %v1496_v2 = vsel %vm1472_vm9, %v1463_v42, %v1129_v43 }
 0x318   : > { %1800 = vst [vmem:[%s4396_s23 + $0x28] sm:$0xff] %v1766_v63  ;;  %v1832_v15 = vadd.f32 %v1831_v6, %v1766_v63 }
 0x319   : > { %1806 = vst [vmem:[%s4396_s23 + $0x58] sm:$0xff] %v1772_v40 }
 0x31c   : > { %v1225_v23 = vpop.permute.xlu1 %1224 }
 0x31d   : > { %v1141_v61 = vpop.permute.xlu0 %1140  ;;  %v1529_v36 = vsel %vm1505_vm10, %v1496_v2, %v1225_v23 }
 0x31e   : > { %v1502_v48 = vsel %vm1472_vm9, %v1469_v1, %v1141_v61  ;;  %2474 = vmatmul.msk.f32.gmra.mxu2 %vm1547_vm11, %v1529_v36 }
 0x31f   : > { %v1535_v27 = vsel %vm1505_vm10, %v1502_v48, %v1237_v16 }
 0x320   : > { %2480 = vmatmul.msk.f32.gmra.mxu3 %vm1547_vm11, %v1535_v27 }
 0x321   : > { %v1719_v13 = vpop.f32.mrf.mxu2 }
 0x322   : > { %v4540_v30 = vadd.f32 %v4378_v38, %v1719_v13  ;;  %v1737_v6 = vpop.f32.mrf.mxu3 }
 0x323   : > { %v4543_v24 = vadd.f32 %v4378_v38, %v1737_v6 }
 0x324   : > { %v1779_v8 = vmax.f32 %v4540_v30, 0.0  ;;  %v1143_v37 = vpop.permute.xlu1 %1142 }
 0x325   : > { %v1785_v9 = vmax.f32 %v4543_v24, 0.0  ;;  %v1047_v56 = vpop.permute.xlu0 %1046 }
 0x326   : > { %1813 = vst [vmem:[%s4396_s23 + $0x90] sm:$0xff] %v1779_v8  ;;  %v1470_v17 = vsel %vm1439_vm8, %v3930_v19, %v1047_v56 }
 0x327   : > { %1819 = vst [vmem:[%s4396_s23 + $0xc0] sm:$0xff] %v1785_v9  ;;  %v1503_v20 = vsel %vm1472_vm9, %v1470_v17, %v1143_v37 }
 0x328   : > { %v1536_v39 = vsel %vm1505_vm10, %v1503_v20, %v1239_v58 }
 0x329   : > { %2481 = vmatmul.msk.f32.gmra.mxu3 %vm1547_vm11, %v1536_v39 }
 0x32c   : > { %v1049_v52 = vpop.permute.xlu1 %1048 }
 0x32d   : > { %v953_v19 = vpop.permute.xlu0 %952 }
 0x32e   : > { %v1438_v33 = vsel %vm1406_vm6, %v1405_v57, %v953_v19 }
 0x32f   : > { %v1471_v46 = vsel %vm1439_vm8, %v1438_v33, %v1049_v52 }
 0x330   : > { %v1504_v55 = vsel %vm1472_vm9, %v1471_v46, %v1145_v59 }
 0x333   : > { %v1683_v25 = vpop.f32.mrf.mxu0  ;;  %v1701_v41 = vpop.f32.mrf.mxu1 }
 0x334   : > { %v1684_v45 = vadd.f32 %v4378_v38, %v1683_v25  ;;  %v1702_v3 = vadd.f32 %v4378_v38, %v1701_v41 }
 0x335   : > { %v1241_v10 = vpop.permute.xlu0 %1240 }
 0x336   : > { %v1767_v51 = vmax.f32 %v1684_v45, 0.0  ;;  %v1773_v21 = vmax.f32 %v1702_v3, 0.0  ;;  %v1537_v47 = vsel %vm1505_vm10, %v1504_v55, %v1241_v10 }
 0x337   : > { %2482 = vmatmul.msk.f32.gmra.mxu3 %vm1547_vm11, %v1537_v47 }
 0x338   : > { %1801 = vst [vmem:[%s4396_s23 + $0x30] sm:$0xff] %v1767_v51  ;;  %v1833_v43 = vadd.f32 %v1832_v15, %v1767_v51 }
 0x339   : > { %1807 = vst [vmem:[%s4396_s23 + $0x60] sm:$0xff] %v1773_v21 }
 0x341   : > { %v1722_v60 = vpop.f32.mrf.mxu2 }
 0x342   : > { %v1723_v4 = vadd.f32 %v4378_v38, %v1722_v60  ;;  %v1740_v18 = vpop.f32.mrf.mxu3 }
 0x343   : > { %v4578_v54 = vadd.f32 %v4378_v38, %v1740_v18 }
 0x344   : > { %v1780_v29 = vmax.f32 %v1723_v4, 0.0 }
 0x345   : > { %v1786_v63 = vmax.f32 %v4578_v54, 0.0 }
 0x346   : > { %1814 = vst [vmem:[%s4396_s23 + $0x98] sm:$0xff] %v1780_v29 }
 0x347   : > { %1820 = vst [vmem:[%s4396_s23 + $0xc8] sm:$0xff] %v1786_v63 }
 0x353   : > { %v1704_v42 = vpop.f32.mrf.mxu1 }
 0x354   : > { %v1686_v16 = vpop.f32.mrf.mxu0  ;;  %v1705_v15 = vadd.f32 %v4378_v38, %v1704_v42 }
 0x355   : > { %v1687_v2 = vadd.f32 %v4378_v38, %v1686_v16 }
 0x356   : > { %v1774_v23 = vmax.f32 %v1705_v15, 0.0 }
 0x357   : > { %v1768_v1 = vmax.f32 %v1687_v2, 0.0 }
 0x358   : > { %1808 = vst [vmem:[%s4396_s23 + $0x68] sm:$0xff] %v1774_v23 }
 0x359   : > { %1802 = vst [vmem:[%s4396_s23 + $0x38] sm:$0xff] %v1768_v1  ;;  %v1834_v61 = vadd.f32 %v1833_v43, %v1768_v1 }
 0x35b   : > { %v1835_v36 = vadd.f32 %v1834_v61, %v1769_v44 }
 0x35d   : > { %v1836_v48 = vadd.f32 %v1835_v36, %v1770_v50 }
 0x35f   : > { %v1837_v27 = vadd.f32 %v1836_v48, %v1771_v34 }
 0x361   : > { %v1838_v13 = vadd.f32 %v1837_v27, %v1772_v40  ;;  %v1725_v6 = vpop.f32.mrf.mxu2  ;;  %v1827_v27 = vld [vmem:[#allocation2] sm:$0x1] }
 0x362   : > { %v1726_v37 = vadd.f32 %v4378_v38, %v1725_v6 }
 0x363   : > { %v1839_v56 = vadd.f32 %v1838_v13, %v1773_v21  ;;  %v1743_v58 = vpop.f32.mrf.mxu3 }
 0x364   : > { %v1781_v17 = vmax.f32 %v1726_v37, 0.0  ;;  %v1744_v7 = vadd.f32 %v4378_v38, %v1743_v58 }
 0x365   : > { %v1840_v44 = vadd.f32 %v1839_v56, %v1774_v23 }
 0x366   : > { %1815 = vst [vmem:[%s4396_s23 + $0xa0] sm:$0xff] %v1781_v17  ;;  %v1787_v0 = vmax.f32 %v1744_v7, 0.0 }
 0x368   : > { %1821 = vst [vmem:[%s4396_s23 + $0xd0] sm:$0xff] %v1787_v0 }
 0x36b   : > { %v1707_v50 = vpop.f32.mrf.mxu1 }
 0x36c   : > { %v1708_v12 = vadd.f32 %v4378_v38, %v1707_v50 }
 0x36e   : > { %v1775_v34 = vmax.f32 %v1708_v12, 0.0 }
 0x370   : > { %1809 = vst [vmem:[%s4396_s23 + $0x70] sm:$0xff] %v1775_v34  ;;  %v1841_v31 = vadd.f32 %v1840_v44, %v1775_v34 }
 0x379   : > { %v1728_v11 = vpop.f32.mrf.mxu2 }
 0x37a   : > { %v1729_v40 = vadd.f32 %v4378_v38, %v1728_v11 }
 0x37b   : > { %v1746_v20 = vpop.f32.mrf.mxu3 }
 0x37c   : > { %v1782_v39 = vmax.f32 %v1729_v40, 0.0  ;;  %v1747_v53 = vadd.f32 %v4378_v38, %v1746_v20 }
 0x37e   : > { %1816 = vst [vmem:[%s4396_s23 + $0xa8] sm:$0xff] %v1782_v39  ;;  %v1788_v26 = vmax.f32 %v1747_v53, 0.0 }
 0x380   : > { %1822 = vst [vmem:[%s4396_s23 + $0xd8] sm:$0xff] %v1788_v26 }
 0x383   : > { %v1710_v22 = vpop.f32.mrf.mxu1 }
 0x384   : > { %v1711_v28 = vadd.f32 %v4378_v38, %v1710_v22 }
 0x386   : > { %v1776_v62 = vmax.f32 %v1711_v28, 0.0 }
 0x388   : > { %1810 = vst [vmem:[%s4396_s23 + $0x78] sm:$0xff] %v1776_v62  ;;  %v1842_v19 = vadd.f32 %v1841_v31, %v1776_v62 }
 0x38a   : > { %v1843_v49 = vadd.f32 %v1842_v19, %v1777_v32 }
 0x38c   : > { %v1844_v57 = vadd.f32 %v1843_v49, %v1778_v14 }
 0x38e   : > { %v1845_v33 = vadd.f32 %v1844_v57, %v1779_v8 }
 0x390   : > { %v1846_v52 = vadd.f32 %v1845_v33, %v1780_v29 }
 0x391   : > { %v1731_v46 = vpop.f32.mrf.mxu2 }
 0x392   : > { %v1732_v59 = vadd.f32 %v4378_v38, %v1731_v46  ;;  %v1847_v25 = vadd.f32 %v1846_v52, %v1781_v17 }
 0x393   : > { %v1749_v41 = vpop.f32.mrf.mxu3 }
 0x394   : > { %v1783_v45 = vmax.f32 %v1732_v59, 0.0  ;;  %v1750_v3 = vadd.f32 %v4378_v38, %v1749_v41  ;;  %v1848_v32 = vadd.f32 %v1847_v25, %v1782_v39 }
 0x396   : > { %1817 = vst [vmem:[%s4396_s23 + $0xb0] sm:$0xff] %v1783_v45  ;;  %v1789_v5 = vmax.f32 %v1750_v3, 0.0  ;;  %v1849_v8 = vadd.f32 %v1848_v32, %v1783_v45 }
 0x398   : > { %1823 = vst [vmem:[%s4396_s23 + $0xe0] sm:$0xff] %v1789_v5 }
 0x3a1   : > { %v1734_v35 = vpop.f32.mrf.mxu2 }
 0x3a2   : > { %v1735_v14 = vadd.f32 %v4378_v38, %v1734_v35 }
 0x3a3   : > { %v1752_v30 = vpop.f32.mrf.mxu3 }
 0x3a4   : > { %v1784_v55 = vmax.f32 %v1735_v14, 0.0  ;;  %v1753_v10 = vadd.f32 %v4378_v38, %v1752_v30 }
 0x3a6   : > { %1818 = vst [vmem:[%s4396_s23 + $0xb8] sm:$0xff] %v1784_v55  ;;  %v1850_v51 = vadd.f32 %v1849_v8, %v1784_v55  ;;  %v1790_v21 = vmax.f32 %v1753_v10, 0.0 }
 0x3a8   : > { %v1851_v47 = vadd.f32 %v1850_v51, %v1785_v9  ;;  %1824 = vst [vmem:[%s4396_s23 + $0xe8] sm:$0xff] %v1790_v21 }
 0x3aa   : > { %v1852_v43 = vadd.f32 %v1851_v47, %v1786_v63 }
 0x3ac   : > { %v1755_v60 = vpop.f32.mrf.mxu3  ;;  %v1853_v4 = vadd.f32 %v1852_v43, %v1787_v0 }
 0x3ad   : > { %v1756_v18 = vadd.f32 %v4378_v38, %v1755_v60 }
 0x3ae   : > { %v1854_v42 = vadd.f32 %v1853_v4, %v1788_v26 }
 0x3af   : > { %v1791_v29 = vmax.f32 %v1756_v18, 0.0 }
 0x3b0   : > { %v1855_v16 = vadd.f32 %v1854_v42, %v1789_v5 }
 0x3b1   : > { %1825 = vst [vmem:[%s4396_s23 + $0xf0] sm:$0xff] %v1791_v29 }
 0x3b2   : > { %v1856_v15 = vadd.f32 %v1855_v16, %v1790_v21 }
 0x3b4   : > { %v1857_v1 = vadd.f32 %v1856_v15, %v1791_v29 }
 0x3ba   : > { %v1758_v2 = vpop.f32.mrf.mxu3 }
 0x3bb   : > { %v1759_v23 = vadd.f32 %v4378_v38, %v1758_v2 }
 0x3bd   : > { %v1792_v24 = vmax.f32 %v1759_v23, 0.0 }
 0x3bf   : > { %1826 = vst [vmem:[%s4396_s23 + $0xf8] sm:$0xff] %v1792_v24  ;;  %v1858_v9 = vadd.f32 %v1857_v1, %v1792_v24 }
 0x3c1   : > { %v1859_v61 = vrot.slane %v1858_v9, 4 }
 0x3c3   : > { %v1860_v36 = vadd.f32 %v1859_v61, %v1858_v9 }
 0x3c5   : > { %v1861_v54 = vrot.slane %v1860_v36, 2 }
 0x3c7   : > { %v1862_v63 = vadd.f32 %v1861_v54, %v1860_v36 }
 0x3c9   : > { %v1863_v48 = vrot.slane %v1862_v63, 1 }
 0x3cb   : > { %v1864_v13 = vadd.f32 %v1863_v48, %v1862_v63  ;;  %1870 = sbr.rel (%p2484_p5) target bundleno = 1173 (0x495), region = 48 }
 0x3cd   : > { %v1865_v6 = vadd.f32 %v1864_v13, %v1827_v27 }
 0x3cf   : > { %1866 = vst [vmem:[#allocation2] sm:$0x1] %v1865_v6 }
 0x3d0   : > { %v4637_v58 = vld [vmem:[#allocation3] sm:$0xff]  ;;  %v4639_v17 = vld [vmem:[#allocation3 + $0x8] sm:$0xff]  ;;  %v4641_v7 = vld [vmem:[#allocation3 + $0x10] sm:$0xff] }
 0x3d1   : > { %v4647_v50 = vld [vmem:[#allocation3 + $0x18] sm:$0xff]  ;;  %v4651_v34 = vld [vmem:[#allocation3 + $0x20] sm:$0xff]  ;;  %v4655_v39 = vld [vmem:[#allocation3 + $0x28] sm:$0xff] }
 0x3d2   : > { %v4659_v22 = vld [vmem:[#allocation3 + $0x30] sm:$0xff]  ;;  %v4663_v19 = vld [vmem:[#allocation3 + $0x38] sm:$0xff]  ;;  %v4667_v52 = vld [vmem:[#allocation3 + $0x100] sm:$0xff] }
 0x3d3   : > { %v4669_v46 = vld [vmem:[#allocation3 + $0x108] sm:$0xff]  ;;  %v4671_v59 = vld [vmem:[#allocation3 + $0x40] sm:$0xff]  ;;  %v4675_v3 = vld [vmem:[#allocation3 + $0x110] sm:$0xff] }
 0x3d4   : > { %5548 = vst [vmem:[#allocation142_spill] sm:$0xff] %v4675_v3  ;;  %v4677_v5 = vld [vmem:[#allocation3 + $0x48] sm:$0xff]  ;;  %v4685_v55 = vld [vmem:[#allocation3 + $0x118] sm:$0xff]  ;;  %v4687_v10 = vld [vmem:[#allocation3 + $0x50] sm:$0xff] }
 0x3d5   : > { %5549 = vst [vmem:[#allocation143_spill] sm:$0xff] %v4685_v55  ;;  %v4693_v60 = vld [vmem:[#allocation3 + $0x120] sm:$0xff]  ;;  %v4695_v4 = vld [vmem:[#allocation3 + $0x58] sm:$0xff]  ;;  %v4701_v23 = vld [vmem:[#allocation3 + $0x128] sm:$0xff] }
 0x3d6   : > { %v1871_v37 = vld [vmem:[#allocation2] sm:$0x1]  ;;  %5550 = vst [vmem:[#allocation144_spill] sm:$0xff] %v4693_v60  ;;  %v4703_v1 = vld [vmem:[#allocation3 + $0x60] sm:$0xff]  ;;  %v4709_v63 = vld [vmem:[#allocation3 + $0x130] sm:$0xff] }
 0x3d7   : > { %v4632_v56 = vmul.f32 0.001953125, %v1871_v37  ;;  %5551 = vst [vmem:[#allocation145_spill] sm:$0xff] %v4701_v23  ;;  %v4711_v48 = vld [vmem:[#allocation3 + $0x68] sm:$0xff] }
 0x3d8   : > { %5552 = vst [vmem:[#allocation146_spill] sm:$0xff] %v4709_v63 }
 0x3d9   : > { %v4635_v38 = vperm.slane %v4632_v56, 0 }
 0x3db   : > { %v1908_v44 = vsub.f32 %v4637_v58, %v4635_v38  ;;  %v1909_v0 = vsub.f32 %v4639_v17, %v4635_v38  ;;  %v1910_v12 = vsub.f32 %v4641_v7, %v4635_v38  ;;  %v1911_v11 = vsub.f32 %v4647_v50, %v4635_v38 }
 0x3dc   : > { %v1912_v53 = vsub.f32 %v4651_v34, %v4635_v38  ;;  %v1913_v28 = vsub.f32 %v4655_v39, %v4635_v38  ;;  %v1914_v49 = vsub.f32 %v4659_v22, %v4635_v38  ;;  %v1915_v25 = vsub.f32 %v4663_v19, %v4635_v38 }
 0x3dd   : > { %v1940_v40 = vmul.f32 %v1908_v44, %v1908_v44  ;;  %v1941_v20 = vmul.f32 %v1909_v0, %v1909_v0  ;;  %v1942_v26 = vmul.f32 %v1910_v12, %v1910_v12  ;;  %v1943_v31 = vmul.f32 %v1911_v11, %v1911_v11  ;;  %v4717_v12 = vld [vmem:[#allocation3 + $0x138] sm:$0xff]  ;;  %v4719_v11 = vld [vmem:[#allocation3 + $0x70] sm:$0xff] }
 0x3de   : > { %v1944_v57 = vmul.f32 %v1912_v53, %v1912_v53  ;;  %v1945_v41 = vmul.f32 %v1913_v28, %v1913_v28  ;;  %v2043_v32 = vsub.f32 %v4667_v52, %v4635_v38  ;;  %v2044_v35 = vsub.f32 %v4669_v46, %v4635_v38  ;;  %5553 = vst [vmem:[#allocation147_spill] sm:$0xff] %v4717_v12 }
 0x3df   : > { %v1972_v62 = vadd.f32 %v1941_v20, %v1940_v40  ;;  %v1916_v14 = vsub.f32 %v4671_v59, %v4635_v38  ;;  %v1946_v30 = vmul.f32 %v1914_v49, %v1914_v49  ;;  %v2045_v51 = vsub.f32 %v4675_v3, %v4635_v38  ;;  %v4727_v49 = vld [vmem:[#allocation3 + $0x78] sm:$0xff] }
 0x3e0   : > { %v1917_v21 = vsub.f32 %v4677_v5, %v4635_v38  ;;  %v1947_v47 = vmul.f32 %v1915_v25, %v1915_v25  ;;  %v2046_v18 = vsub.f32 %v4685_v55, %v4635_v38  ;;  %v2075_v29 = vmul.f32 %v2043_v32, %v2043_v32 }
 0x3e1   : > { %v1973_v33 = vadd.f32 %v1972_v62, %v1942_v26  ;;  %v2076_v42 = vmul.f32 %v2044_v35, %v2044_v35  ;;  %v1918_v16 = vsub.f32 %v4687_v10, %v4635_v38  ;;  %v1948_v15 = vmul.f32 %v1916_v14, %v1916_v14  ;;  %v4725_v62 = vld [vmem:[#allocation3 + $0x140] sm:$0xff]  ;;  %v4733_v35 = vld [vmem:[#allocation3 + $0x148] sm:$0xff] }
 0x3e2   : > { %v2047_v24 = vsub.f32 %v4693_v60, %v4635_v38  ;;  %v2077_v9 = vmul.f32 %v2045_v51, %v2045_v51  ;;  %v1919_v61 = vsub.f32 %v4695_v4, %v4635_v38  ;;  %v1949_v36 = vmul.f32 %v1917_v21, %v1917_v21  ;;  %5554 = vst [vmem:[#allocation148_spill] sm:$0xff] %v4725_v62  ;;  %v4735_v14 = vld [vmem:[#allocation3 + $0x80] sm:$0xff] }
 0x3e3   : > { %v1974_v45 = vadd.f32 %v1973_v33, %v1943_v31  ;;  %v2048_v27 = vsub.f32 %v4701_v23, %v4635_v38  ;;  %v2078_v13 = vmul.f32 %v2046_v18, %v2046_v18  ;;  %v2107_v6 = vadd.f32 %v2076_v42, %v2075_v29  ;;  %5555 = vst [vmem:[#allocation149_spill] sm:$0xff] %v4733_v35  ;;  %v4741_v18 = vld [vmem:[#allocation3 + $0x150] sm:$0xff]  ;;  %v4743_v29 = vld [vmem:[#allocation3 + $0x88] sm:$0xff] }
 0x3e4   : > { %v1920_v37 = vsub.f32 %v4703_v1, %v4635_v38  ;;  %v1950_v44 = vmul.f32 %v1918_v16, %v1918_v16  ;;  %v2049_v40 = vsub.f32 %v4709_v63, %v4635_v38  ;;  %v2079_v20 = vmul.f32 %v2047_v24, %v2047_v24  ;;  %5556 = vst [vmem:[#allocation150_spill] sm:$0xff] %v4741_v18 }
 0x3e5   : > { %v1975_v8 = vadd.f32 %v1974_v45, %v1944_v57  ;;  %v2108_v53 = vadd.f32 %v2107_v6, %v2077_v9  ;;  %v1921_v26 = vsub.f32 %v4711_v48, %v4635_v38  ;;  %v1951_v28 = vmul.f32 %v1919_v61, %v1919_v61  ;;  %v4749_v61 = vld [vmem:[#allocation3 + $0x158] sm:$0xff] }
 0x3e6   : > { %v2050_v57 = vsub.f32 %v4717_v12, %v4635_v38  ;;  %v2080_v33 = vmul.f32 %v2048_v27, %v2048_v27  ;;  %v1952_v45 = vmul.f32 %v1920_v37, %v1920_v37  ;;  %v1923_v21 = vsub.f32 %v4727_v49, %v4635_v38  ;;  %5557 = vst [vmem:[#allocation151_spill] sm:$0xff] %v4749_v61 }
 0x3e7   : > { %v1976_v43 = vadd.f32 %v1975_v8, %v1945_v41  ;;  %v2109_v25 = vadd.f32 %v2108_v53, %v2078_v13  ;;  %v1922_v41 = vsub.f32 %v4719_v11, %v4635_v38  ;;  %v2081_v8 = vmul.f32 %v2049_v40, %v2049_v40  ;;  %v4759_v40 = vld [vmem:[#allocation3 + $0x98] sm:$0xff] }
 0x3e8   : > { %v2052_v42 = vsub.f32 %v4733_v35, %v4635_v38  ;;  %v2082_v16 = vmul.f32 %v2050_v57, %v2050_v57  ;;  %v1925_v6 = vsub.f32 %v4743_v29, %v4635_v38  ;;  %v1955_v37 = vmul.f32 %v1923_v21, %v1923_v21  ;;  %v4773_v21 = vld [vmem:[#allocation3 + $0x170] sm:$0xff] }
 0x3e9   : > { %v1977_v2 = vadd.f32 %v1976_v43, %v1946_v30  ;;  %v2051_v30 = vsub.f32 %v4725_v62, %v4635_v38  ;;  %v2110_v51 = vadd.f32 %v2109_v25, %v2079_v20  ;;  %v1954_v24 = vmul.f32 %v1922_v41, %v1922_v41  ;;  %v4767_v25 = vld [vmem:[#allocation3 + $0xa0] sm:$0xff]  ;;  %5560 = vst [vmem:[#allocation154_spill] sm:$0xff] %v4773_v21 }
 0x3ea   : > { %v2054_v20 = vsub.f32 %v4749_v61, %v4635_v38  ;;  %v2084_v53 = vmul.f32 %v2052_v42, %v2052_v42 }
 0x3eb   : > { %v1978_v54 = vadd.f32 %v1977_v2, %v1947_v47  ;;  %v1953_v47 = vmul.f32 %v1921_v26, %v1921_v26  ;;  %v1924_v2 = vsub.f32 %v4735_v14, %v4635_v38  ;;  %v2083_v27 = vmul.f32 %v2051_v30, %v2051_v30 }
 0x3ec   : > { %v1927_v30 = vsub.f32 %v4759_v40, %v4635_v38  ;;  %v2086_v42 = vmul.f32 %v2054_v20, %v2054_v20 }
 0x3ed   : > { %v1979_v0 = vadd.f32 %v1978_v54, %v1948_v15  ;;  %v2111_v15 = vadd.f32 %v2110_v51, %v2080_v33  ;;  %v2053_v54 = vsub.f32 %v4741_v18, %v4635_v38  ;;  %v4765_v33 = vld [vmem:[#allocation3 + $0x168] sm:$0xff] }
 0x3ee   : > { %5559 = vst [vmem:[#allocation153_spill] sm:$0xff] %v4765_v33 }
 0x3ef   : > { %v1980_v31 = vadd.f32 %v1979_v0, %v1949_v36  ;;  %v4751_v36 = vld [vmem:[#allocation3 + $0x90] sm:$0xff]  ;;  %v2112_v13 = vadd.f32 %v2111_v15, %v2081_v8  ;;  %v4757_v0 = vld [vmem:[#allocation3 + $0x160] sm:$0xff]  ;;  %v1957_v8 = vmul.f32 %v1925_v6, %v1925_v6  ;;  %v1928_v15 = vsub.f32 %v4767_v25, %v4635_v38 }
 0x3f0   : > { %5558 = vst [vmem:[#allocation152_spill] sm:$0xff] %v4757_v0  ;;  %v2055_v41 = vsub.f32 %v4757_v0, %v4635_v38 }
 0x3f1   : > { %v1981_v32 = vadd.f32 %v1980_v31, %v1950_v44  ;;  %v2113_v26 = vadd.f32 %v2112_v13, %v2082_v16  ;;  %v1956_v31 = vmul.f32 %v1924_v2, %v1924_v2 }
 0x3f2   : > { %v2087_v13 = vmul.f32 %v2055_v41, %v2055_v41 }
 0x3f3   : > { %v1982_v43 = vadd.f32 %v1981_v32, %v1951_v28  ;;  %v1926_v28 = vsub.f32 %v4751_v36, %v4635_v38  ;;  %v2114_v32 = vadd.f32 %v2113_v26, %v2083_v27  ;;  %v2057_v27 = vsub.f32 %v4773_v21, %v4635_v38  ;;  %v4791_v26 = vld [vmem:[#allocation3 + $0xb8] sm:$0xff] }
 0x3f4   : > { %v1931_v21 = vsub.f32 %v4791_v26, %v4635_v38 }
 0x3f5   : > { %v1983_v9 = vadd.f32 %v1982_v43, %v1952_v45  ;;  %v2085_v45 = vmul.f32 %v2053_v54, %v2053_v54  ;;  %v2056_v43 = vsub.f32 %v4765_v33, %v4635_v38  ;;  %v2115_v16 = vadd.f32 %v2114_v32, %v2084_v53  ;;  %v4783_v54 = vld [vmem:[#allocation3 + $0xb0] sm:$0xff]  ;;  %v4789_v53 = vld [vmem:[#allocation3 + $0x180] sm:$0xff] }
 0x3f6   : > { %v1958_v2 = vmul.f32 %v1926_v28, %v1926_v28  ;;  %5562 = vst [vmem:[#allocation156_spill] sm:$0xff] %v4789_v53  ;;  %v1930_v32 = vsub.f32 %v4783_v54, %v4635_v38 }
 0x3f7   : > { %v1984_v44 = vadd.f32 %v1983_v9, %v1953_v47  ;;  %v4775_v47 = vld [vmem:[#allocation3 + $0xa8] sm:$0xff]  ;;  %v4781_v9 = vld [vmem:[#allocation3 + $0x178] sm:$0xff]  ;;  %v2116_v6 = vadd.f32 %v2115_v16, %v2085_v45  ;;  %v4799_v16 = vld [vmem:[#allocation3 + $0xc0] sm:$0xff] }
 0x3f8   : > { %5561 = vst [vmem:[#allocation155_spill] sm:$0xff] %v4781_v9  ;;  %v2058_v28 = vsub.f32 %v4781_v9, %v4635_v38  ;;  %v4797_v45 = vld [vmem:[#allocation3 + $0x188] sm:$0xff]  ;;  %v1932_v33 = vsub.f32 %v4799_v16, %v4635_v38 }
 0x3f9   : > { %v1985_v57 = vadd.f32 %v1984_v44, %v1954_v24  ;;  %v1959_v44 = vmul.f32 %v1927_v30, %v1927_v30  ;;  %5563 = vst [vmem:[#allocation157_spill] sm:$0xff] %v4797_v45  ;;  %v2059_v30 = vsub.f32 %v4789_v53, %v4635_v38  ;;  %v1962_v53 = vmul.f32 %v1930_v32, %v1930_v32 }
 0x3fb   : > { %v1986_v51 = vadd.f32 %v1985_v57, %v1955_v37  ;;  %v1929_v37 = vsub.f32 %v4775_v47, %v4635_v38  ;;  %v2117_v57 = vadd.f32 %v2116_v6, %v2086_v42  ;;  %v4805_v42 = vld [vmem:[#allocation3 + $0x190] sm:$0xff]  ;;  %v4807_v6 = vld [vmem:[#allocation3 + $0xc8] sm:$0xff] }
 0x3fc   : > { %5564 = vst [vmem:[#allocation158_spill] sm:$0xff] %v4805_v42  ;;  %v1933_v0 = vsub.f32 %v4807_v6, %v4635_v38 }
 0x3fd   : > { %v1987_v24 = vadd.f32 %v1986_v51, %v1956_v31  ;;  %v2088_v31 = vmul.f32 %v2056_v43, %v2056_v43  ;;  %v1960_v51 = vmul.f32 %v1928_v15, %v1928_v15  ;;  %v1961_v9 = vmul.f32 %v1929_v37, %v1929_v37 }
 0x3fe   : > { %v2060_v15 = vsub.f32 %v4797_v45, %v4635_v38  ;;  %v2061_v37 = vsub.f32 %v4805_v42, %v4635_v38  ;;  %v1963_v45 = vmul.f32 %v1931_v21, %v1931_v21  ;;  %v1964_v42 = vmul.f32 %v1932_v33, %v1932_v33 }
 0x3ff   : > { %v1988_v20 = vadd.f32 %v1987_v24, %v1957_v8  ;;  %v2089_v8 = vmul.f32 %v2057_v27, %v2057_v27  ;;  %v2118_v24 = vadd.f32 %v2117_v57, %v2087_v13  ;;  %v4813_v13 = vld [vmem:[#allocation3 + $0x198] sm:$0xff]  ;;  %v4815_v57 = vld [vmem:[#allocation3 + $0xd0] sm:$0xff] }
 0x400   : > { %5565 = vst [vmem:[#allocation159_spill] sm:$0xff] %v4813_v13  ;;  %v2062_v32 = vsub.f32 %v4813_v13, %v4635_v38  ;;  %v1934_v61 = vsub.f32 %v4815_v57, %v4635_v38  ;;  %v1965_v13 = vmul.f32 %v1933_v0, %v1933_v0 }
 0x401   : > { %v1989_v41 = vadd.f32 %v1988_v20, %v1958_v2  ;;  %v2090_v2 = vmul.f32 %v2058_v28, %v2058_v28  ;;  %v2119_v20 = vadd.f32 %v2118_v24, %v2088_v31  ;;  %v4821_v31 = vld [vmem:[#allocation3 + $0x1a0] sm:$0xff]  ;;  %v4823_v24 = vld [vmem:[#allocation3 + $0xd8] sm:$0xff] }
 0x402   : > { %5566 = vst [vmem:[#allocation160_spill] sm:$0xff] %v4821_v31  ;;  %v2063_v21 = vsub.f32 %v4821_v31, %v4635_v38  ;;  %v1935_v18 = vsub.f32 %v4823_v24, %v4635_v38  ;;  %v1966_v31 = vmul.f32 %v1934_v61, %v1934_v61 }
 0x403   : > { %v1990_v43 = vadd.f32 %v1989_v41, %v1959_v44  ;;  %v2091_v44 = vmul.f32 %v2059_v30, %v2059_v30  ;;  %v2120_v41 = vadd.f32 %v2119_v20, %v2089_v8  ;;  %v4829_v8 = vld [vmem:[#allocation3 + $0x1a8] sm:$0xff]  ;;  %v4831_v20 = vld [vmem:[#allocation3 + $0xe0] sm:$0xff] }
 0x404   : > { %5567 = vst [vmem:[#allocation161_spill] sm:$0xff] %v4829_v8  ;;  %v2064_v33 = vsub.f32 %v4829_v8, %v4635_v38  ;;  %v1936_v35 = vsub.f32 %v4831_v20, %v4635_v38  ;;  %v1967_v8 = vmul.f32 %v1935_v18, %v1935_v18 }
 0x405   : > { %v1991_v27 = vadd.f32 %v1990_v43, %v1960_v51  ;;  %v2092_v51 = vmul.f32 %v2060_v15, %v2060_v15  ;;  %v2121_v43 = vadd.f32 %v2120_v41, %v2090_v2  ;;  %v4837_v2 = vld [vmem:[#allocation3 + $0x1b0] sm:$0xff]  ;;  %v4839_v41 = vld [vmem:[#allocation3 + $0xe8] sm:$0xff] }
 0x406   : > { %5568 = vst [vmem:[#allocation162_spill] sm:$0xff] %v4837_v2  ;;  %v2065_v0 = vsub.f32 %v4837_v2, %v4635_v38  ;;  %v1937_v62 = vsub.f32 %v4839_v41, %v4635_v38  ;;  %v1968_v2 = vmul.f32 %v1936_v35, %v1936_v35 }
 0x407   : > { %v1992_v28 = vadd.f32 %v1991_v27, %v1961_v9  ;;  %v2093_v9 = vmul.f32 %v2061_v37, %v2061_v37  ;;  %v2122_v27 = vadd.f32 %v2121_v43, %v2091_v44  ;;  %v4845_v44 = vld [vmem:[#allocation3 + $0x1b8] sm:$0xff]  ;;  %v4847_v43 = vld [vmem:[#allocation3 + $0xf0] sm:$0xff] }
 0x408   : > { %5569 = vst [vmem:[#allocation163_spill] sm:$0xff] %v4845_v44  ;;  %v2066_v61 = vsub.f32 %v4845_v44, %v4635_v38  ;;  %v1938_v12 = vsub.f32 %v4847_v43, %v4635_v38  ;;  %v1969_v63 = vmul.f32 %v1937_v62, %v1937_v62  ;;  %v4867_v44 = vld [vmem:[#allocation3 + $0x1d0] sm:$0xff]  ;;  %v4875_v62 = vld [vmem:[#allocation3 + $0x1e0] sm:$0xff] }
 0x409   : > { %v1993_v30 = vadd.f32 %v1992_v28, %v1962_v53  ;;  %v2094_v53 = vmul.f32 %v2062_v32, %v2062_v32  ;;  %v2123_v28 = vadd.f32 %v2122_v27, %v2092_v51  ;;  %v4853_v51 = vld [vmem:[#allocation3 + $0x1c0] sm:$0xff]  ;;  %v4855_v27 = vld [vmem:[#allocation3 + $0xf8] sm:$0xff]  ;;  %5572 = vst [vmem:[#allocation166_spill] sm:$0xff] %v4867_v44 }
 0x40a   : > { %5570 = vst [vmem:[#allocation164_spill] sm:$0xff] %v4853_v51  ;;  %v2067_v18 = vsub.f32 %v4853_v51, %v4635_v38 }
 0x40b   : > { %v1994_v15 = vadd.f32 %v1993_v30, %v1963_v45  ;;  %v2095_v45 = vmul.f32 %v2063_v21, %v2063_v21  ;;  %v2124_v30 = vadd.f32 %v2123_v28, %v2093_v9  ;;  %v4861_v9 = vld [vmem:[#allocation3 + $0x1c8] sm:$0xff]  ;;  %5574 = vst [vmem:[#allocation168_spill] sm:$0xff] %v4875_v62 }
 0x40c   : > { %5571 = vst [vmem:[#allocation165_spill] sm:$0xff] %v4861_v9 }
 0x40d   : > { %v1995_v37 = vadd.f32 %v1994_v15, %v1964_v42  ;;  %v2096_v42 = vmul.f32 %v2064_v33, %v2064_v33  ;;  %v2125_v15 = vadd.f32 %v2124_v30, %v2094_v53  ;;  %v2068_v33 = vsub.f32 %v4861_v9, %v4635_v38 }
 0x40e   : > { %v2098_v53 = vmul.f32 %v2066_v61, %v2066_v61 }
 0x40f   : > { %v1996_v32 = vadd.f32 %v1995_v37, %v1965_v13  ;;  %v2097_v13 = vmul.f32 %v2065_v0, %v2065_v0  ;;  %v2126_v28 = vadd.f32 %v2125_v15, %v2095_v45  ;;  %v1939_v37 = vsub.f32 %v4855_v27, %v4635_v38 }
 0x410   : > { %v2069_v0 = vsub.f32 %v4867_v44, %v4635_v38  ;;  %v2099_v45 = vmul.f32 %v2067_v18, %v2067_v18  ;;  %v4883_v18 = vld [vmem:[#allocation3 + $0x1f0] sm:$0xff] }
 0x411   : > { %v1997_v21 = vadd.f32 %v1996_v32, %v1966_v31  ;;  %v2127_v35 = vadd.f32 %v2126_v28, %v2096_v42  ;;  %v1970_v31 = vmul.f32 %v1938_v12, %v1938_v12  ;;  %v4871_v32 = vld [vmem:[#allocation3 + $0x1d8] sm:$0xff]  ;;  %v1971_v51 = vmul.f32 %v1939_v37, %v1939_v37  ;;  %v4879_v42 = vld [vmem:[#allocation3 + $0x1e8] sm:$0xff]  ;;  %5576 = vst [vmem:[#allocation170_spill] sm:$0xff] %v4883_v18 }
 0x412   : > { %5573 = vst [vmem:[#allocation167_spill] sm:$0xff] %v4871_v32  ;;  %v2101_v12 = vmul.f32 %v2069_v0, %v2069_v0 }
 0x413   : > { %v1998_v23 = vadd.f32 %v1997_v21, %v1967_v8  ;;  %v2128_v15 = vadd.f32 %v2127_v35, %v2097_v13  ;;  %v2070_v8 = vsub.f32 %v4871_v32, %v4635_v38  ;;  %v2100_v21 = vmul.f32 %v2068_v33, %v2068_v33  ;;  %5575 = vst [vmem:[#allocation169_spill] sm:$0xff] %v4879_v42  ;;  %v4887_v35 = vld [vmem:[#allocation3 + $0x1f8] sm:$0xff] }
 0x415   : > { %v1999_v30 = vadd.f32 %v1998_v23, %v1968_v2  ;;  %v2129_v9 = vadd.f32 %v2128_v15, %v2098_v53  ;;  %v2071_v23 = vsub.f32 %v4875_v62, %v4635_v38  ;;  %v2102_v13 = vmul.f32 %v2070_v8, %v2070_v8 }
 0x417   : > { %v2000_v60 = vadd.f32 %v1999_v30, %v1969_v63  ;;  %v2130_v2 = vadd.f32 %v2129_v9, %v2099_v45  ;;  %v2072_v63 = vsub.f32 %v4879_v42, %v4635_v38  ;;  %v2103_v53 = vmul.f32 %v2071_v23, %v2071_v23 }
 0x418   : > { %v2074_v30 = vsub.f32 %v4887_v35, %v4635_v38 }
 0x419   : > { %v2001_v61 = vadd.f32 %v2000_v60, %v1970_v31  ;;  %v2131_v37 = vadd.f32 %v2130_v2, %v2100_v21  ;;  %v2073_v60 = vsub.f32 %v4883_v18, %v4635_v38  ;;  %v2104_v9 = vmul.f32 %v2072_v63, %v2072_v63 }
 0x41b   : > { %v2002_v28 = vadd.f32 %v2001_v61, %v1971_v51  ;;  %v2132_v31 = vadd.f32 %v2131_v37, %v2101_v12  ;;  %v2105_v45 = vmul.f32 %v2073_v60, %v2073_v60  ;;  %v2106_v61 = vmul.f32 %v2074_v30, %v2074_v30 }
 0x41d   : > { %v2003_v33 = vrot.slane %v2002_v28, 4  ;;  %v2133_v51 = vadd.f32 %v2132_v31, %v2102_v13 }
 0x41f   : > { %v2004_v0 = vadd.f32 %v2003_v33, %v2002_v28  ;;  %v2134_v15 = vadd.f32 %v2133_v51, %v2103_v53 }
 0x421   : > { %v2135_v42 = vadd.f32 %v2134_v15, %v2104_v9  ;;  %v2005_v8 = vrot.slane %v2004_v0, 2 }
 0x423   : > { %v2136_v21 = vadd.f32 %v2135_v42, %v2105_v45  ;;  %v2006_v62 = vadd.f32 %v2005_v8, %v2004_v0 }
 0x425   : > { %v2137_v2 = vadd.f32 %v2136_v21, %v2106_v61  ;;  %v2007_v55 = vrot.slane %v2006_v62, 1 }
 0x427   : > { %v2138_v32 = vrot.slane %v2137_v2, 4  ;;  %v2008_v12 = vadd.f32 %v2007_v55, %v2006_v62 }
 0x429   : > { %v2139_v44 = vadd.f32 %v2138_v32, %v2137_v2 }
 0x42b   : > { %v2140_v18 = vrot.slane %v2139_v44, 2 }
 0x42d   : > { %v2141_v23 = vadd.f32 %v2140_v18, %v2139_v44  ;;  %v2157_v44 = vld [vmem:[%s5110_s3] sm:$0x1] }
 0x42f   : > { %v2142_v37 = vrot.slane %v2141_v23, 1 }
 0x431   : > { %v2143_v3 = vadd.f32 %v2142_v37, %v2141_v23 }
 0x433   : > { %v2144_v38 = vadd.f32 %v2143_v3, %v2008_v12  ;;  %v2159_v3 = vld [vmem:[%s5111_s4] sm:$0x1] }
 0x435   : > { %v2145_v63 = vmul.f32 0.001953125, %v2144_v38 }
 0x437   : > { %v2146_v13 = vadd.f32 1e-05, %v2145_v63 }
 0x439   : > { %2564 = vrsqrt.f32 %v2146_v13  ;;  %vm2153_vm12 = vweird.f32 %v2146_v13 }
 0x43f   : > { %v2565_v28 = vpop.eup %2564 }
 0x440   : > { %v2148_v33 = vmul.f32 %v2565_v28, %v2146_v13  ;;  %vm2154_vm13 = vweird.f32 %v2565_v28 }
 0x441   : > { %vm2155_vm14 = vmor %vm2153_vm12, %vm2154_vm13 }
 0x442   : > { %v2149_v60 = vmul.f32 %v2565_v28, %v2148_v33 }
 0x444   : > { %v2150_v53 = vmul.f32 0.5, %v2149_v60 }
 0x446   : > { %v2151_v42 = vsub.f32 1.5, %v2150_v53 }
 0x448   : > { %v2152_v31 = vmul.f32 %v2565_v28, %v2151_v42 }
 0x44a   : > { %v2156_v55 = vsel %vm2155_vm14, %v2565_v28, %v2152_v31 }
 0x44b   : > { %v2158_v32 = vmul.f32 %v2157_v44, %v2156_v55 }
 0x44d   : > { %v2160_v62 = vmul.f32 %v2158_v32, %v4632_v56  ;;  %v4900_v18 = vperm.slane %v2158_v32, 0 }
 0x44f   : > { %v2161_v30 = vsub.f32 %v2159_v3, %v2160_v62  ;;  %v2165_v9 = vmul.f32 %v4900_v18, %v4637_v58  ;;  %v2166_v51 = vmul.f32 %v4900_v18, %v4639_v17  ;;  %v2167_v0 = vmul.f32 %v4900_v18, %v4641_v7 }
 0x450   : > { %v2168_v45 = vmul.f32 %v4900_v18, %v4647_v50  ;;  %v2169_v56 = vmul.f32 %v4900_v18, %v4651_v34  ;;  %v2170_v61 = vmul.f32 %v4900_v18, %v4655_v39  ;;  %v2171_v7 = vmul.f32 %v4900_v18, %v4659_v22 }
 0x451   : > { %v4910_v15 = vperm.slane %v2161_v30, 0  ;;  %v2172_v50 = vmul.f32 %v4900_v18, %v4663_v19  ;;  %v2173_v39 = vmul.f32 %v4900_v18, %v4671_v59  ;;  %v2174_v23 = vmul.f32 %v4900_v18, %v4677_v5 }
 0x452   : > { %v2175_v12 = vmul.f32 %v4900_v18, %v4687_v10  ;;  %v2176_v37 = vmul.f32 %v4900_v18, %v4695_v4  ;;  %v2177_v38 = vmul.f32 %v4900_v18, %v4703_v1  ;;  %v2178_v63 = vmul.f32 %v4900_v18, %v4711_v48 }
 0x453   : > { %v2200_v8 = vadd.f32 %v4910_v15, %v2165_v9  ;;  %v2201_v58 = vadd.f32 %v4910_v15, %v2166_v51  ;;  %v2202_v17 = vadd.f32 %v4910_v15, %v2167_v0  ;;  %v2203_v21 = vadd.f32 %v4910_v15, %v2168_v45 }
 0x454   : > { %v2204_v34 = vadd.f32 %v4910_v15, %v2169_v56  ;;  %v2205_v2 = vadd.f32 %v4910_v15, %v2170_v61  ;;  %v2206_v22 = vadd.f32 %v4910_v15, %v2171_v7  ;;  %v2207_v19 = vadd.f32 %v4910_v15, %v2172_v50 }
 0x455   : > { %2232 = vst [vmem:[#allocation3] sm:$0xff] %v2200_v8  ;;  %v2208_v59 = vadd.f32 %v4910_v15, %v2173_v39  ;;  %v2209_v5 = vadd.f32 %v4910_v15, %v2174_v23  ;;  %v2210_v10 = vadd.f32 %v4910_v15, %v2175_v12  ;;  %v2179_v13 = vmul.f32 %v4900_v18, %v4719_v11  ;;  %v5580_v23 = vld [vmem:[#allocation145_spill] sm:$0xff]  ;;  %v5581_v12 = vld [vmem:[#allocation146_spill] sm:$0xff] }
 0x456   : > { %2233 = vst [vmem:[#allocation3 + $0x8] sm:$0xff] %v2201_v58  ;;  %v2211_v4 = vadd.f32 %v4910_v15, %v2176_v37  ;;  %v2180_v28 = vmul.f32 %v4900_v18, %v4727_v49  ;;  %v2212_v1 = vadd.f32 %v4910_v15, %v2177_v38  ;;  %v2181_v33 = vmul.f32 %v4900_v18, %v4735_v14  ;;  %v5577_v58 = vld [vmem:[#allocation142_spill] sm:$0xff] }
 0x457   : > { %2234 = vst [vmem:[#allocation3 + $0x10] sm:$0xff] %v2202_v17  ;;  %v2213_v48 = vadd.f32 %v4910_v15, %v2178_v63  ;;  %v2182_v60 = vmul.f32 %v4900_v18, %v4743_v29  ;;  %v2214_v11 = vadd.f32 %v4910_v15, %v2179_v13  ;;  %v2183_v53 = vmul.f32 %v4900_v18, %v4751_v36  ;;  %v5583_v63 = vld [vmem:[#allocation148_spill] sm:$0xff] }
 0x458   : > { %2235 = vst [vmem:[#allocation3 + $0x18] sm:$0xff] %v2203_v21  ;;  %v2215_v49 = vadd.f32 %v4910_v15, %v2180_v28  ;;  %v2184_v42 = vmul.f32 %v4900_v18, %v4759_v40  ;;  %v2216_v14 = vadd.f32 %v4910_v15, %v2181_v33  ;;  %v2185_v31 = vmul.f32 %v4900_v18, %v4767_v25  ;;  %v5578_v21 = vld [vmem:[#allocation143_spill] sm:$0xff]  ;;  %v5585_v33 = vld [vmem:[#allocation150_spill] sm:$0xff] }
 0x459   : > { %2236 = vst [vmem:[#allocation3 + $0x20] sm:$0xff] %v2204_v34  ;;  %v2217_v29 = vadd.f32 %v4910_v15, %v2182_v60  ;;  %v2186_v44 = vmul.f32 %v4900_v18, %v4775_v47  ;;  %v2218_v36 = vadd.f32 %v4910_v15, %v2183_v53  ;;  %v2187_v55 = vmul.f32 %v4900_v18, %v4783_v54  ;;  %v5579_v34 = vld [vmem:[#allocation144_spill] sm:$0xff] }
 0x45a   : > { %2237 = vst [vmem:[#allocation3 + $0x28] sm:$0xff] %v2205_v2  ;;  %v2219_v40 = vadd.f32 %v4910_v15, %v2184_v42  ;;  %v2188_v32 = vmul.f32 %v4900_v18, %v4791_v26  ;;  %v2220_v25 = vadd.f32 %v4910_v15, %v2185_v31  ;;  %v2189_v3 = vmul.f32 %v4900_v18, %v4799_v16  ;;  %v5587_v42 = vld [vmem:[#allocation152_spill] sm:$0xff] }
 0x45b   : > { %2238 = vst [vmem:[#allocation3 + $0x30] sm:$0xff] %v2206_v22  ;;  %v2221_v47 = vadd.f32 %v4910_v15, %v2186_v44  ;;  %v2190_v62 = vmul.f32 %v4900_v18, %v4807_v6  ;;  %v2222_v54 = vadd.f32 %v4910_v15, %v2187_v55  ;;  %v2191_v30 = vmul.f32 %v4900_v18, %v4815_v57  ;;  %v5589_v55 = vld [vmem:[#allocation154_spill] sm:$0xff] }
 0x45c   : > { %2239 = vst [vmem:[#allocation3 + $0x38] sm:$0xff] %v2207_v19  ;;  %v2223_v26 = vadd.f32 %v4910_v15, %v2188_v32  ;;  %v2192_v9 = vmul.f32 %v4900_v18, %v4823_v24  ;;  %v2224_v16 = vadd.f32 %v4910_v15, %v2189_v3  ;;  %v2193_v51 = vmul.f32 %v4900_v18, %v4831_v20 }
 0x45d   : > { %2240 = vst [vmem:[#allocation3 + $0x40] sm:$0xff] %v2208_v59  ;;  %v2225_v6 = vadd.f32 %v4910_v15, %v2190_v62  ;;  %v2194_v0 = vmul.f32 %v4900_v18, %v4839_v41  ;;  %v2226_v57 = vadd.f32 %v4910_v15, %v2191_v30  ;;  %v2195_v45 = vmul.f32 %v4900_v18, %v4847_v43  ;;  %v5582_v59 = vld [vmem:[#allocation147_spill] sm:$0xff]  ;;  %v5591_v62 = vld [vmem:[#allocation156_spill] sm:$0xff] }
 0x45e   : > { %2241 = vst [vmem:[#allocation3 + $0x48] sm:$0xff] %v2209_v5  ;;  %v2227_v24 = vadd.f32 %v4910_v15, %v2192_v9  ;;  %v2196_v56 = vmul.f32 %v4900_v18, %v4855_v27  ;;  %v2228_v20 = vadd.f32 %v4910_v15, %v2193_v51  ;;  %v2296_v61 = vmul.f32 %v4900_v18, %v4667_v52  ;;  %v5593_v51 = vld [vmem:[#allocation158_spill] sm:$0xff] }
 0x45f   : > { %2242 = vst [vmem:[#allocation3 + $0x50] sm:$0xff] %v2210_v10  ;;  %v2229_v41 = vadd.f32 %v4910_v15, %v2194_v0  ;;  %v2297_v8 = vmul.f32 %v4900_v18, %v4669_v46  ;;  %v2230_v43 = vadd.f32 %v4910_v15, %v2195_v45  ;;  %v2298_v17 = vmul.f32 %v4900_v18, %v5577_v58  ;;  %v5597_v58 = vld [vmem:[#allocation162_spill] sm:$0xff] }
 0x460   : > { %2243 = vst [vmem:[#allocation3 + $0x58] sm:$0xff] %v2211_v4  ;;  %v2327_v27 = vmul.f32 %v4900_v18, %v4887_v35  ;;  %v2231_v7 = vadd.f32 %v4910_v15, %v2196_v56  ;;  %v2299_v52 = vmul.f32 %v4900_v18, %v5578_v21  ;;  %v2328_v50 = vadd.f32 %v2296_v61, %v4910_v15  ;;  %v5584_v4 = vld [vmem:[#allocation149_spill] sm:$0xff]  ;;  %v5595_v56 = vld [vmem:[#allocation160_spill] sm:$0xff] }
 0x461   : > { %2244 = vst [vmem:[#allocation3 + $0x60] sm:$0xff] %v2212_v1  ;;  %v2300_v46 = vmul.f32 %v4900_v18, %v5579_v34  ;;  %v2329_v2 = vadd.f32 %v2297_v8, %v4910_v15  ;;  %v2301_v35 = vmul.f32 %v4900_v18, %v5580_v23  ;;  %v2330_v22 = vadd.f32 %v2298_v17, %v4910_v15 }
 0x462   : > { %2245 = vst [vmem:[#allocation3 + $0x68] sm:$0xff] %v2213_v48  ;;  %v5014_v39 = vadd.f32 %v2327_v27, %v4910_v15  ;;  %v2302_v19 = vmul.f32 %v4900_v18, %v5581_v12  ;;  %v2331_v37 = vadd.f32 %v2299_v52, %v4910_v15  ;;  %v2303_v38 = vmul.f32 %v4900_v18, %v5582_v59 }
 0x463   : > { %2246 = vst [vmem:[#allocation3 + $0x70] sm:$0xff] %v2214_v11  ;;  %v2332_v5 = vadd.f32 %v2300_v46, %v4910_v15  ;;  %v2304_v10 = vmul.f32 %v4900_v18, %v5583_v63  ;;  %v2333_v13 = vadd.f32 %v2301_v35, %v4910_v15  ;;  %v2305_v28 = vmul.f32 %v4900_v18, %v5584_v4  ;;  %v5586_v11 = vld [vmem:[#allocation151_spill] sm:$0xff] }
 0x464   : > { %2247 = vst [vmem:[#allocation3 + $0x78] sm:$0xff] %v2215_v49  ;;  %v2334_v1 = vadd.f32 %v2302_v19, %v4910_v15  ;;  %v2306_v48 = vmul.f32 %v4900_v18, %v5585_v33  ;;  %v2335_v60 = vadd.f32 %v2303_v38, %v4910_v15  ;;  %v2307_v53 = vmul.f32 %v4900_v18, %v5586_v11 }
 0x465   : > { %2248 = vst [vmem:[#allocation3 + $0x80] sm:$0xff] %v2216_v14  ;;  %v2336_v49 = vadd.f32 %v2304_v10, %v4910_v15  ;;  %v2308_v14 = vmul.f32 %v4900_v18, %v5587_v42  ;;  %v2337_v31 = vadd.f32 %v2305_v28, %v4910_v15  ;;  %v2318_v17 = vmul.f32 %v4900_v18, %v5597_v58 }
 0x466   : > { %2249 = vst [vmem:[#allocation3 + $0x88] sm:$0xff] %v2217_v29  ;;  %v5588_v29 = vld [vmem:[#allocation153_spill] sm:$0xff]  ;;  %v2339_v32 = vadd.f32 %v2307_v53, %v4910_v15 }
 0x467   : > { %2250 = vst [vmem:[#allocation3 + $0x90] sm:$0xff] %v2218_v36  ;;  %v2309_v44 = vmul.f32 %v4900_v18, %v5588_v29  ;;  %v2338_v36 = vadd.f32 %v2306_v48, %v4910_v15  ;;  %v2350_v35 = vadd.f32 %v2318_v17, %v4910_v15 }
 0x468   : > { %2251 = vst [vmem:[#allocation3 + $0x98] sm:$0xff] %v2219_v40  ;;  %v2310_v40 = vmul.f32 %v4900_v18, %v5589_v55 }
 0x469   : > { %2252 = vst [vmem:[#allocation3 + $0xa0] sm:$0xff] %v2220_v25  ;;  %v5590_v25 = vld [vmem:[#allocation155_spill] sm:$0xff]  ;;  %v2341_v30 = vadd.f32 %v2309_v44, %v4910_v15 }
 0x46a   : > { %2253 = vst [vmem:[#allocation3 + $0xa8] sm:$0xff] %v2221_v47  ;;  %v2311_v3 = vmul.f32 %v4900_v18, %v5590_v25  ;;  %v2340_v47 = vadd.f32 %v2308_v14, %v4910_v15 }
 0x46b   : > { %2254 = vst [vmem:[#allocation3 + $0xb0] sm:$0xff] %v2222_v54  ;;  %v2312_v54 = vmul.f32 %v4900_v18, %v5591_v62 }
 0x46c   : > { %2255 = vst [vmem:[#allocation3 + $0xb8] sm:$0xff] %v2223_v26  ;;  %v5592_v26 = vld [vmem:[#allocation157_spill] sm:$0xff]  ;;  %v2343_v0 = vadd.f32 %v2311_v3, %v4910_v15 }
 0x46d   : > { %2256 = vst [vmem:[#allocation3 + $0xc0] sm:$0xff] %v2224_v16  ;;  %v2313_v9 = vmul.f32 %v4900_v18, %v5592_v26  ;;  %v2342_v16 = vadd.f32 %v2310_v40, %v4910_v15 }
 0x46e   : > { %2257 = vst [vmem:[#allocation3 + $0xc8] sm:$0xff] %v2225_v6  ;;  %v2314_v6 = vmul.f32 %v4900_v18, %v5593_v51 }
 0x46f   : > { %2258 = vst [vmem:[#allocation3 + $0xd0] sm:$0xff] %v2226_v57  ;;  %v5594_v57 = vld [vmem:[#allocation159_spill] sm:$0xff]  ;;  %v2345_v61 = vadd.f32 %v2313_v9, %v4910_v15 }
 0x470   : > { %2259 = vst [vmem:[#allocation3 + $0xd8] sm:$0xff] %v2227_v24  ;;  %v2315_v45 = vmul.f32 %v4900_v18, %v5594_v57  ;;  %v2344_v24 = vadd.f32 %v2312_v54, %v4910_v15 }
 0x471   : > { %2260 = vst [vmem:[#allocation3 + $0xe0] sm:$0xff] %v2228_v20  ;;  %v2316_v20 = vmul.f32 %v4900_v18, %v5595_v56 }
 0x472   : > { %2261 = vst [vmem:[#allocation3 + $0xe8] sm:$0xff] %v2229_v41  ;;  %v5596_v41 = vld [vmem:[#allocation161_spill] sm:$0xff]  ;;  %v2347_v27 = vadd.f32 %v2315_v45, %v4910_v15 }
 0x473   : > { %2262 = vst [vmem:[#allocation3 + $0xf0] sm:$0xff] %v2230_v43  ;;  %v2317_v8 = vmul.f32 %v4900_v18, %v5596_v41  ;;  %v2346_v43 = vadd.f32 %v2314_v6, %v4910_v15  ;;  %v2348_v52 = vadd.f32 %v2316_v20, %v4910_v15 }
 0x474   : > { %2263 = vst [vmem:[#allocation3 + $0xf8] sm:$0xff] %v2231_v7  ;;  %v5598_v7 = vld [vmem:[#allocation163_spill] sm:$0xff] }
 0x475   : > { %2360 = vst [vmem:[#allocation3 + $0x100] sm:$0xff] %v2328_v50  ;;  %v2319_v21 = vmul.f32 %v4900_v18, %v5598_v7  ;;  %v5599_v50 = vld [vmem:[#allocation164_spill] sm:$0xff]  ;;  %v2349_v46 = vadd.f32 %v2317_v8, %v4910_v15 }
 0x476   : > { %2361 = vst [vmem:[#allocation3 + $0x108] sm:$0xff] %v2329_v2  ;;  %v2320_v34 = vmul.f32 %v4900_v18, %v5599_v50  ;;  %v5600_v2 = vld [vmem:[#allocation165_spill] sm:$0xff] }
 0x477   : > { %2362 = vst [vmem:[#allocation3 + $0x110] sm:$0xff] %v2330_v22  ;;  %v2321_v23 = vmul.f32 %v4900_v18, %v5600_v2  ;;  %v5601_v22 = vld [vmem:[#allocation166_spill] sm:$0xff]  ;;  %v2351_v19 = vadd.f32 %v2319_v21, %v4910_v15 }
 0x478   : > { %2363 = vst [vmem:[#allocation3 + $0x118] sm:$0xff] %v2331_v37  ;;  %v2322_v12 = vmul.f32 %v4900_v18, %v5601_v22  ;;  %v5602_v37 = vld [vmem:[#allocation167_spill] sm:$0xff]  ;;  %v2352_v38 = vadd.f32 %v2320_v34, %v4910_v15 }
 0x479   : > { %2364 = vst [vmem:[#allocation3 + $0x120] sm:$0xff] %v2332_v5  ;;  %v2323_v59 = vmul.f32 %v4900_v18, %v5602_v37  ;;  %v5603_v5 = vld [vmem:[#allocation168_spill] sm:$0xff]  ;;  %v2353_v10 = vadd.f32 %v2321_v23, %v4910_v15 }
 0x47a   : > { %2365 = vst [vmem:[#allocation3 + $0x128] sm:$0xff] %v2333_v13  ;;  %v2324_v63 = vmul.f32 %v4900_v18, %v5603_v5  ;;  %v5604_v13 = vld [vmem:[#allocation169_spill] sm:$0xff]  ;;  %v2354_v28 = vadd.f32 %v2322_v12, %v4910_v15 }
 0x47b   : > { %2366 = vst [vmem:[#allocation3 + $0x130] sm:$0xff] %v2334_v1  ;;  %v2325_v4 = vmul.f32 %v4900_v18, %v5604_v13  ;;  %v5605_v1 = vld [vmem:[#allocation170_spill] sm:$0xff]  ;;  %v2355_v48 = vadd.f32 %v2323_v59, %v4910_v15 }
 0x47c   : > { %2367 = vst [vmem:[#allocation3 + $0x138] sm:$0xff] %v2335_v60  ;;  %v2326_v33 = vmul.f32 %v4900_v18, %v5605_v1  ;;  %v2356_v60 = vadd.f32 %v2324_v63, %v4910_v15 }
 0x47d   : > { %2368 = vst [vmem:[#allocation3 + $0x140] sm:$0xff] %v2336_v49  ;;  %v2357_v11 = vadd.f32 %v2325_v4, %v4910_v15 }
 0x47e   : > { %2369 = vst [vmem:[#allocation3 + $0x148] sm:$0xff] %v2337_v31  ;;  %v2358_v53 = vadd.f32 %v2326_v33, %v4910_v15 }
 0x47f   : > { %2370 = vst [vmem:[#allocation3 + $0x150] sm:$0xff] %v2338_v36 }
 0x480   : > { %2371 = vst [vmem:[#allocation3 + $0x158] sm:$0xff] %v2339_v32 }
 0x481   : > { %2372 = vst [vmem:[#allocation3 + $0x160] sm:$0xff] %v2340_v47 }
 0x482   : > { %2373 = vst [vmem:[#allocation3 + $0x168] sm:$0xff] %v2341_v30 }
 0x483   : > { %2374 = vst [vmem:[#allocation3 + $0x170] sm:$0xff] %v2342_v16 }
 0x484   : > { %2375 = vst [vmem:[#allocation3 + $0x178] sm:$0xff] %v2343_v0 }
 0x485   : > { %2376 = vst [vmem:[#allocation3 + $0x180] sm:$0xff] %v2344_v24 }
 0x486   : > { %2377 = vst [vmem:[#allocation3 + $0x188] sm:$0xff] %v2345_v61 }
 0x487   : > { %2378 = vst [vmem:[#allocation3 + $0x190] sm:$0xff] %v2346_v43 }
 0x488   : > { %2379 = vst [vmem:[#allocation3 + $0x198] sm:$0xff] %v2347_v27 }
 0x489   : > { %2380 = vst [vmem:[#allocation3 + $0x1a0] sm:$0xff] %v2348_v52 }
 0x48a   : > { %2381 = vst [vmem:[#allocation3 + $0x1a8] sm:$0xff] %v2349_v46 }
 0x48b   : > { %2382 = vst [vmem:[#allocation3 + $0x1b0] sm:$0xff] %v2350_v35 }
 0x48c   : > { %2383 = vst [vmem:[#allocation3 + $0x1b8] sm:$0xff] %v2351_v19 }
 0x48d   : > { %2384 = vst [vmem:[#allocation3 + $0x1c0] sm:$0xff] %v2352_v38 }
 0x48e   : > { %2385 = vst [vmem:[#allocation3 + $0x1c8] sm:$0xff] %v2353_v10 }
 0x48f   : > { %2386 = vst [vmem:[#allocation3 + $0x1d0] sm:$0xff] %v2354_v28 }
 0x490   : > { %2387 = vst [vmem:[#allocation3 + $0x1d8] sm:$0xff] %v2355_v48 }
 0x491   : > { %2388 = vst [vmem:[#allocation3 + $0x1e0] sm:$0xff] %v2356_v60 }
 0x492   : > { %2389 = vst [vmem:[#allocation3 + $0x1e8] sm:$0xff] %v2357_v11 }
 0x493   : > { %2390 = vst [vmem:[#allocation3 + $0x1f0] sm:$0xff] %v2358_v53 }
 0x494   : > { %2391 = vst [vmem:[#allocation3 + $0x1f8] sm:$0xff] %v5014_v39 }
 0x495 PF: > { %p2509_p6 = scmp.eq.s32.totalorder %s2653_s19, 1  ;;  %s2615_s29 = smov [#allocation3]  }
 0x496   : > { %s2397_s30 = sshll.u32 %s2615_s29, 4  ;;  %s2399_s8 = sshll.u32 %s5112_s5, 4  ;;  %s2398_s30 = int_to_ptr.vmem [resolvable:$true] %s2397_s30  ;;  %s2400_s8 = int_to_ptr.hbm [resolvable:$true] %s2399_s8 }
 0x497   : > { %s2616_s9 = smov 128  }
 0x498   : > { %2506 = dma.vmem_to_hbm [thread:$0]  (%p2509_p6), %s2398_s30, 8192, %s2400_s8, [#allocation4], %s2616_s9, %s2616_s9, %s2608_s26  }
 0x499   : > { %2599 = dma.done.wait (%p2509_p6), [#allocation4], 8192  }
 0x49a   : > { %2601 = vsyncadd (%p2509_p6), [#allocation4], 4294959104 }
 0x49b PF: > { %s16_s18 = sadd.s32 1, %s2604_s18  }
 0x49c   : > { %p13_p7 = scmp.ge.s32.totalorder %s16_s18, 4  }
 0x49e   :  { %15 = sbr.rel (!%p13_p7) target bundleno = 1 (0x1), region = 77 }
 0x4a3   :  { %2416 = vsyncpa [#allocation4], 1 }
 0x4a4   :  { %2418 = vsyncpa [#allocation4 + $0x1], 1 }

</bundles_post_ra>
